<compile_context>
chip_gen: v5e
topology: v5e:2x2
jax: 0.10.0
libtpu: 0.0.40
codegen_flags: <defaults>
</compile_context>

<pallas_src>
import jax
import jax.numpy as jnp
from jax.experimental import pallas as pl
from jax.experimental.pallas import tpu as pltpu


# ---------------------------------------------------------------------------
# Phase 1: per-point feature MLP + per-batch max over points (global feature)
# ---------------------------------------------------------------------------
def feat_max_kernel(x_ref,                 # (bb, tn, 3)  f32
                    w1_ref, t1_ref,        # (3, 64) f32, (1, 64) f32   feat fc1 (+bn1)
                    w2_ref, t2_ref,        # (64, 128) bf16, (1, 128)   feat fc2 (+bn2)
                    w3_ref, t3_ref,        # (128, d) bf16, (1, d)      feat fc3 (+bn3), no ReLU
                    gf_ref):               # (bb, 1, d)  bf16  (resident max accumulator)
    ki = pl.program_id(1)
    bb, tn, _ = x_ref.shape
    f32 = jnp.float32
    bf16 = jnp.bfloat16

    # fc1 (3 -> 64): K=3 would waste the MXU, so do 3 broadcast FMAs on the VPU.
    x = x_ref[...]
    w1 = w1_ref[...]
    h1 = (x[:, :, 0:1] * w1[0:1, :]
          + x[:, :, 1:2] * w1[1:2, :]
          + x[:, :, 2:3] * w1[2:3, :]
          + t1_ref[...])
    h1 = jnp.maximum(h1, 0.0).reshape(bb * tn, 64).astype(bf16)

    h2 = jnp.dot(h1, w2_ref[...], preferred_element_type=f32) + t2_ref[...]
    h2 = jnp.maximum(h2, 0.0).astype(bf16)

    # fc3 (+bn3), no ReLU.  Cast to bf16 *before* the max: rounding is monotone
    # so the max is unchanged, and the largest intermediate halves in size.
    h3 = (jnp.dot(h2, w3_ref[...], preferred_element_type=f32)
          + t3_ref[...]).astype(bf16)                                   # (M, d)

    tile_max = jnp.max(h3.reshape(bb, tn, -1), axis=1, keepdims=True)   # (bb, 1, d)

    @pl.when(ki == 0)
    def _():
        gf_ref[...] = tile_max

    @pl.when(ki > 0)
    def _():
        gf_ref[...] = jnp.maximum(gf_ref[...], tile_max)


# ---------------------------------------------------------------------------
# Phase 2: batch-wide global-feature projection, gfp = gf @ Wseg1[64:] + shift.
# Computed once at M = B (instead of an M=bb matmul per grid step).
# ---------------------------------------------------------------------------
def global_proj_kernel(gf_ref, wg1b_ref, tg1_ref, out_ref):
    out_ref[...] = (jnp.dot(gf_ref[...], wg1b_ref[...],
                            preferred_element_type=jnp.float32)
                    + tg1_ref[...])


# ---------------------------------------------------------------------------
# Phase 3: segmentation head (feature1 recomputed on the VPU) + log-softmax
# ---------------------------------------------------------------------------
def seg_head_kernel(x_ref,                   # (bb, tn, 3)  f32
                    gfp_ref,                 # (bb, 1, 512) f32   gf @ Wseg1[64:] + shift
                    w1_ref, t1_ref,          # feat fc1 (+bn1)
                    wg1a_ref,                # (64, 512) bf16     Wseg1[:64]
                    wg2_ref, tg2_ref,        # (512, 256) bf16, (1, 256)
                    wg3_ref, tg3_ref,        # (256, 128) bf16, (1, 128)
                    wg4_ref, bg4_ref,        # (128, k) bf16, (1, k) f32
                    out_ref):                # (bb, tn, k)  f32
    bb, tn, _ = x_ref.shape
    f32 = jnp.float32
    bf16 = jnp.bfloat16

    # Recompute feature1 (h1): 3 VPU FMAs — cheaper than storing/streaming (B,N,64).
    x = x_ref[...]
    w1 = w1_ref[...]
    h1 = (x[:, :, 0:1] * w1[0:1, :]
          + x[:, :, 1:2] * w1[1:2, :]
          + x[:, :, 2:3] * w1[2:3, :]
          + t1_ref[...])
    h1 = jnp.maximum(h1, 0.0).reshape(bb * tn, 64).astype(bf16)

    # concat([feature1, broadcast(global_feat)], -1) @ Wseg1 as a split matmul;
    # the global half (incl. the fc1 shift) was precomputed batch-wide (gfp).
    y1 = jnp.dot(h1, wg1a_ref[...], preferred_element_type=f32)          # (M, 512)
    y1 = y1.reshape(bb, tn, -1) + gfp_ref[...]                           # broadcast over points
    y1 = jnp.maximum(y1, 0.0).reshape(bb * tn, -1).astype(bf16)

    y2 = jnp.dot(y1, wg2_ref[...], preferred_element_type=f32) + tg2_ref[...]
    y2 = jnp.maximum(y2, 0.0).astype(bf16)                               # (M, 256)

    y3 = jnp.dot(y2, wg3_ref[...], preferred_element_type=f32) + tg3_ref[...]
    y3 = jnp.maximum(y3, 0.0).astype(bf16)    # bf16 so fc4 is a native MXU matmul on v7x

    logits = jnp.dot(y3, wg4_ref[...], preferred_element_type=f32) + bg4_ref[...]

    # Stable log-softmax over classes.
    m = jnp.max(logits, axis=-1, keepdims=True)
    z = logits - m
    lse = jnp.log(jnp.sum(jnp.exp(z), axis=-1, keepdims=True))
    out_ref[...] = (z - lse).reshape(bb, tn, -1)


# ---------------------------------------------------------------------------
# Wrapper
# ---------------------------------------------------------------------------
_FEAT_WEIGHTS = ("w1", "t1", "w2", "t2", "w3", "t3")
_SEG_WEIGHTS = ("w1", "t1", "wg1a", "wg2", "tg2", "wg3", "tg3", "wg4", "bg4")


def _pick_tiles(B, N, target_rows=256):
    """Point-tile size tn and batch rows per step bb, so that M = bb*tn targets
    `target_rows` (fills the 256-row MXU on v6e/v7x; an M of 256 also runs at
    full efficiency on v5e's 128-row MXU as two M-tiles). bb drops to 1 as soon
    as a single point tile already provides enough rows (N >= 256)."""
    tn = N
    for cand in (512, 256, 128, 64, 32, 16, 8):
        if N % cand == 0:
            tn = cand
            break
    bb = max(1, min(B, target_rows // tn))
    while B % bb:
        bb -= 1
    return bb, tn


def _vmem_limit_bytes():
    """Generation-aware VMEM budget: ~3/4 of physical per-core VMEM, capped at
    96 MiB (=> 48 MiB on v7x's 64 MiB/TC, 96 MiB on v5e/v6e's 128 MiB)."""
    try:
        cap = pltpu.get_tpu_info().vmem_capacity_bytes
    except Exception:
        # Hardware-info query unavailable (e.g. interpret mode / older runtime):
        # fall back to the most conservative (v7x) physical size. This fallback
        # only affects a budget constant, never kernel correctness.
        cap = 64 * 1024 * 1024
    return int(min(96 * 1024 * 1024, cap * 3 // 4))


def pointnet_seg(x, params, *, k=2, target_rows=256):
    B, N, _ = x.shape
    d = params["w3"].shape[1]
    bb, tn = _pick_tiles(B, N, target_rows)
    grid = (B // bb, N // tn)
    vmem_limit = _vmem_limit_bytes()

    def full_spec(arr):
        nd = arr.ndim
        return pl.BlockSpec(arr.shape, lambda bi, ki, _nd=nd: (0,) * _nd)

    # ---- Phase 1: global feature gf (B, d) via per-batch max over point tiles.
    feat_w = [params[n] for n in _FEAT_WEIGHTS]
    gf = pl.pallas_call(
        feat_max_kernel,
        out_shape=jax.ShapeDtypeStruct((B, 1, d), jnp.bfloat16),
        grid_spec=pltpu.PrefetchScalarGridSpec(
            num_scalar_prefetch=0,
            grid=grid,
            in_specs=[pl.BlockSpec((bb, tn, 3), lambda bi, ki: (bi, ki, 0))]
                     + [full_spec(w) for w in feat_w],
            out_specs=pl.BlockSpec((bb, 1, d), lambda bi, ki: (bi, 0, 0)),
        ),
        compiler_params=pltpu.CompilerParams(
            dimension_semantics=("parallel", "arbitrary"),
            vmem_limit_bytes=vmem_limit,
        ),
    )(x, *feat_w)

    # ---- Phase 2: one (B, d) @ (d, 512) matmul for the global branch (+ shift).
    gfp = pl.pallas_call(
        global_proj_kernel,
        out_shape=jax.ShapeDtypeStruct((B, 512), jnp.float32),
        grid_spec=pltpu.PrefetchScalarGridSpec(
            num_scalar_prefetch=0,
            grid=(1,),
            in_specs=[pl.BlockSpec((B, d), lambda i: (0, 0)),
                      pl.BlockSpec(params["wg1b"].shape, lambda i: (0, 0)),
                      pl.BlockSpec(params["tg1"].shape, lambda i: (0, 0))],
            out_specs=pl.BlockSpec((B, 512), lambda i: (0, 0)),
        ),
        compiler_params=pltpu.CompilerParams(
            dimension_semantics=("arbitrary",),
            vmem_limit_bytes=vmem_limit,
        ),
    )(gf.reshape(B, d), params["wg1b"], params["tg1"])

    # ---- Phase 3: segmentation head per (batch block, point tile); independent
    # blocks => both grid axes parallel (megacore / 2-TC shardable).
    seg_w = [params[n] for n in _SEG_WEIGHTS]
    out = pl.pallas_call(
        seg_head_kernel,
        out_shape=jax.ShapeDtypeStruct((B, N, k), jnp.float32),
        grid_spec=pltpu.PrefetchScalarGridSpec(
            num_scalar_prefetch=0,
            grid=grid,
            in_specs=[pl.BlockSpec((bb, tn, 3), lambda bi, ki: (bi, ki, 0)),
                      pl.BlockSpec((bb, 1, 512), lambda bi, ki: (bi, 0, 0))]
                     + [full_spec(w) for w in seg_w],
            out_specs=pl.BlockSpec((bb, tn, k), lambda bi, ki: (bi, ki, 0)),
        ),
        compiler_params=pltpu.CompilerParams(
            dimension_semantics=("parallel", "parallel"),
            vmem_limit_bytes=vmem_limit,
        ),
    )(x, gfp.reshape(B, 1, 512), *seg_w)

    return out


# ---------------------------------------------------------------------------
# Deterministic parameters. Eval-mode BatchNorm1d is folded into each Linear:
#   y = ((x @ w + b) - mean) / sqrt(var+eps) * gamma + beta
#     =  x @ (w * scale) + (b * scale + shift)
# (Training-mode BN batch statistics are not modeled.)
# ---------------------------------------------------------------------------
def _bn_affine(key, c, eps=1e-5):
    k1, k2, k3, k4 = jax.random.split(key, 4)
    gamma = 1.0 + 0.1 * jax.random.normal(k1, (c,), jnp.float32)
    beta = 0.1 * jax.random.normal(k2, (c,), jnp.float32)
    mean = 0.1 * jax.random.normal(k3, (c,), jnp.float32)
    var = 1.0 + 0.1 * jax.random.uniform(k4, (c,), jnp.float32)
    scale = gamma / jnp.sqrt(var + eps)
    shift = beta - mean * scale
    return scale, shift


def _linear(key, cin, cout):
    kw, kb = jax.random.split(key)
    w = 0.1 * jax.random.normal(kw, (cin, cout), jnp.float32)
    b = 0.1 * jax.random.normal(kb, (cout,), jnp.float32)
    return w, b


def _fold(w, b, scale, shift):
    return w * scale[None, :], (b * scale + shift).reshape(1, -1)


def make_params(key, d=1024, k=2):
    """f32 params with eval-mode BN folded into every Linear."""
    keys = jax.random.split(key, 14)
    p = {}
    w, b = _linear(keys[0], 3, 64)
    p["w1"], p["t1"] = _fold(w, b, *_bn_affine(keys[1], 64))
    w, b = _linear(keys[2], 64, 128)
    p["w2"], p["t2"] = _fold(w, b, *_bn_affine(keys[3], 128))
    w, b = _linear(keys[4], 128, d)
    p["w3"], p["t3"] = _fold(w, b, *_bn_affine(keys[5], d))
    # Seg fc1 acts on concat([feature1 (64), global_feat (d)]): split its rows.
    w, b = _linear(keys[6], 64 + d, 512)
    wf, tf = _fold(w, b, *_bn_affine(keys[7], 512))
    p["wg1a"], p["wg1b"], p["tg1"] = wf[:64], wf[64:], tf
    w, b = _linear(keys[8], 512, 256)
    p["wg2"], p["tg2"] = _fold(w, b, *_bn_affine(keys[9], 256))
    w, b = _linear(keys[10], 256, 128)
    p["wg3"], p["tg3"] = _fold(w, b, *_bn_affine(keys[11], 128))
    w, b = _linear(keys[12], 128, k)
    p["wg4"], p["bg4"] = w, b.reshape(1, -1)
    return p


def cast_for_kernel(p):
    """bf16 for every MXU matmul weight (incl. fc4, for v7x's bf16-only MXU);
    shifts/biases and the VPU fc1 weight stay f32."""
    q = dict(p)
    for name in ("w2", "w3", "wg1a", "wg1b", "wg2", "wg3", "wg4"):
        q[name] = p[name].astype(jnp.bfloat16)
    return q


# Pure-JAX reference (same math; casts matmul inputs to the weight dtype so it
# can reproduce either the f32 model or the bf16-weight kernel precision).
def reference(x, p):
    f32 = jnp.float32
    B, N, _ = x.shape

    def lin(h, w, t):
        return jnp.dot(h.astype(w.dtype), w, preferred_element_type=f32) + t

    xf = x.reshape(B * N, 3)
    h1 = jnp.maximum(lin(xf, p["w1"], p["t1"]), 0.0)
    h2 = jnp.maximum(lin(h1, p["w2"], p["t2"]), 0.0)
    h3 = lin(h2, p["w3"], p["t3"])
    gf = jnp.max(h3.reshape(B, N, -1), axis=1)
    y1 = (jnp.dot(h1.astype(p["wg1a"].dtype), p["wg1a"],
                  preferred_element_type=f32).reshape(B, N, -1)
          + jnp.dot(gf.astype(p["wg1b"].dtype), p["wg1b"],
                    preferred_element_type=f32)[:, None, :]
          + p["tg1"])
    y1 = jnp.maximum(y1, 0.0).reshape(B * N, -1)
    y2 = jnp.maximum(lin(y1, p["wg2"], p["tg2"]), 0.0)
    y3 = jnp.maximum(lin(y2, p["wg3"], p["tg3"]), 0.0)
    logits = lin(y3, p["wg4"], p["bg4"])
    return jax.nn.log_softmax(logits, axis=-1).reshape(B, N, -1)


if __name__ == "__main__":
    B, N, k = 4, 128, 2
    key = jax.random.PRNGKey(0)
    kx, kp = jax.random.split(key)
    x = jax.random.normal(kx, (B, N, 3), jnp.float32)

    p32 = make_params(kp, d=1024, k=k)      # f32 model, BN folded
    params = cast_for_kernel(p32)           # bf16 matmul weights for the kernel

    out = jax.block_until_ready(pointnet_seg(x, params, k=k))

    ref_q = jax.block_until_ready(reference(x, params))   # matched bf16 precision
    ref_f = jax.block_until_ready(reference(x, p32))      # pure f32 model

    assert out.shape == (B, N, k)
    assert jnp.allclose(out, ref_q, atol=2e-3, rtol=2e-3), \
        "mismatch vs matched-precision JAX reference"
    assert jnp.allclose(out, ref_f, atol=3e-2, rtol=3e-2), \
        "mismatch vs f32 JAX reference"

    print("KERNEL_OK")
</pallas_src>

<mosaic_0001>
module attributes {stable_mosaic.version = 11 : i64} {
  func.func @feat_max_kernel(%arg0: i32, %arg1: i32, %arg2: memref<2x128x3xf32, #tpu.memory_space<vmem>>, %arg3: memref<3x64xf32, #tpu.memory_space<vmem>>, %arg4: memref<1x64xf32, #tpu.memory_space<vmem>>, %arg5: memref<64x128xbf16, #tpu.memory_space<vmem>>, %arg6: memref<1x128xf32, #tpu.memory_space<vmem>>, %arg7: memref<128x1024xbf16, #tpu.memory_space<vmem>>, %arg8: memref<1x1024xf32, #tpu.memory_space<vmem>>, %arg9: memref<2x1x1024xbf16, #tpu.memory_space<vmem>>) attributes {dimension_semantics = [#tpu.dimension_semantics<parallel>, #tpu.dimension_semantics<arbitrary>], iteration_bounds = array<i64: 2, 1>, scalar_prefetch = 0 : i64, scratch_operands = 0 : i64, tpu.core_type = #tpu.core_type<tc>, window_params = [{transform_indices = @transform_0, window_bounds = array<i64: 2, 128, 3>}, {pipeline_mode = #tpu.pipeline_mode<synchronous>, transform_indices = @transform_1, window_bounds = array<i64: 3, 64>}, {pipeline_mode = #tpu.pipeline_mode<synchronous>, transform_indices = @transform_2, window_bounds = array<i64: 1, 64>}, {pipeline_mode = #tpu.pipeline_mode<synchronous>, transform_indices = @transform_3, window_bounds = array<i64: 64, 128>}, {pipeline_mode = #tpu.pipeline_mode<synchronous>, transform_indices = @transform_4, window_bounds = array<i64: 1, 128>}, {pipeline_mode = #tpu.pipeline_mode<synchronous>, transform_indices = @transform_5, window_bounds = array<i64: 128, 1024>}, {pipeline_mode = #tpu.pipeline_mode<synchronous>, transform_indices = @transform_6, window_bounds = array<i64: 1, 1024>}, {transform_indices = @transform_7, window_bounds = array<i64: 2, 1, 1024>}]} {
    %c0 = arith.constant 0 : index
    %c0_0 = arith.constant 0 : index
    %c0_1 = arith.constant 0 : index
    %0 = vector.load %arg2[%c0, %c0_0, %c0_1] : memref<2x128x3xf32, #tpu.memory_space<vmem>>, vector<2x128x3xf32>
    %c0_2 = arith.constant 0 : index
    %c0_3 = arith.constant 0 : index
    %1 = vector.load %arg3[%c0_2, %c0_3] : memref<3x64xf32, #tpu.memory_space<vmem>>, vector<3x64xf32>
    %2 = vector.extract_strided_slice %0 {offsets = [0, 0, 0], sizes = [2, 128, 1], strides = [1, 1, 1]} : vector<2x128x3xf32> to vector<2x128x1xf32>
    %3 = vector.extract_strided_slice %1 {offsets = [0, 0], sizes = [1, 64], strides = [1, 1]} : vector<3x64xf32> to vector<1x64xf32>
    %4 = vector.shape_cast %3 : vector<1x64xf32> to vector<1x1x64xf32>
    %5 = vector.broadcast %2 : vector<2x128x1xf32> to vector<2x128x64xf32>
    %6 = vector.broadcast %4 : vector<1x1x64xf32> to vector<2x128x64xf32>
    %7 = arith.mulf %5, %6 : vector<2x128x64xf32>
    %8 = vector.extract_strided_slice %0 {offsets = [0, 0, 1], sizes = [2, 128, 1], strides = [1, 1, 1]} : vector<2x128x3xf32> to vector<2x128x1xf32>
    %9 = vector.extract_strided_slice %1 {offsets = [1, 0], sizes = [1, 64], strides = [1, 1]} : vector<3x64xf32> to vector<1x64xf32>
    %10 = vector.shape_cast %9 : vector<1x64xf32> to vector<1x1x64xf32>
    %11 = vector.broadcast %8 : vector<2x128x1xf32> to vector<2x128x64xf32>
    %12 = vector.broadcast %10 : vector<1x1x64xf32> to vector<2x128x64xf32>
    %13 = arith.mulf %11, %12 : vector<2x128x64xf32>
    %14 = arith.addf %7, %13 : vector<2x128x64xf32>
    %15 = vector.extract_strided_slice %0 {offsets = [0, 0, 2], sizes = [2, 128, 1], strides = [1, 1, 1]} : vector<2x128x3xf32> to vector<2x128x1xf32>
    %16 = vector.extract_strided_slice %1 {offsets = [2, 0], sizes = [1, 64], strides = [1, 1]} : vector<3x64xf32> to vector<1x64xf32>
    %17 = vector.shape_cast %16 : vector<1x64xf32> to vector<1x1x64xf32>
    %18 = vector.broadcast %15 : vector<2x128x1xf32> to vector<2x128x64xf32>
    %19 = vector.broadcast %17 : vector<1x1x64xf32> to vector<2x128x64xf32>
    %20 = arith.mulf %18, %19 : vector<2x128x64xf32>
    %21 = arith.addf %14, %20 : vector<2x128x64xf32>
    %c0_4 = arith.constant 0 : index
    %c0_5 = arith.constant 0 : index
    %22 = vector.load %arg4[%c0_4, %c0_5] : memref<1x64xf32, #tpu.memory_space<vmem>>, vector<1x64xf32>
    %23 = vector.shape_cast %22 : vector<1x64xf32> to vector<1x1x64xf32>
    %24 = vector.broadcast %23 : vector<1x1x64xf32> to vector<2x128x64xf32>
    %25 = arith.addf %21, %24 : vector<2x128x64xf32>
    %cst = arith.constant 0.000000e+00 : f32
    %26 = vector.broadcast %cst : f32 to vector<2x128x64xf32>
    %27 = arith.maximumf %25, %26 : vector<2x128x64xf32>
    %28 = vector.shape_cast %27 : vector<2x128x64xf32> to vector<256x64xf32>
    %29 = arith.truncf %28 : vector<256x64xf32> to vector<256x64xbf16>
    %c0_6 = arith.constant 0 : index
    %c0_7 = arith.constant 0 : index
    %30 = vector.load %arg5[%c0_6, %c0_7] : memref<64x128xbf16, #tpu.memory_space<vmem>>, vector<64x128xbf16>
    %cst_8 = arith.constant dense<0.000000e+00> : vector<256x128xf32>
    %31 = tpu.matmul %29, %30, %cst_8 {dimension_numbers = #tpu.dot_dimension_numbers<[1], [0], [0], [1], [0, 0, 1, 1], [], []>} : vector<256x64xbf16>, vector<64x128xbf16>, vector<256x128xf32> -> vector<256x128xf32>
    %c0_9 = arith.constant 0 : index
    %c0_10 = arith.constant 0 : index
    %32 = vector.load %arg6[%c0_9, %c0_10] : memref<1x128xf32, #tpu.memory_space<vmem>>, vector<1x128xf32>
    %33 = vector.broadcast %32 : vector<1x128xf32> to vector<256x128xf32>
    %34 = arith.addf %31, %33 : vector<256x128xf32>
    %cst_11 = arith.constant 0.000000e+00 : f32
    %35 = vector.broadcast %cst_11 : f32 to vector<256x128xf32>
    %36 = arith.maximumf %34, %35 : vector<256x128xf32>
    %37 = arith.truncf %36 : vector<256x128xf32> to vector<256x128xbf16>
    %c0_12 = arith.constant 0 : index
    %c0_13 = arith.constant 0 : index
    %38 = vector.load %arg7[%c0_12, %c0_13] : memref<128x1024xbf16, #tpu.memory_space<vmem>>, vector<128x1024xbf16>
    %cst_14 = arith.constant dense<0.000000e+00> : vector<256x1024xf32>
    %39 = tpu.matmul %37, %38, %cst_14 {dimension_numbers = #tpu.dot_dimension_numbers<[1], [0], [0], [1], [0, 0, 1, 1], [], []>} : vector<256x128xbf16>, vector<128x1024xbf16>, vector<256x1024xf32> -> vector<256x1024xf32>
    %c0_15 = arith.constant 0 : index
    %c0_16 = arith.constant 0 : index
    %40 = vector.load %arg8[%c0_15, %c0_16] : memref<1x1024xf32, #tpu.memory_space<vmem>>, vector<1x1024xf32>
    %41 = vector.broadcast %40 : vector<1x1024xf32> to vector<256x1024xf32>
    %42 = arith.addf %39, %41 : vector<256x1024xf32>
    %43 = arith.truncf %42 : vector<256x1024xf32> to vector<256x1024xbf16>
    %44 = vector.shape_cast %43 : vector<256x1024xbf16> to vector<2x128x1024xbf16>
    %cst_17 = arith.constant dense<0xFF80> : vector<2x1024xbf16>
    %45 = vector.multi_reduction <maximumf>, %44, %cst_17 [1] : vector<2x128x1024xbf16> to vector<2x1024xbf16>
    %46 = vector.shape_cast %45 : vector<2x1024xbf16> to vector<2x1x1024xbf16>
    %c0_i32 = arith.constant 0 : i32
    %47 = arith.cmpi eq, %arg1, %c0_i32 : i32
    %48 = arith.extui %47 : i1 to i32
    %c0_i32_18 = arith.constant 0 : i32
    %49 = arith.cmpi ne, %48, %c0_i32_18 : i32
    scf.if %49 {
      %c0_21 = arith.constant 0 : index
      %c0_22 = arith.constant 0 : index
      %c0_23 = arith.constant 0 : index
      %53 = vector.load %arg9[%c0_21, %c0_22, %c0_23] : memref<2x1x1024xbf16, #tpu.memory_space<vmem>>, vector<2x1x1024xbf16>
      tpu.vector_store %arg9[%c0_21, %c0_22, %c0_23], %46 {strides = array<i32>} : memref<2x1x1024xbf16, #tpu.memory_space<vmem>>, vector<2x1x1024xbf16>,
    } else {
    }
    %c0_i32_19 = arith.constant 0 : i32
    %50 = arith.cmpi sgt, %arg1, %c0_i32_19 : i32
    %51 = arith.extui %50 : i1 to i32
    %c0_i32_20 = arith.constant 0 : i32
    %52 = arith.cmpi ne, %51, %c0_i32_20 : i32
    scf.if %52 {
      %c0_21 = arith.constant 0 : index
      %c0_22 = arith.constant 0 : index
      %c0_23 = arith.constant 0 : index
      %53 = vector.load %arg9[%c0_21, %c0_22, %c0_23] : memref<2x1x1024xbf16, #tpu.memory_space<vmem>>, vector<2x1x1024xbf16>
      %54 = arith.maximumf %53, %46 : vector<2x1x1024xbf16>
      %c0_24 = arith.constant 0 : index
      %c0_25 = arith.constant 0 : index
      %c0_26 = arith.constant 0 : index
      %55 = vector.load %arg9[%c0_24, %c0_25, %c0_26] : memref<2x1x1024xbf16, #tpu.memory_space<vmem>>, vector<2x1x1024xbf16>
      tpu.vector_store %arg9[%c0_24, %c0_25, %c0_26], %54 {strides = array<i32>} : memref<2x1x1024xbf16, #tpu.memory_space<vmem>>, vector<2x1x1024xbf16>,
    } else {
    }
    return
  }
  func.func @transform_0(%arg0: i32, %arg1: i32) -> (i32, i32, i32) {
    %c0_i32 = arith.constant 0 : i32
    %c0_i32_0 = arith.constant 0 : i32
    return %arg0, %arg1, %c0_i32 : i32, i32, i32
  }
  func.func @transform_1(%arg0: i32, %arg1: i32) -> (i32, i32) {
    %c0_i32 = arith.constant 0 : i32
    %c0_i32_0 = arith.constant 0 : i32
    %c0_i32_1 = arith.constant 0 : i32
    return %c0_i32, %c0_i32_0 : i32, i32
  }
  func.func @transform_2(%arg0: i32, %arg1: i32) -> (i32, i32) {
    %c0_i32 = arith.constant 0 : i32
    %c0_i32_0 = arith.constant 0 : i32
    %c0_i32_1 = arith.constant 0 : i32
    return %c0_i32, %c0_i32_0 : i32, i32
  }
  func.func @transform_3(%arg0: i32, %arg1: i32) -> (i32, i32) {
    %c0_i32 = arith.constant 0 : i32
    %c0_i32_0 = arith.constant 0 : i32
    %c0_i32_1 = arith.constant 0 : i32
    return %c0_i32, %c0_i32_0 : i32, i32
  }
  func.func @transform_4(%arg0: i32, %arg1: i32) -> (i32, i32) {
    %c0_i32 = arith.constant 0 : i32
    %c0_i32_0 = arith.constant 0 : i32
    %c0_i32_1 = arith.constant 0 : i32
    return %c0_i32, %c0_i32_0 : i32, i32
  }
  func.func @transform_5(%arg0: i32, %arg1: i32) -> (i32, i32) {
    %c0_i32 = arith.constant 0 : i32
    %c0_i32_0 = arith.constant 0 : i32
    %c0_i32_1 = arith.constant 0 : i32
    return %c0_i32, %c0_i32_0 : i32, i32
  }
  func.func @transform_6(%arg0: i32, %arg1: i32) -> (i32, i32) {
    %c0_i32 = arith.constant 0 : i32
    %c0_i32_0 = arith.constant 0 : i32
    %c0_i32_1 = arith.constant 0 : i32
    return %c0_i32, %c0_i32_0 : i32, i32
  }
  func.func @transform_7(%arg0: i32, %arg1: i32) -> (i32, i32, i32) {
    %c0_i32 = arith.constant 0 : i32
    %c0_i32_0 = arith.constant 0 : i32
    %c0_i32_1 = arith.constant 0 : i32
    return %arg0, %c0_i32, %c0_i32_0 : i32, i32, i32
  }
}

</mosaic_0001>

<bundles_post_ra>
// kernel: tpu_custom_call.1
= control target key start
LH: loop header
LB: loop body
LE: loop exit
PB: predicated region body
PF: predicated region fallthrough
CT: control target
= control target key end

     0   :  { %12 = vsyncpa [#allocation3], 0  ;;  %s4101_s24 = smov 0   ;;  %s4103_s25 = smov 0   ;;  %s5779_s0 = inlined_call_operand.vmem [shape: f32[4,128,3], index: 0, kind: input, shape index: {}]   ;;  %s5780_s1 = inlined_call_operand.vmem [shape: f32[3,64], index: 1, kind: input, shape index: {}]   ;;  %s5781_s2 = inlined_call_operand.vmem [shape: f32[1,64], index: 2, kind: input, shape index: {}]   ;;  %s5782_s3 = inlined_call_operand.hbm [shape: bf16[64,128], index: 3, kind: input, shape index: {}]   ;;  %s5783_s4 = inlined_call_operand.vmem [shape: f32[1,128], index: 4, kind: input, shape index: {}]   ;;  %s5784_s5 = inlined_call_operand.vmem [shape: bf16[128,1024], index: 5, kind: input, shape index: {}]   ;;  %s5785_s6 = inlined_call_operand.vmem [shape: f32[1,1024], index: 6, kind: input, shape index: {}]   ;;  %s5786_s7 = inlined_call_operand.vmem [shape: bf16[4,1,1024], index: 7, kind: output, shape index: {}]  }
   0x1   :  { %s4105_s26 = smov 0  }
   0x2 LB: > { %s3491_s27 = sadd.s32 4294967295, %s4053_s26   ;;  %s30_s28 = sadd.s32 1, %s4049_s25  ;;  %s4053_s26 = sphi %s4105_s26, %s18_s26   ;;  %s4049_s25 = sphi %s4103_s25, %s5808_s25   ;;  %s4045_s24 = sphi %s4101_s24, %s5807_s24  }
   0x3   : > { %p32_p0 = scmp.ge.s32.totalorder %s30_s28, 2  ;;  %p3493_p1 = scmp.ge.s32.totalorder %s4053_s26, 1 }
   0x4   : > { %p215_p2 = scmp.lt.s32.totalorder %s4053_s26, 3  ;;  %p3890_p4 = scmp.eq.s32.totalorder %s3491_s27, 0 }
   0x5   : > { %s5810_s28 = smov (%p32_p0, %s30_s28), 0  ;;  %s232_s8 = sshll.u32 %s5782_s3, 4  ;;  %s233_s8 = int_to_ptr.hbm [resolvable:$true] %s232_s8 }
   0x6   : > { %p216_p3 = pnand %p3493_p1, %p215_p2  ;;  %s4055_s9 = smov [#allocation2]  }
   0x7   : > { %s234_s10 = sshll.u32 %s4055_s9, 4  ;;  %s4056_s11 = smov 64   ;;  %s235_s10 = int_to_ptr.vmem [resolvable:$true] %s234_s10 }
   0x8   : > { %p3886_p5 = pneg %p216_p3  ;;  %s4057_s12 = smov 4  }
   0x9   : > { %274 = sbr.rel (%p216_p3) target bundleno = 1137 (0x471), region = 48 }
   0xa   : > { %p3887_p6 = pnand %p3890_p4, %p3886_p5 }
   0xc   : > { %3889 = dma.hbm_to_vmem [thread:$0]  (!%p3887_p6), %s233_s8, 512, %s235_s10, [#allocation3], %s4056_s11, %s4056_s11, %s4057_s12  }
   0xe   : > { %4040 = dma.done.wait (%p3890_p4), [#allocation3], 512  }
   0xf   : > { %4042 = vsyncadd (%p3890_p4), [#allocation3], 4294966784  ;;  %s3498_s13 = sshll.u32 %s4045_s24, 1  ;;  %v4058_v0 = vmov 2   ;;  %v4059_v1 = vmov 1   ;;  %v4060_v2 = vmov 0  }
  0x10   : > { %3924 = vset.pattern.permute.xlu2 %v4058_v0  ;;  %3923 = vset.pattern.permute.xlu1 %v4059_v1  ;;  %p314_p7 = scmp.lt.s32.totalorder %s3498_s13, 3  ;;  %v3797_v18 = vld [vmem:[#allocation2 + $0x18] sm:$0xff]  ;;  %v3796_v20 = vld [vmem:[#allocation2 + $0x10] sm:$0xff]  ;;  %v3795_v21 = vld [vmem:[#allocation2 + $0x8] sm:$0xff]  ;;  %vm1063_vm0 = vcmask 523264   ;;  %vm3121_vm1 = vcmask 1042434  }
  0x11   : > { %3922 = vset.pattern.permute.xlu0 %v4060_v2  ;;  %1116 = vmatpush.bf16.msra.mxu0 %v3797_v18  ;;  %v3794_v23 = vld [vmem:[#allocation2] sm:$0xff]  ;;  %vm3117_vm2 = vcmask 1040384   ;;  %vm3125_vm3 = vcmask 1041408   ;;  %vm3157_vm4 = vsmask.f32 256  ;;  %vm3159_vm5 = vcmask 1041409  }
  0x12   : > { %s5812_s13 = smov (!%p314_p7, %s3498_s13), 3  ;;  %3862 = vmatpush.bf16.msra.mxu1 %v3797_v18  ;;  %3864 = vmatpush.bf16.msra.mxu3 %v3797_v18  ;;  %v363_v26 = vld [vmem:[%s5780_s1] sm:$0x7]  ;;  %vm3160_vm6 = vsmask.f32 1280  ;;  %vm5561_vm8 = vmand %vm3117_vm2, %vm3157_vm4  ;;  %vm3167_vm12 = vcmask 1043459  }
  0x13   : > { %s3793_s14 = sshll.u32 %s5812_s13, 7  ;;  %3863 = vmatpush.bf16.msra.mxu2 %v3797_v18  ;;  %v4196_v27 = vperm.slane %v363_v26, 1  ;;  %v4198_v28 = vperm.slane %v363_v26, 0  ;;  %v4202_v32 = vperm.slane %v363_v26, 2  ;;  %v4220_v44 = vld [vmem:[%s5781_s2] ss:$0 sm:$0xff]  ;;  %vm5567_vm9 = vmand %vm3159_vm5, %vm3160_vm6 }
  0x14   : > { %s4135_s17 = scalar_lea.vmem %s5779_s0, %s3793_s14  ;;  %vm3164_vm7 = vsmask.f32 2304  ;;  %vm3162_vm11 = vmor %vm5567_vm9, %vm5561_vm8  ;;  %vm3168_vm13 = vsmask.f32 3328  ;;  %vm3175_vm4 = vcmask 1045509   ;;  %vm3131_vm9 = vcmask 1046534  }
  0x15   : > { %v331_v3 = vld [vmem:[%s4135_s17] sm:$0xff]  ;;  %v332_v4 = vld [vmem:[%s4135_s17 + $0x8] sm:$0xff]  ;;  %v333_v5 = vld [vmem:[%s4135_s17 + $0x10] sm:$0xff]  ;;  %1117 = vmatpush.bf16.msra.mxu0 %v3796_v20  ;;  %vm3176_vm5 = vsmask.f32 5376  ;;  %s3502_s23 = sshll.u32 %s5812_s13, 3 }
  0x16   : > { %751 = vperm.xlu2 %3924, %v331_v3   ;;  %558 = vperm.xlu1 %3923, %v331_v3   ;;  %v334_v6 = vld [vmem:[%s4135_s17 + $0x18] sm:$0xff]  ;;  %v340_v7 = vld [vmem:[%s4135_s17 + $0x48] sm:$0xff]  ;;  %v4147_v8 = vld [vmem:[%s4135_s17 + $0x50] sm:$0xff]  ;;  %vm3180_vm6 = vsmask.f32 6400  ;;  %s5655_s27 = scalar_lea.vmem %s5786_s7, %s3502_s23 }
  0x17   : > { %366 = vperm.xlu0 %3922, %v331_v3   ;;  %v336_v9 = vld [vmem:[%s4135_s17 + $0x28] sm:$0xff]  ;;  %v335_v10 = vld [vmem:[%s4135_s17 + $0x20] sm:$0xff]  ;;  %v338_v11 = vld [vmem:[%s4135_s17 + $0x38] sm:$0xff]  ;;  %3865 = vmatpush.bf16.msra.mxu1 %v3796_v20 }
  0x18   : > { %v337_v12 = vld [vmem:[%s4135_s17 + $0x30] sm:$0xff]  ;;  %v342_v13 = vld [vmem:[%s4135_s17 + $0x58] sm:$0xff]  ;;  %v4165_v14 = vld [vmem:[%s4135_s17 + $0xc0] sm:$0xff]  ;;  %3867 = vmatpush.bf16.msra.mxu3 %v3796_v20  ;;  %3866 = vmatpush.bf16.msra.mxu2 %v3796_v20 }
  0x19   : > { %v339_v15 = vld [vmem:[%s4135_s17 + $0x40] sm:$0xff]  ;;  %v4172_v16 = vld [vmem:[%s4135_s17 + $0xd0] sm:$0xff]  ;;  %1118 = vmatpush.bf16.msra.mxu0 %v3795_v21  ;;  %v356_v24 = vld [vmem:[%s4135_s17 + $0xc8] sm:$0xff] }
  0x1a   : > { %v4177_v17 = vld [vmem:[%s4135_s17 + $0xe0] sm:$0xff]  ;;  %v4213_v41 = vld [vmem:[%s4135_s17 + $0xd8] sm:$0xff]  ;;  %v344_v52 = vld [vmem:[%s4135_s17 + $0x68] sm:$0xff] }
  0x1b   : > { %3868 = vmatpush.bf16.msra.mxu1 %v3795_v21  ;;  %v343_v30 = vld [vmem:[%s4135_s17 + $0x60] sm:$0xff]  ;;  %v4232_v56 = vld [vmem:[%s4135_s17 + $0x70] sm:$0xff]  ;;  %v4243_v61 = vld [vmem:[%s4135_s17 + $0xe8] sm:$0xff] }
  0x1c   : > { %3870 = vmatpush.bf16.msra.mxu3 %v3795_v21  ;;  %3869 = vmatpush.bf16.msra.mxu2 %v3795_v21  ;;  %v351_v3 = vld [vmem:[%s4135_s17 + $0xa0] sm:$0xff]  ;;  %vm5576_vm10 = vmand %vm3121_vm1, %vm3164_vm7 }
  0x1d   : > { %1119 = vmatpush.bf16.msra.mxu0 %v3794_v23  ;;  %vm5588_vm14 = vmor %vm5576_vm10, %vm3162_vm11 }
  0x1e   : > { %755 = vperm.xlu2 %3924, %v332_v4   ;;  %562 = vperm.xlu1 %3923, %v332_v4   ;;  %vm5595_vm15 = vmand %vm3167_vm12, %vm3168_vm13  ;;  %vm3183_vm12 = vcmask 1047559   ;;  %vm3184_vm13 = vsmask.f32 7424 }
  0x1f   : > { %371 = vperm.xlu0 %3922, %v332_v4   ;;  %3871 = vmatpush.bf16.msra.mxu1 %v3794_v23  ;;  %vm5620_vm8 = vmand %vm3175_vm4, %vm3176_vm5 }
  0x20   : > { %3873 = vmatpush.bf16.msra.mxu3 %v3794_v23  ;;  %3872 = vmatpush.bf16.msra.mxu2 %v3794_v23  ;;  %vm5625_vm10 = vmand %vm3131_vm9, %vm3180_vm6 }
  0x26   : > { %3926 = vset.pattern.permute.xlu2 %v4059_v1  ;;  %3925 = vset.pattern.permute.xlu1 %v4060_v2 }
  0x27   : > { %376 = vperm.xlu0 %3922, %v333_v5   ;;  %566 = vperm.xlu2 %3926, %v333_v5  }
  0x28   : > { %381 = vperm.xlu1 %3925, %v334_v6  }
  0x2f   : > { %411 = vperm.xlu0 %3922, %v340_v7   ;;  %3928 = vset.pattern.permute.xlu2 %v4058_v0 }
  0x30   : > { %3927 = vset.pattern.permute.xlu1 %v4058_v0  ;;  %763 = vperm.xlu2 %3928, %v334_v6  }
  0x31   : > { %759 = vperm.xlu1 %3927, %v333_v5   ;;  %v4256_v5 = vld [vmem:[%s4135_s17 + $0x80] sm:$0xff] }
  0x37   : > { %416 = vperm.xlu0 %3922, %v4147_v8  }
  0x38   : > { %3930 = vset.pattern.permute.xlu2 %v4060_v2 }
  0x39   : > { %3929 = vset.pattern.permute.xlu1 %v4060_v2  ;;  %391 = vperm.xlu2 %3930, %v336_v9  }
  0x3a   : > { %386 = vperm.xlu1 %3929, %v335_v10  }
  0x3f   : > { %3943 = vset.pattern.permute.xlu0 %v4059_v1 }
  0x40   : > { %570 = vperm.xlu0 %3943, %v334_v6  }
  0x41   : > { %3932 = vset.pattern.permute.xlu2 %v4058_v0 }
  0x42   : > { %3931 = vset.pattern.permute.xlu1 %v4059_v1  ;;  %767 = vperm.xlu2 %3932, %v335_v10  }
  0x43   : > { %578 = vperm.xlu1 %3931, %v336_v9  }
  0x48   : > { %574 = vperm.xlu0 %3943, %v335_v10  }
  0x4a   : > { %3934 = vset.pattern.permute.xlu2 %v4060_v2 }
  0x4b   : > { %3933 = vset.pattern.permute.xlu1 %v4060_v2  ;;  %401 = vperm.xlu2 %3934, %v338_v11  }
  0x4c   : > { %396 = vperm.xlu1 %3933, %v337_v12  }
  0x50   : > { %602 = vperm.xlu0 %3943, %v342_v13  }
  0x53   : > { %3936 = vset.pattern.permute.xlu2 %v4059_v1 }
  0x54   : > { %3935 = vset.pattern.permute.xlu1 %v4059_v1  ;;  %586 = vperm.xlu2 %3936, %v338_v11  }
  0x55   : > { %582 = vperm.xlu1 %3935, %v337_v12  }
  0x58   : > { %654 = vperm.xlu0 %3943, %v4165_v14  }
  0x5c   : > { %3938 = vset.pattern.permute.xlu2 %v4060_v2 }
  0x5d   : > { %3937 = vset.pattern.permute.xlu1 %v4058_v0  ;;  %406 = vperm.xlu2 %3938, %v339_v15  }
  0x5e   : > { %779 = vperm.xlu1 %3937, %v338_v11  }
  0x60   : > { %662 = vperm.xlu0 %3943, %v4172_v16  }
  0x65   : > { %3940 = vset.pattern.permute.xlu2 %v4059_v1 }
  0x66   : > { %3939 = vset.pattern.permute.xlu1 %v4059_v1  ;;  %594 = vperm.xlu2 %3940, %v340_v7  }
  0x67   : > { %590 = vperm.xlu1 %3939, %v339_v15  }
  0x68   : > { %670 = vperm.xlu0 %3943, %v4177_v17  }
  0x6e   : > { %3942 = vset.pattern.permute.xlu2 %v4058_v0 }
  0x6f   : > { %3941 = vset.pattern.permute.xlu1 %v4058_v0  ;;  %787 = vperm.xlu2 %3942, %v340_v7  }
  0x70   : > { %783 = vperm.xlu1 %3941, %v339_v15   ;;  %3972 = vset.pattern.permute.xlu0 %v4058_v0  ;;  %v752_v19 = vpop.permute.xlu2 %751 }
  0x71   : > { %771 = vperm.xlu0 %3972, %v336_v9   ;;  %v879_v36 = vmul.f32 %v4202_v32, %v752_v19 }
  0x77   : > { %3945 = vset.pattern.permute.xlu2 %v4059_v1 }
  0x78   : > { %3944 = vset.pattern.permute.xlu1 %v4060_v2  ;;  %598 = vperm.xlu2 %3945, %v4147_v8   ;;  %v756_v22 = vpop.permute.xlu2 %755 }
  0x79   : > { %421 = vperm.xlu1 %3944, %v342_v13   ;;  %775 = vperm.xlu0 %3972, %v337_v12   ;;  %v880_v46 = vmul.f32 %v4202_v32, %v756_v22  ;;  %v352_v22 = vld [vmem:[%s4135_s17 + $0xa8] sm:$0xff] }
  0x80   : > { %3947 = vset.pattern.permute.xlu2 %v4058_v0 }
  0x81   : > { %3946 = vset.pattern.permute.xlu1 %v4058_v0  ;;  %795 = vperm.xlu2 %3947, %v342_v13   ;;  %v4190_v25 = vpop.permute.xlu2 %566 }
  0x82   : > { %791 = vperm.xlu1 %3946, %v4147_v8   ;;  %851 = vperm.xlu0 %3972, %v356_v24   ;;  %v688_v6 = vmul.f32 %v4196_v27, %v4190_v25 }
  0x88   : > { %v559_v29 = vpop.permute.xlu1 %558 }
  0x89   : > { %v367_v31 = vpop.permute.xlu0 %366  ;;  %3949 = vset.pattern.permute.xlu2 %v4060_v2  ;;  %v686_v33 = vmul.f32 %v4196_v27, %v559_v29 }
  0x8a   : > { %v525_v34 = vmul.f32 %v4198_v28, %v367_v31  ;;  %3948 = vset.pattern.permute.xlu1 %v4060_v2  ;;  %491 = vperm.xlu2 %3949, %v356_v24   ;;  %v4207_v35 = vpop.permute.xlu2 %763 }
  0x8b   : > { %486 = vperm.xlu1 %3948, %v4165_v14   ;;  %799 = vperm.xlu0 %3972, %v343_v30   ;;  %v882_v15 = vmul.f32 %v4202_v32, %v4207_v35 }
  0x8c   : > { %v718_v37 = vadd.f32 %v686_v33, %v525_v34 }
  0x8e   : > { %v911_v42 = vadd.f32 %v879_v36, %v718_v37 }
  0x90   : > { %v563_v38 = vpop.permute.xlu1 %562  ;;  %v947_v49 = vadd.f32 %v4220_v44, %v911_v42  ;;  %v346_v42 = vld [vmem:[%s4135_s17 + $0x78] sm:$0xff] }
  0x91   : > { %v687_v39 = vmul.f32 %v4196_v27, %v563_v38  ;;  %v372_v40 = vpop.permute.xlu0 %371 }
  0x92   : > { %v526_v43 = vmul.f32 %v4198_v28, %v372_v40  ;;  %3951 = vset.pattern.permute.xlu2 %v4058_v0  ;;  %v979_v54 = vmax.f32 %v947_v49, 0.0 }
  0x93   : > { %3950 = vset.pattern.permute.xlu1 %v4059_v1  ;;  %847 = vperm.xlu2 %3951, %v4165_v14   ;;  %v4224_v45 = vpop.permute.xlu2 %391 }
  0x94   : > { %v719_v47 = vadd.f32 %v687_v39, %v526_v43  ;;  %658 = vperm.xlu1 %3950, %v356_v24   ;;  %859 = vperm.xlu0 %3972, %v4213_v41  }
  0x96   : > { %v912_v48 = vadd.f32 %v880_v46, %v719_v47  ;;  %v4309_v47 = vld [vmem:[%s4135_s17 + $0xb8] sm:$0xff] }
  0x98   : > { %v948_v50 = vadd.f32 %v4220_v44, %v912_v48 }
  0x99   : > { %v377_v51 = vpop.permute.xlu0 %376 }
  0x9a   : > { %v382_v53 = vpop.permute.xlu1 %381  ;;  %v980_v55 = vmax.f32 %v948_v50, 0.0  ;;  %v527_v7 = vmul.f32 %v4198_v28, %v377_v51 }
  0x9b   : > { %3953 = vset.pattern.permute.xlu2 %v4060_v2  ;;  %v528_v12 = vmul.f32 %v4198_v28, %v382_v53 }
  0x9c   : > { %3952 = vset.pattern.permute.xlu1 %v4060_v2  ;;  %431 = vperm.xlu2 %3953, %v344_v52   ;;  %v1011_v57 = vpack.c.bf16 %v980_v55, %v979_v54  ;;  %v4236_v58 = vpop.permute.xlu2 %767  ;;  %v720_v10 = vadd.f32 %v688_v6, %v527_v7  ;;  %v3855_v7 = vld [vmem:[%s5784_s5 + $0x1cc] sm:$0xf] }
  0x9d   : > { %426 = vperm.xlu1 %3952, %v343_v30   ;;  %807 = vperm.xlu0 %3972, %v4232_v56   ;;  %v883_v50 = vmul.f32 %v4202_v32, %v4236_v58 }
  0x9e   : > { %3519 = vmatmul.msk.bf16.vlgmr.msra.gmra.mxu0 %vm1063_vm0, %v1011_v57 }
  0xa1   : > { %v4240_v59 = vpop.permute.xlu0 %411 }
  0xa3   : > { %v760_v60 = vpop.permute.xlu1 %759 }
  0xa4   : > { %3955 = vset.pattern.permute.xlu2 %v4059_v1  ;;  %v881_v9 = vmul.f32 %v4202_v32, %v760_v60 }
  0xa5   : > { %3954 = vset.pattern.permute.xlu1 %v4059_v1  ;;  %610 = vperm.xlu2 %3955, %v344_v52   ;;  %v4247_v62 = vpop.permute.xlu2 %401 }
  0xa6   : > { %606 = vperm.xlu1 %3954, %v343_v30   ;;  %867 = vperm.xlu0 %3972, %v4243_v61   ;;  %v913_v13 = vadd.f32 %v881_v9, %v720_v10  ;;  %v3771_v9 = vld [vmem:[%s5784_s5 + $0x1e8] sm:$0xf0] }
  0xa7   : > { %v3774_v10 = vor.u32 %v3855_v7, %v3771_v9 }
  0xa8   : > { %v949_v20 = vadd.f32 %v4220_v44, %v913_v13  ;;  %v532_v13 = vmul.f32 %v4198_v28, %v4247_v62 }
  0xa9   : > { %v4250_v63 = vpop.permute.xlu0 %416  ;;  %1918 = vmatpush.bf16.msrb.mxu0 %v3774_v10  ;;  %v3823_v10 = vld [vmem:[%s5784_s5 + $0xcc] sm:$0xf] }
  0xaa   : > { %v981_v26 = vmax.f32 %v949_v20, 0.0 }
  0xac   : > { %v4253_v4 = vpop.permute.xlu1 %386 }
  0xad   : > { %3957 = vset.pattern.permute.xlu2 %v4060_v2  ;;  %v529_v48 = vmul.f32 %v4198_v28, %v4253_v4 }
  0xae   : > { %3956 = vset.pattern.permute.xlu1 %v4058_v0  ;;  %466 = vperm.xlu2 %3957, %v351_v3   ;;  %v4263_v8 = vpop.permute.xlu2 %586 }
  0xaf   : > { %803 = vperm.xlu1 %3956, %v344_v52   ;;  %815 = vperm.xlu0 %3972, %v4256_v5   ;;  %v530_v52 = vmul.f32 %v4198_v28, %v4224_v45  ;;  %v4330_v45 = vld [vmem:[%s4135_s17 + $0xb0] sm:$0xff] }
  0xb2   : > { %v571_v11 = vpop.permute.xlu0 %570 }
  0xb3   : > { %v689_v14 = vmul.f32 %v4196_v27, %v571_v11 }
  0xb5   : > { %v721_v18 = vadd.f32 %v689_v14, %v528_v12  ;;  %v579_v19 = vpop.permute.xlu1 %578  ;;  %v693_v14 = vmul.f32 %v4196_v27, %v4263_v8  ;;  %v3847_v8 = vld [vmem:[%s5784_s5 + $0x18c] sm:$0xf] }
  0xb6   : > { %501 = vperm.xlu2 %3957, %v4213_v41   ;;  %v691_v51 = vmul.f32 %v4196_v27, %v579_v19 }
  0xb7   : > { %v914_v21 = vadd.f32 %v882_v15, %v721_v18  ;;  %3958 = vset.pattern.permute.xlu1 %v4060_v2  ;;  %3979 = vset.pattern.permute.xlu0 %v4060_v2  ;;  %v4276_v23 = vpop.permute.xlu2 %406 }
  0xb8   : > { %496 = vperm.xlu1 %3958, %v4172_v16   ;;  %471 = vperm.xlu0 %3979, %v352_v22   ;;  %v723_v57 = vadd.f32 %v691_v51, %v530_v52 }
  0xb9   : > { %v950_v24 = vadd.f32 %v4220_v44, %v914_v21 }
  0xba   : > { %v575_v25 = vpop.permute.xlu0 %574 }
  0xbb   : > { %v982_v29 = vmax.f32 %v950_v24, 0.0  ;;  %v3739_v24 = vld [vmem:[%s5784_s5 + $0x1a8] sm:$0xf0] }
  0xbd   : > { %v1012_v30 = vpack.c.bf16 %v982_v29, %v981_v26  ;;  %v3742_v26 = vor.u32 %v3847_v8, %v3739_v24 }
  0xbe   : > { %v4280_v31 = vpop.permute.xlu1 %396  ;;  %3960 = vset.pattern.permute.xlu2 %v4059_v1 }
  0xbf   : > { %3520 = vmatmul.msk.bf16.gmra.mxu0 %vm1063_vm0, %v1012_v30  ;;  %642 = vperm.xlu2 %3960, %v352_v22   ;;  %v531_v20 = vmul.f32 %v4198_v28, %v4280_v31 }
  0xc0   : > { %3959 = vset.pattern.permute.xlu1 %v4059_v1  ;;  %v4285_v33 = vpop.permute.xlu2 %594  ;;  %481 = vperm.xlu0 %3979, %v4309_v47  }
  0xc1   : > { %638 = vperm.xlu1 %3959, %v351_v3   ;;  %1919 = vmatpush.bf16.msrb.mxu0 %v3742_v26 }
  0xc2   : > { %v603_v34 = vpop.permute.xlu0 %602 }
  0xc3   : > { %v697_v15 = vmul.f32 %v4196_v27, %v603_v34 }
  0xc7   : > { %v583_v35 = vpop.permute.xlu1 %582  ;;  %3961 = vset.pattern.permute.xlu2 %v4058_v0 }
  0xc8   : > { %831 = vperm.xlu2 %3961, %v351_v3  }
  0xc9   : > { %666 = vperm.xlu1 %3959, %v4213_v41   ;;  %v4289_v36 = vpop.permute.xlu2 %787  ;;  %v690_v41 = vmul.f32 %v4196_v27, %v575_v25 }
  0xca   : > { %v4291_v37 = vpop.permute.xlu0 %654 }
  0xcb   : > { %v722_v49 = vadd.f32 %v690_v41, %v529_v48  ;;  %v3839_v48 = vld [vmem:[%s5784_s5 + $0x14c] sm:$0xf] }
  0xcd   : > { %v915_v53 = vadd.f32 %v883_v50, %v722_v49  ;;  %v535_v49 = vmul.f32 %v4198_v28, %v4250_v63  ;;  %v3675_v63 = vld [vmem:[%s5784_s5 + $0x128] sm:$0xf0] }
  0xcf   : > { %v951_v4 = vadd.f32 %v4220_v44, %v915_v53 }
  0xd0   : > { %v780_v38 = vpop.permute.xlu1 %779  ;;  %855 = vperm.xlu2 %3961, %v4172_v16  }
  0xd1   : > { %3962 = vset.pattern.permute.xlu1 %v4058_v0  ;;  %v983_v12 = vmax.f32 %v951_v4, 0.0  ;;  %v886_v30 = vmul.f32 %v4202_v32, %v780_v38 }
  0xd2   : > { %835 = vperm.xlu1 %3962, %v352_v22   ;;  %v4295_v39 = vpop.permute.xlu0 %662  ;;  %v4297_v40 = vpop.permute.xlu2 %598 }
  0xd3   : > { %v696_v38 = vmul.f32 %v4196_v27, %v4297_v40 }
  0xd8   : > { %3964 = vset.pattern.permute.xlu2 %v4060_v2 }
  0xd9   : > { %v4301_v43 = vpop.permute.xlu1 %590  ;;  %441 = vperm.xlu2 %3964, %v346_v42  }
  0xda   : > { %3963 = vset.pattern.permute.xlu1 %v4060_v2  ;;  %v4305_v46 = vpop.permute.xlu0 %670 }
  0xdb   : > { %436 = vperm.xlu1 %3963, %v4232_v56   ;;  %v796_v16 = vpop.permute.xlu2 %795 }
  0xdc   : > { %v890_v31 = vmul.f32 %v4202_v32, %v796_v16 }
  0xe1   : > { %3966 = vset.pattern.permute.xlu2 %v4059_v1 }
  0xe2   : > { %v4320_v54 = vpop.permute.xlu1 %783  ;;  %618 = vperm.xlu2 %3966, %v346_v42  }
  0xe3   : > { %3965 = vset.pattern.permute.xlu1 %v4059_v1  ;;  %v772_v55 = vpop.permute.xlu0 %771 }
  0xe4   : > { %v884_v60 = vmul.f32 %v4202_v32, %v772_v55  ;;  %614 = vperm.xlu1 %3965, %v4232_v56   ;;  %v4325_v58 = vpop.permute.xlu2 %491  ;;  %v692_v56 = vmul.f32 %v4196_v27, %v583_v35  ;;  %v725_v35 = vadd.f32 %v693_v14, %v532_v13  ;;  %v3831_v55 = vld [vmem:[%s5784_s5 + $0x10c] sm:$0xf]  ;;  %v534_v13 = vmul.f32 %v4198_v28, %v4240_v59 }
  0xe5   : > { %v695_v14 = vmul.f32 %v4196_v27, %v4285_v33  ;;  %v3815_v33 = vld [vmem:[%s5784_s5 + $0x8c] sm:$0xf] }
  0xe6   : > { %v916_v3 = vadd.f32 %v884_v60, %v723_v57  ;;  %v724_v29 = vadd.f32 %v692_v56, %v531_v20  ;;  %v918_v16 = vadd.f32 %v886_v30, %v725_v35  ;;  %v728_v57 = vadd.f32 %v696_v38, %v535_v49  ;;  %v3643_v56 = vld [vmem:[%s5784_s5 + $0xe8] sm:$0xf0]  ;;  %v4424_v35 = vld [vmem:[%s4135_s17 + $0xf8] sm:$0xff] }
  0xe7   : > { %v3678_v60 = vor.u32 %v3831_v55, %v3675_v63  ;;  %v727_v26 = vadd.f32 %v695_v14, %v534_v13  ;;  %521 = vperm.xlu0 %3979, %v4424_v35   ;;  %v550_v55 = vmul.f32 %v4198_v28, %v4325_v58 }
  0xe8   : > { %v952_v6 = vadd.f32 %v4220_v44, %v916_v3  ;;  %v954_v3 = vadd.f32 %v4220_v44, %v918_v16  ;;  %v3799_v16 = vld [vmem:[%s5784_s5 + $0xc] sm:$0xf] }
  0xea   : > { %v984_v11 = vmax.f32 %v952_v6, 0.0  ;;  %3968 = vset.pattern.permute.xlu2 %v4060_v2 }
  0xeb   : > { %v422_v18 = vpop.permute.xlu1 %421  ;;  %v776_v19 = vpop.permute.xlu0 %775  ;;  %476 = vperm.xlu2 %3968, %v4330_v45  }
  0xec   : > { %v536_v21 = vmul.f32 %v4198_v28, %v422_v18  ;;  %v885_v22 = vmul.f32 %v4202_v32, %v776_v19  ;;  %3967 = vset.pattern.permute.xlu1 %v4058_v0  ;;  %v1013_v62 = vpack.c.bf16 %v984_v11, %v983_v12  ;;  %v3646_v12 = vor.u32 %v3823_v10, %v3643_v56 }
  0xed   : > { %811 = vperm.xlu1 %3967, %v346_v42   ;;  %v4357_v25 = vpop.permute.xlu2 %847  ;;  %v3707_v42 = vld [vmem:[%s5784_s5 + $0x168] sm:$0xf0]  ;;  %v694_v18 = vmul.f32 %v4196_v27, %v4301_v43 }
  0xee   : > { %3521 = vmatmul.msk.bf16.gmra.mxu0 %vm1063_vm0, %v1013_v62  ;;  %v729_v34 = vadd.f32 %v697_v15, %v536_v21  ;;  %v917_v41 = vadd.f32 %v885_v22, %v724_v29  ;;  %v3710_v50 = vor.u32 %v3839_v48, %v3707_v42  ;;  %v986_v15 = vmax.f32 %v954_v3, 0.0  ;;  %v3611_v43 = vld [vmem:[%s5784_s5 + $0xa8] sm:$0xf0] }
  0xef   : > { %v533_v21 = vmul.f32 %v4198_v28, %v4276_v23  ;;  %v887_v22 = vmul.f32 %v4202_v32, %v4320_v54  ;;  %v3614_v24 = vor.u32 %v3815_v33, %v3611_v43  ;;  %v888_v23 = vmul.f32 %v4202_v32, %v4289_v36  ;;  %v3807_v36 = vld [vmem:[%s5784_s5 + $0x4c] sm:$0xf] }
  0xf0   : > { %v922_v51 = vadd.f32 %v890_v31, %v729_v34  ;;  %1920 = vmatpush.bf16.msrb.mxu0 %v3710_v50  ;;  %v953_v52 = vadd.f32 %v4220_v44, %v917_v41  ;;  %v710_v29 = vmul.f32 %v4196_v27, %v4291_v37  ;;  %v3579_v37 = vld [vmem:[%s5784_s5 + $0x68] sm:$0xf0]  ;;  %v903_v49 = vmul.f32 %v4202_v32, %v4357_v25 }
  0xf1   : > { %v726_v54 = vadd.f32 %v694_v18, %v533_v21  ;;  %v3582_v41 = vor.u32 %v3807_v36, %v3579_v37  ;;  %v920_v48 = vadd.f32 %v888_v23, %v727_v26  ;;  %v348_v18 = vld [vmem:[%s4135_s17 + $0x88] sm:$0xff] }
  0xf2   : > { %v958_v7 = vadd.f32 %v4220_v44, %v922_v51  ;;  %v985_v9 = vmax.f32 %v953_v52, 0.0  ;;  %v3547_v51 = vld [vmem:[%s5784_s5 + $0x28] sm:$0xf0] }
  0xf3   : > { %511 = vperm.xlu2 %3968, %v4243_v61   ;;  %v919_v34 = vadd.f32 %v887_v22, %v726_v54  ;;  %v3550_v52 = vor.u32 %v3799_v16, %v3547_v51  ;;  %v956_v25 = vadd.f32 %v4220_v44, %v920_v48  ;;  %v4497_v48 = vld [vmem:[%s4135_s17 + $0x98] sm:$0xff] }
  0xf4   : > { %v792_v53 = vpop.permute.xlu1 %791  ;;  %1921 = vmatpush.bf16.msrb.mxu0 %v3678_v60  ;;  %v990_v20 = vmax.f32 %v958_v7, 0.0  ;;  %v1014_v59 = vpack.c.bf16 %v986_v15, %v985_v9  ;;  %v852_v42 = vpop.permute.xlu0 %851 }
  0xf5   : > { %v889_v40 = vmul.f32 %v4202_v32, %v792_v53  ;;  %3969 = vset.pattern.permute.xlu1 %v4060_v2  ;;  %v955_v50 = vadd.f32 %v4220_v44, %v919_v34  ;;  %v988_v7 = vmax.f32 %v956_v25, 0.0 }
  0xf6   : > { %506 = vperm.xlu1 %3969, %v4177_v17   ;;  %v4384_v4 = vpop.permute.xlu2 %431 }
  0xf7   : > { %v921_v6 = vadd.f32 %v889_v40, %v728_v57  ;;  %v904_v57 = vmul.f32 %v4202_v32, %v852_v42  ;;  %v987_v60 = vmax.f32 %v955_v50, 0.0  ;;  %v538_v43 = vmul.f32 %v4198_v28, %v4384_v4 }
  0xf8   : > { %1922 = vmatpush.bf16.msrb.mxu0 %v3646_v12 }
  0xf9   : > { %v957_v11 = vadd.f32 %v4220_v44, %v921_v6  ;;  %v4453_v6 = vld [vmem:[%s4135_s17 + $0x90] sm:$0xff]  ;;  %v1015_v56 = vpack.c.bf16 %v988_v7, %v987_v60 }
  0xfa   : > { %456 = vperm.xlu0 %3979, %v4453_v6  }
  0xfb   : > { %v989_v19 = vmax.f32 %v957_v11, 0.0  ;;  %3971 = vset.pattern.permute.xlu2 %v4059_v1 }
  0xfc   : > { %650 = vperm.xlu2 %3971, %v4309_v47   ;;  %1923 = vmatpush.bf16.msrb.mxu0 %v3614_v24 }
  0xfd   : > { %v487_v62 = vpop.permute.xlu1 %486  ;;  %v1016_v8 = vpack.c.bf16 %v990_v20, %v989_v19  ;;  %v800_v10 = vpop.permute.xlu0 %799 }
  0xfe   : > { %3970 = vset.pattern.permute.xlu1 %v4059_v1  ;;  %3522 = vmatmul.msk.bf16.gmra.mxu0 %vm1063_vm0, %v1014_v59  ;;  %v549_v30 = vmul.f32 %v4198_v28, %v487_v62  ;;  %v891_v59 = vmul.f32 %v4202_v32, %v800_v10 }
  0xff   : > { %646 = vperm.xlu1 %3970, %v4330_v45   ;;  %3524 = vmatmul.msk.bf16.vlgmr.msra.gmra.mxu1 %vm1063_vm0, %v1016_v8  ;;  %v4421_v31 = vpop.permute.xlu2 %610  ;;  %v4484_v8 = vld [vmem:[%s5783_s4] ss:$0 sm:$0xff] }
 0x100   : > { %v742_v38 = vadd.f32 %v710_v29, %v549_v30  ;;  %1924 = vmatpush.bf16.msrb.mxu0 %v3582_v41  ;;  %v699_v62 = vmul.f32 %v4196_v27, %v4421_v31  ;;  %v361_v41 = vld [vmem:[%s4135_s17 + $0xf0] sm:$0xff] }
 0x102   : > { %v935_v63 = vadd.f32 %v903_v49, %v742_v38  ;;  %3988 = vset.pattern.permute.xlu0 %v4059_v1  ;;  %v731_v4 = vadd.f32 %v699_v62, %v538_v43 }
 0x103   : > { %634 = vperm.xlu0 %3988, %v4497_v48  }
 0x104   : > { %3973 = vset.pattern.permute.xlu2 %v4058_v0  ;;  %1925 = vmatpush.bf16.msrb.mxu0 %v3550_v52  ;;  %v971_v58 = vadd.f32 %v4220_v44, %v935_v63 }
 0x105   : > { %839 = vperm.xlu2 %3973, %v4330_v45  }
 0x106   : > { %v659_v53 = vpop.permute.xlu1 %658  ;;  %v1003_v12 = vmax.f32 %v971_v58, 0.0 }
 0x107   : > { %v711_v40 = vmul.f32 %v4196_v27, %v659_v53  ;;  %674 = vperm.xlu1 %3970, %v4243_v61  }
 0x108   : > { %v4450_v3 = vpop.permute.xlu2 %466 }
 0x109   : > { %v743_v45 = vadd.f32 %v711_v40, %v550_v55  ;;  %v712_v40 = vmul.f32 %v4196_v27, %v4295_v39 }
 0x10b   : > { %v936_v9 = vadd.f32 %v904_v57, %v743_v45  ;;  %3991 = vset.pattern.permute.xlu0 %v4058_v0 }
 0x10d   : > { %863 = vperm.xlu2 %3973, %v4177_v17   ;;  %v972_v61 = vadd.f32 %v4220_v44, %v936_v9  ;;  %v4468_v17 = vpop.permute.xlu0 %859 }
 0x10e   : > { %3523 = vmatmul.msk.bf16.gmra.mxu0 %vm1063_vm0, %v1015_v56  ;;  %v906_v56 = vmul.f32 %v4202_v32, %v4468_v17 }
 0x10f   : > { %3974 = vset.pattern.permute.xlu1 %v4058_v0  ;;  %v427_v11 = vpop.permute.xlu1 %426  ;;  %v1004_v13 = vmax.f32 %v972_v61, 0.0 }
 0x110   : > { %843 = vperm.xlu1 %3974, %v4309_v47   ;;  %v4462_v15 = vpop.permute.xlu2 %501  ;;  %v537_v47 = vmul.f32 %v4198_v28, %v427_v11 }
 0x111   : > { %v1023_v14 = vpack.c.bf16 %v1004_v13, %v1003_v12  ;;  %v552_v10 = vmul.f32 %v4198_v28, %v4462_v15  ;;  %v545_v12 = vmul.f32 %v4198_v28, %v4450_v3 }
 0x113   : > { %3531 = vmatmul.msk.bf16.vlgmr.msra.gmra.mxu3 %vm1063_vm0, %v1023_v14 }
 0x115   : > { %3976 = vset.pattern.permute.xlu2 %v4060_v2  ;;  %v4487_v26 = vpop.permute.xlu0 %807 }
 0x116   : > { %451 = vperm.xlu2 %3976, %v348_v18  }
 0x118   : > { %3975 = vset.pattern.permute.xlu1 %v4060_v2  ;;  %v607_v19 = vpop.permute.xlu1 %606 }
 0x119   : > { %v698_v20 = vmul.f32 %v4196_v27, %v607_v19  ;;  %446 = vperm.xlu1 %3975, %v4256_v5   ;;  %v4474_v22 = vpop.permute.xlu2 %642 }
 0x11a   : > { %v707_v17 = vmul.f32 %v4196_v27, %v4474_v22 }
 0x11b   : > { %v1121_v21 = vpop.f32.mrf.mxu0  ;;  %v730_v33 = vadd.f32 %v698_v20, %v537_v47 }
 0x11c   : > { %v1122_v54 = vadd.f32 %v4484_v8, %v1121_v21 }
 0x11d   : > { %v923_v24 = vadd.f32 %v891_v59, %v730_v33  ;;  %v4504_v51 = vpop.permute.xlu0 %867 }
 0x11e   : > { %3978 = vset.pattern.permute.xlu2 %v4059_v1  ;;  %v1201_v42 = vmax.f32 %v1122_v54, 0.0 }
 0x11f   : > { %626 = vperm.xlu2 %3978, %v348_v18   ;;  %v959_v36 = vadd.f32 %v4220_v44, %v923_v24 }
 0x121   : > { %3977 = vset.pattern.permute.xlu1 %v4059_v1  ;;  %v804_v23 = vpop.permute.xlu1 %803  ;;  %v991_v16 = vmax.f32 %v959_v36, 0.0 }
 0x122   : > { %v892_v29 = vmul.f32 %v4202_v32, %v804_v23  ;;  %622 = vperm.xlu1 %3977, %v4256_v5   ;;  %v832_v37 = vpop.permute.xlu2 %831 }
 0x123   : > { %v1123_v30 = vpop.f32.mrf.mxu0  ;;  %v899_v14 = vmul.f32 %v4202_v32, %v832_v37 }
 0x124   : > { %v924_v31 = vadd.f32 %v892_v29, %v731_v4  ;;  %v1124_v34 = vadd.f32 %v4484_v8, %v1123_v30 }
 0x125   : > { %v4514_v57 = vpop.permute.xlu0 %815 }
 0x126   : > { %v960_v49 = vadd.f32 %v4220_v44, %v924_v31  ;;  %v1202_v38 = vmax.f32 %v1124_v34, 0.0 }
 0x127   : > { %3981 = vset.pattern.permute.xlu2 %v4060_v2 }
 0x128   : > { %v992_v50 = vmax.f32 %v960_v49, 0.0  ;;  %v4502_v5 = vpack.c.bf16 %v1202_v38, %v1201_v42  ;;  %516 = vperm.xlu2 %3981, %v361_v41  }
 0x12a   : > { %3980 = vset.pattern.permute.xlu1 %v4058_v0  ;;  %v497_v52 = vpop.permute.xlu1 %496  ;;  %1926 = vmatmul.bf16.vlgmr.msrb.gmra.mxu0 %v4502_v5  ;;  %v1017_v25 = vpack.c.bf16 %v992_v50, %v991_v16  ;;  %v856_v53 = vpop.permute.xlu2 %855 }
 0x12b   : > { %819 = vperm.xlu1 %3980, %v348_v18   ;;  %v551_v63 = vmul.f32 %v4198_v28, %v497_v52  ;;  %v905_v7 = vmul.f32 %v4202_v32, %v856_v53 }
 0x12c   : > { %3525 = vmatmul.msk.bf16.gmra.mxu1 %vm1063_vm0, %v1017_v25 }
 0x12d   : > { %v744_v45 = vadd.f32 %v712_v40, %v551_v63 }
 0x12f   : > { %v937_v61 = vadd.f32 %v905_v7, %v744_v45 }
 0x130   : > { %3983 = vset.pattern.permute.xlu2 %v4059_v1 }
 0x131   : > { %682 = vperm.xlu2 %3983, %v4424_v35   ;;  %v973_v15 = vadd.f32 %v4220_v44, %v937_v61 }
 0x133   : > { %3982 = vset.pattern.permute.xlu1 %v4059_v1  ;;  %v639_v55 = vpop.permute.xlu1 %638  ;;  %v4518_v60 = vpop.permute.xlu2 %441  ;;  %v1005_v33 = vmax.f32 %v973_v15, 0.0  ;;  %v3667_v15 = vld [vmem:[%s5784_s5 + $0x120] sm:$0xf0] }
 0x134   : > { %678 = vperm.xlu1 %3982, %v361_v41   ;;  %v706_v9 = vmul.f32 %v4196_v27, %v639_v55  ;;  %v540_v53 = vmul.f32 %v4198_v28, %v4518_v60 }
 0x136   : > { %v738_v18 = vadd.f32 %v706_v9, %v545_v12  ;;  %v3846_v9 = vld [vmem:[%s5784_s5 + $0x184] sm:$0xf] }
 0x138   : > { %v931_v3 = vadd.f32 %v899_v14, %v738_v18  ;;  %v3830_v18 = vld [vmem:[%s5784_s5 + $0x104] sm:$0xf] }
 0x139   : > { %3985 = vset.pattern.permute.xlu2 %v4058_v0 }
 0x13a   : > { %875 = vperm.xlu2 %3985, %v4424_v35   ;;  %v472_v35 = vpop.permute.xlu0 %471  ;;  %v967_v31 = vadd.f32 %v4220_v44, %v931_v3  ;;  %v3822_v3 = vld [vmem:[%s5784_s5 + $0xc4] sm:$0xf] }
 0x13b   : > { %v667_v58 = vpop.permute.xlu1 %666  ;;  %v546_v20 = vmul.f32 %v4198_v28, %v472_v35 }
 0x13c   : > { %v713_v39 = vmul.f32 %v4196_v27, %v667_v58  ;;  %3984 = vset.pattern.permute.xlu1 %v4058_v0  ;;  %v1126_v11 = vpop.f32.mrf.mxu0  ;;  %v619_v47 = vpop.permute.xlu2 %618  ;;  %v3731_v58 = vld [vmem:[%s5784_s5 + $0x1a0] sm:$0xf0] }
 0x13d   : > { %871 = vperm.xlu1 %3984, %v361_v41   ;;  %v1127_v59 = vadd.f32 %v4484_v8, %v1126_v11  ;;  %v739_v23 = vadd.f32 %v707_v17, %v546_v20  ;;  %v701_v55 = vmul.f32 %v4196_v27, %v619_v47  ;;  %v3734_v60 = vor.u32 %v3846_v9, %v3731_v58  ;;  %v3699_v11 = vld [vmem:[%s5784_s5 + $0x160] sm:$0xf0] }
 0x13e   : > { %v745_v13 = vadd.f32 %v713_v39, %v552_v10  ;;  %v3838_v39 = vld [vmem:[%s5784_s5 + $0x144] sm:$0xf]  ;;  %v3670_v20 = vor.u32 %v3830_v18, %v3667_v15 }
 0x13f   : > { %v1203_v54 = vmax.f32 %v1127_v59, 0.0  ;;  %v3702_v35 = vor.u32 %v3838_v39, %v3699_v11  ;;  %v3635_v59 = vld [vmem:[%s5784_s5 + $0xe0] sm:$0xf0] }
 0x140   : > { %v938_v19 = vadd.f32 %v906_v56, %v745_v13 }
 0x142   : > { %3987 = vset.pattern.permute.xlu2 %v4059_v1  ;;  %v974_v21 = vadd.f32 %v4220_v44, %v938_v19 }
 0x143   : > { %630 = vperm.xlu2 %3987, %v4453_v6  }
 0x144   : > { %v836_v43 = vpop.permute.xlu1 %835  ;;  %v1128_v62 = vpop.f32.mrf.mxu0  ;;  %v1006_v24 = vmax.f32 %v974_v21, 0.0 }
 0x145   : > { %v900_v4 = vmul.f32 %v4202_v32, %v836_v43  ;;  %v1129_v22 = vadd.f32 %v4484_v8, %v1128_v62  ;;  %3986 = vset.pattern.permute.xlu1 %v4060_v2  ;;  %v4550_v41 = vpop.permute.xlu2 %476  ;;  %v999_v2 = vmax.f32 %v967_v31, 0.0  ;;  %v3761_v43 = vld [vmem:[%s5784_s5 + $0x1c0] sm:$0xf] }
 0x146   : > { %461 = vperm.xlu1 %3986, %v4497_v48   ;;  %v1024_v1 = vpack.c.bf16 %v1006_v24, %v1005_v33  ;;  %v3638_v33 = vor.u32 %v3822_v3, %v3635_v59  ;;  %v3858_v62 = vld [vmem:[%s5784_s5 + $0x1dc] sm:$0xf0]  ;;  %v547_v9 = vmul.f32 %v4198_v28, %v4550_v41  ;;  %v3859_v41 = vld [vmem:[%s5784_s5 + $0x1e4] sm:$0xf0] }
 0x147   : > { %v932_v29 = vadd.f32 %v900_v4, %v739_v23  ;;  %v1204_v30 = vmax.f32 %v1129_v22, 0.0  ;;  %v3762_v24 = vor.u32 %v3858_v62, %v3761_v43  ;;  %v3814_v23 = vld [vmem:[%s5784_s5 + $0x84] sm:$0xf] }
 0x148   : > { %3532 = vmatmul.msk.bf16.gmra.mxu3 %vm1063_vm0, %v1024_v1  ;;  %v3603_v4 = vld [vmem:[%s5784_s5 + $0xa0] sm:$0xf0] }
 0x149   : > { %v968_v34 = vadd.f32 %v4220_v44, %v932_v29  ;;  %v4548_v36 = vpack.c.bf16 %v1204_v30, %v1203_v54  ;;  %v3606_v22 = vor.u32 %v3814_v23, %v3603_v4  ;;  %1651 = vmatpush.bf16.msrb.mxu1 %v3762_v24  ;;  %v3737_v24 = vld [vmem:[%s5784_s5 + $0x188] sm:$0xf]  ;;  %v3697_v4 = vld [vmem:[%s5784_s5 + $0x140] sm:$0xf] }
 0x14a   : > { %v3851_v23 = vld [vmem:[%s5784_s5 + $0x1a4] sm:$0xf0] }
 0x14b   : > { %v1000_v37 = vmax.f32 %v968_v34, 0.0  ;;  %1931 = vmatmul.bf16.gmra.mxu0 %v4548_v36  ;;  %3990 = vset.pattern.permute.xlu2 %v4058_v0  ;;  %v3806_v34 = vld [vmem:[%s5784_s5 + $0x44] sm:$0xf] }
 0x14c   : > { %827 = vperm.xlu2 %3990, %v4497_v48   ;;  %v3854_v48 = vld [vmem:[%s5784_s5 + $0x1c4] sm:$0xf] }
 0x14d   : > { %v437_v42 = vpop.permute.xlu1 %436  ;;  %v1021_v49 = vpack.c.bf16 %v1000_v37, %v999_v2  ;;  %v4558_v38 = vpop.permute.xlu2 %511  ;;  %v3571_v37 = vld [vmem:[%s5784_s5 + $0x60] sm:$0xf0]  ;;  %v714_v2 = vmul.f32 %v4196_v27, %v4305_v46 }
 0x14e   : > { %3989 = vset.pattern.permute.xlu1 %v4058_v0  ;;  %v539_v52 = vmul.f32 %v4198_v28, %v437_v42  ;;  %v3763_v0 = vld [vmem:[%s5784_s5 + $0x1e0] sm:$0xf0] }
 0x14f   : > { %823 = vperm.xlu1 %3989, %v4453_v6   ;;  %3529 = vmatmul.msk.bf16.vlgmr.msra.gmra.mxu2 %vm1063_vm0, %v1021_v49  ;;  %v893_v6 = vmul.f32 %v4202_v32, %v4487_v26  ;;  %v3766_v63 = vor.u32 %v3854_v48, %v3763_v0  ;;  %v733_v26 = vadd.f32 %v701_v55, %v540_v53  ;;  %v3798_v48 = vld [vmem:[%s5784_s5 + $0x4] sm:$0xf] }
 0x150   : > { %v3574_v49 = vor.u32 %v3806_v34, %v3571_v37  ;;  %v3539_v0 = vld [vmem:[%s5784_s5 + $0x20] sm:$0xf0] }
 0x151   : > { %1740 = vmatpush.bf16.msrb.mxu2 %v3766_v63  ;;  %v3542_v46 = vor.u32 %v3798_v48, %v3539_v0  ;;  %v554_v63 = vmul.f32 %v4198_v28, %v4558_v38  ;;  %v3769_v38 = vld [vmem:[%s5784_s5 + $0x1c8] sm:$0xf] }
 0x155   : > { %1741 = vmatpush.bf16.msrb.mxu2 %v3734_v60  ;;  %v908_v60 = vmul.f32 %v4202_v32, %v4504_v51 }
 0x156   : > { %v615_v50 = vpop.permute.xlu1 %614  ;;  %v4573_v45 = vpop.permute.xlu2 %650 }
 0x157   : > { %v700_v16 = vmul.f32 %v4196_v27, %v615_v50  ;;  %v709_v18 = vmul.f32 %v4196_v27, %v4573_v45 }
 0x159   : > { %v732_v25 = vadd.f32 %v700_v16, %v539_v52  ;;  %1742 = vmatpush.bf16.msrb.mxu2 %v3702_v35  ;;  %v3770_v35 = vor.u32 %v3859_v41, %v3769_v38  ;;  %v3835_v38 = vld [vmem:[%s5784_s5 + $0x124] sm:$0xf0] }
 0x15b   : > { %v925_v40 = vadd.f32 %v893_v6, %v732_v25  ;;  %1829 = vmatpush.bf16.msrb.mxu3 %v3770_v35 }
 0x15d   : > { %v961_v61 = vadd.f32 %v4220_v44, %v925_v40  ;;  %1743 = vmatpush.bf16.msrb.mxu2 %v3670_v20 }
 0x15f   : > { %v812_v7 = vpop.permute.xlu1 %811  ;;  %v993_v14 = vmax.f32 %v961_v61, 0.0  ;;  %v840_v47 = vpop.permute.xlu2 %839 }
 0x160   : > { %v894_v10 = vmul.f32 %v4202_v32, %v812_v7  ;;  %v901_v11 = vmul.f32 %v4202_v32, %v840_v47 }
 0x161   : > { %1744 = vmatpush.bf16.msrb.mxu2 %v3638_v33 }
 0x162   : > { %v926_v56 = vadd.f32 %v894_v10, %v733_v26  ;;  %v3729_v26 = vld [vmem:[%s5784_s5 + $0x180] sm:$0xf] }
 0x163   : > { %v3850_v10 = vld [vmem:[%s5784_s5 + $0x19c] sm:$0xf0] }
 0x164   : > { %v962_v12 = vadd.f32 %v4220_v44, %v926_v56  ;;  %v482_v56 = vpop.permute.xlu0 %481  ;;  %v3730_v39 = vor.u32 %v3850_v10, %v3729_v26  ;;  %v3673_v10 = vld [vmem:[%s5784_s5 + $0x108] sm:$0xf] }
 0x165   : > { %1745 = vmatpush.bf16.msrb.mxu2 %v3606_v22  ;;  %v548_v51 = vmul.f32 %v4198_v28, %v482_v56  ;;  %v3674_v56 = vor.u32 %v3835_v38, %v3673_v10  ;;  %v3856_v38 = vld [vmem:[%s5784_s5 + $0x1d4] sm:$0xf] }
 0x166   : > { %v994_v13 = vmax.f32 %v962_v12, 0.0  ;;  %1652 = vmatpush.bf16.msrb.mxu1 %v3730_v39 }
 0x167   : > { %v864_v30 = vpop.permute.xlu2 %863  ;;  %v741_v59 = vadd.f32 %v709_v18, %v548_v51 }
 0x168   : > { %v507_v19 = vpop.permute.xlu1 %506  ;;  %v1018_v17 = vpack.c.bf16 %v994_v13, %v993_v14  ;;  %v907_v16 = vmul.f32 %v4202_v32, %v864_v30 }
 0x169   : > { %v553_v54 = vmul.f32 %v4198_v28, %v507_v19  ;;  %1746 = vmatpush.bf16.msrb.mxu2 %v3574_v49 }
 0x16a   : > { %3526 = vmatmul.msk.bf16.gmra.mxu1 %vm1063_vm0, %v1018_v17 }
 0x16b   : > { %v1131_v21 = vpop.f32.mrf.mxu0  ;;  %v746_v50 = vadd.f32 %v714_v2, %v553_v54  ;;  %v3738_v54 = vor.u32 %v3851_v23, %v3737_v24 }
 0x16c   : > { %v1132_v29 = vadd.f32 %v4484_v8, %v1131_v21 }
 0x16d   : > { %v939_v40 = vadd.f32 %v907_v16, %v746_v50  ;;  %1747 = vmatpush.bf16.msrb.mxu2 %v3542_v46  ;;  %1830 = vmatpush.bf16.msrb.mxu3 %v3738_v54  ;;  %v3705_v16 = vld [vmem:[%s5784_s5 + $0x148] sm:$0xf]  ;;  %v3665_v46 = vld [vmem:[%s5784_s5 + $0x100] sm:$0xf] }
 0x16e   : > { %v1205_v52 = vmax.f32 %v1132_v29, 0.0  ;;  %v3842_v29 = vld [vmem:[%s5784_s5 + $0x15c] sm:$0xf0]  ;;  %v3811_v54 = vld [vmem:[%s5784_s5 + $0x64] sm:$0xf0] }
 0x16f   : > { %v975_v13 = vadd.f32 %v4220_v44, %v939_v40  ;;  %v3698_v34 = vor.u32 %v3842_v29, %v3697_v4  ;;  %v4742_v4 = vld [vmem:[%s5781_s2] ss:$0 sm:$0xff] }
 0x170   : > { %v4661_v15 = vpop.permute.xlu2 %451  ;;  %v3601_v29 = vld [vmem:[%s5784_s5 + $0x80] sm:$0xf] }
 0x171   : > { %v647_v1 = vpop.permute.xlu1 %646  ;;  %v1007_v20 = vmax.f32 %v975_v13, 0.0  ;;  %1653 = vmatpush.bf16.msrb.mxu1 %v3698_v34  ;;  %v3641_v13 = vld [vmem:[%s5784_s5 + $0xc8] sm:$0xf] }
 0x172   : > { %v708_v53 = vmul.f32 %v4196_v27, %v647_v1 }
 0x173   : > { %v1133_v31 = vpop.f32.mrf.mxu0 }
 0x174   : > { %v1134_v42 = vadd.f32 %v4484_v8, %v1133_v31  ;;  %v740_v12 = vadd.f32 %v708_v53, %v547_v9  ;;  %v3834_v53 = vld [vmem:[%s5784_s5 + $0x11c] sm:$0xf0] }
 0x176   : > { %v1206_v25 = vmax.f32 %v1134_v42, 0.0  ;;  %v933_v17 = vadd.f32 %v901_v11, %v740_v12  ;;  %v3633_v11 = vld [vmem:[%s5784_s5 + $0xc0] sm:$0xf] }
 0x177   : > { %v3826_v12 = vld [vmem:[%s5784_s5 + $0xdc] sm:$0xf0] }
 0x178   : > { %v4633_v6 = vpack.c.bf16 %v1206_v25, %v1205_v52  ;;  %v969_v1 = vadd.f32 %v4220_v44, %v933_v17  ;;  %v3843_v52 = vld [vmem:[%s5784_s5 + $0x164] sm:$0xf0]  ;;  %v3634_v35 = vor.u32 %v3826_v12, %v3633_v11  ;;  %v895_v17 = vmul.f32 %v4202_v32, %v4514_v57 }
 0x179   : > { %v675_v55 = vpop.permute.xlu1 %674  ;;  %v627_v42 = vpop.permute.xlu2 %626  ;;  %v3706_v25 = vor.u32 %v3843_v52, %v3705_v16 }
 0x17a   : > { %v715_v7 = vmul.f32 %v4196_v27, %v675_v55  ;;  %1936 = vmatmul.bf16.gmra.mxu0 %v4633_v6  ;;  %v1001_v50 = vmax.f32 %v969_v1, 0.0  ;;  %v3666_v55 = vor.u32 %v3834_v53, %v3665_v46  ;;  %v3577_v1 = vld [vmem:[%s5784_s5 + $0x48] sm:$0xf] }
 0x17b   : > { %v1136_v58 = vpop.f32.mrf.mxu0  ;;  %1831 = vmatpush.bf16.msrb.mxu3 %v3706_v25  ;;  %v3545_v25 = vld [vmem:[%s5784_s5 + $0x8] sm:$0xf] }
 0x17c   : > { %v747_v61 = vadd.f32 %v715_v7, %v554_v63  ;;  %v1137_v47 = vadd.f32 %v4484_v8, %v1136_v58  ;;  %1654 = vmatpush.bf16.msrb.mxu1 %v3666_v55  ;;  %v1146_v63 = vpop.f32.mrf.mxu1 }
 0x17d   : > { %v1147_v34 = vadd.f32 %v4484_v8, %v1146_v63 }
 0x17e   : > { %v940_v14 = vadd.f32 %v908_v60, %v747_v61  ;;  %v1207_v30 = vmax.f32 %v1137_v47, 0.0  ;;  %v703_v47 = vmul.f32 %v4196_v27, %v627_v42 }
 0x17f   : > { %1832 = vmatpush.bf16.msrb.mxu3 %v3674_v56  ;;  %v1211_v53 = vmax.f32 %v1147_v34, 0.0  ;;  %v3569_v56 = vld [vmem:[%s5784_s5 + $0x40] sm:$0xf] }
 0x180   : > { %v976_v19 = vadd.f32 %v4220_v44, %v940_v14  ;;  %v3827_v14 = vld [vmem:[%s5784_s5 + $0xe4] sm:$0xf0]  ;;  %1655 = vmatpush.bf16.msrb.mxu1 %v3634_v35 }
 0x182   : > { %v844_v21 = vpop.permute.xlu1 %843  ;;  %v1008_v3 = vmax.f32 %v976_v19, 0.0  ;;  %v4699_v7 = vpop.permute.xlu2 %516  ;;  %v3642_v19 = vor.u32 %v3827_v14, %v3641_v13 }
 0x183   : > { %v902_v33 = vmul.f32 %v4202_v32, %v844_v21  ;;  %v1138_v43 = vpop.f32.mrf.mxu0  ;;  %v555_v13 = vmul.f32 %v4198_v28, %v4699_v7 }
 0x184   : > { %v1139_v62 = vadd.f32 %v4484_v8, %v1138_v43  ;;  %v1025_v45 = vpack.c.bf16 %v1008_v3, %v1007_v20  ;;  %v542_v20 = vmul.f32 %v4198_v28, %v4661_v15  ;;  %1833 = vmatpush.bf16.msrb.mxu3 %v3642_v19  ;;  %v1148_v21 = vpop.f32.mrf.mxu1 }
 0x185   : > { %v934_v22 = vadd.f32 %v902_v33, %v741_v59  ;;  %v3609_v59 = vld [vmem:[%s5784_s5 + $0x88] sm:$0xf]  ;;  %v1149_v24 = vadd.f32 %v4484_v8, %v1148_v21 }
 0x186   : > { %v1208_v31 = vmax.f32 %v1139_v62, 0.0  ;;  %3533 = vmatmul.msk.bf16.gmra.mxu3 %vm1063_vm0, %v1025_v45  ;;  %v3819_v33 = vld [vmem:[%s5784_s5 + $0xa4] sm:$0xf0]  ;;  %v735_v62 = vadd.f32 %v703_v47, %v542_v20 }
 0x187   : > { %v970_v37 = vadd.f32 %v4220_v44, %v934_v22  ;;  %v3610_v15 = vor.u32 %v3819_v33, %v3609_v59 }
 0x188   : > { %v4682_v2 = vpack.c.bf16 %v1208_v31, %v1207_v30  ;;  %v3818_v30 = vld [vmem:[%s5784_s5 + $0x9c] sm:$0xf0]  ;;  %v3578_v31 = vor.u32 %v3811_v54, %v3577_v1 }
 0x189   : > { %v1002_v49 = vmax.f32 %v970_v37, 0.0  ;;  %1834 = vmatpush.bf16.msrb.mxu3 %v3610_v15  ;;  %v3602_v42 = vor.u32 %v3818_v30, %v3601_v29  ;;  %v3785_v30 = vld [vmem:[%s5784_s5 + $0x1d8] sm:$0xf] }
 0x18a   : > { %1941 = vmatmul.bf16.gmra.mxu0 %v4682_v2 }
 0x18b   : > { %v447_v48 = vpop.permute.xlu1 %446  ;;  %v1141_v44 = vpop.f32.mrf.mxu0  ;;  %v1022_v0 = vpack.c.bf16 %v1002_v49, %v1001_v50  ;;  %v1212_v49 = vmax.f32 %v1149_v24, 0.0  ;;  %1656 = vmatpush.bf16.msrb.mxu1 %v3602_v42  ;;  %v3802_v24 = vld [vmem:[%s5784_s5 + $0x1c] sm:$0xf0] }
 0x18c   : > { %v1142_v40 = vadd.f32 %v4484_v8, %v1141_v44  ;;  %v541_v61 = vmul.f32 %v4198_v28, %v447_v48  ;;  %v683_v43 = vpop.permute.xlu2 %682  ;;  %v522_v50 = vpop.permute.xlu0 %521  ;;  %v3803_v48 = vld [vmem:[%s5784_s5 + $0x24] sm:$0xf0] }
 0x18d   : > { %3530 = vmatmul.msk.bf16.gmra.mxu2 %vm1063_vm0, %v1022_v0  ;;  %1835 = vmatpush.bf16.msrb.mxu3 %v3578_v31  ;;  %v717_v44 = vmul.f32 %v4196_v27, %v683_v43  ;;  %v556_v0 = vmul.f32 %v4198_v28, %v522_v50  ;;  %v3546_v46 = vor.u32 %v3803_v48, %v3545_v25  ;;  %v3861_v31 = vld [vmem:[%s5784_s5 + $0x1f4] sm:$0xf0]  ;;  %v3860_v25 = vld [vmem:[%s5784_s5 + $0x1ec] sm:$0xf0] }
 0x18e   : > { %v1209_v39 = vmax.f32 %v1142_v40, 0.0  ;;  %v3786_v42 = vor.u32 %v3861_v31, %v3785_v30  ;;  %v3683_v30 = vld [vmem:[%s5784_s5 + $0x130] sm:$0xf0] }
 0x191   : > { %1836 = vmatpush.bf16.msrb.mxu3 %v3546_v46 }
 0x193   : > { %v1143_v9 = vpop.f32.mrf.mxu0 }
 0x194   : > { %v1144_v58 = vadd.f32 %v4484_v8, %v1143_v9  ;;  %v623_v26 = vpop.permute.xlu1 %622  ;;  %v876_v40 = vpop.permute.xlu2 %875  ;;  %v4767_v9 = vpack.c.bf16 %v1212_v49, %v1211_v53 }
 0x195   : > { %v702_v60 = vmul.f32 %v4196_v27, %v623_v26  ;;  %v910_v26 = vmul.f32 %v4202_v32, %v876_v40  ;;  %v457_v35 = vpop.permute.xlu0 %456  ;;  %2185 = vmatpush.bf16.msra.mxu3 %v3786_v42 }
 0x196   : > { %v1210_v41 = vmax.f32 %v1144_v58, 0.0  ;;  %v749_v58 = vadd.f32 %v717_v44, %v556_v0  ;;  %v543_v48 = vmul.f32 %v4198_v28, %v457_v35 }
 0x197   : > { %v734_v51 = vadd.f32 %v702_v60, %v541_v61  ;;  %v3779_v60 = vld [vmem:[%s5784_s5 + $0x1f0] sm:$0xf0] }
 0x198   : > { %v4722_v18 = vpack.c.bf16 %v1210_v41, %v1209_v39  ;;  %v3782_v61 = vor.u32 %v3856_v38, %v3779_v60  ;;  %v3810_v39 = vld [vmem:[%s5784_s5 + $0x5c] sm:$0xf0]  ;;  %v942_v12 = vadd.f32 %v910_v26, %v749_v58  ;;  %v3747_v38 = vld [vmem:[%s5784_s5 + $0x1b0] sm:$0xf0] }
 0x199   : > { %v927_v3 = vadd.f32 %v895_v17, %v734_v51  ;;  %v3570_v41 = vor.u32 %v3810_v39, %v3569_v56  ;;  %v3853_v39 = vld [vmem:[%s5784_s5 + $0x1b4] sm:$0xf0] }
 0x19a   : > { %1946 = vmatmul.bf16.gmra.mxu0 %v4722_v18  ;;  %2096 = vmatpush.bf16.msra.mxu2 %v3782_v61  ;;  %v978_v17 = vadd.f32 %v4742_v4, %v942_v12  ;;  %v3753_v61 = vld [vmem:[%s5784_s5 + $0x198] sm:$0xf]  ;;  %v3852_v12 = vld [vmem:[%s5784_s5 + $0x1ac] sm:$0xf0] }
 0x19b   : > { %v963_v22 = vadd.f32 %v4742_v4, %v927_v3  ;;  %1657 = vmatpush.bf16.msrb.mxu1 %v3570_v41  ;;  %v3754_v41 = vor.u32 %v3853_v39, %v3753_v61 }
 0x19d   : > { %v820_v57 = vpop.permute.xlu1 %819  ;;  %1748 = vmatmul.bf16.vlgmr.msrb.gmra.mxu2 %v4502_v5  ;;  %v995_v52 = vmax.f32 %v963_v22, 0.0  ;;  %v631_v20 = vpop.permute.xlu2 %630  ;;  %2186 = vmatpush.bf16.msra.mxu3 %v3754_v41 }
 0x19e   : > { %v896_v45 = vmul.f32 %v4202_v32, %v820_v57  ;;  %v1010_v57 = vmax.f32 %v978_v17, 0.0  ;;  %v635_v15 = vpop.permute.xlu0 %634  ;;  %v3849_v17 = vld [vmem:[%s5784_s5 + $0x19c] sm:$0xf] }
 0x19f   : > { %v705_v54 = vmul.f32 %v4196_v27, %v635_v15  ;;  %v3721_v15 = vld [vmem:[%s5784_s5 + $0x158] sm:$0xf] }
 0x1a0   : > { %v928_v23 = vadd.f32 %v896_v45, %v735_v62  ;;  %v3537_v45 = vld [vmem:[%s5784_s5] sm:$0xf] }
 0x1a2   : > { %v964_v37 = vadd.f32 %v4742_v4, %v928_v23  ;;  %v3538_v23 = vor.u32 %v3802_v24, %v3537_v45  ;;  %v3844_v24 = vld [vmem:[%s5784_s5 + $0x16c] sm:$0xf0] }
 0x1a4   : > { %v996_v16 = vmax.f32 %v964_v37, 0.0  ;;  %1658 = vmatpush.bf16.msrb.mxu1 %v3538_v23 }
 0x1a6   : > { %v679_v55 = vpop.permute.xlu1 %678  ;;  %v1019_v63 = vpack.c.bf16 %v996_v16, %v995_v52  ;;  %v828_v37 = vpop.permute.xlu2 %827  ;;  %v704_v16 = vmul.f32 %v4196_v27, %v631_v20  ;;  %v3777_v52 = vld [vmem:[%s5784_s5 + $0x1d0] sm:$0xf]  ;;  %v3755_v20 = vld [vmem:[%s5784_s5 + $0x1b8] sm:$0xf0] }
 0x1a7   : > { %v716_v11 = vmul.f32 %v4196_v27, %v679_v55  ;;  %v898_v50 = vmul.f32 %v4202_v32, %v828_v37  ;;  %v3778_v0 = vor.u32 %v3860_v25, %v3777_v52  ;;  %v3723_v37 = vld [vmem:[%s5784_s5 + $0x178] sm:$0xf0]  ;;  %v3689_v25 = vld [vmem:[%s5784_s5 + $0x118] sm:$0xf] }
 0x1a8   : > { %3527 = vmatmul.msk.bf16.gmra.mxu1 %vm1063_vm0, %v1019_v63  ;;  %v736_v53 = vadd.f32 %v704_v16, %v543_v48  ;;  %v3837_v48 = vld [vmem:[%s5784_s5 + $0x134] sm:$0xf0] }
 0x1a9   : > { %v1151_v10 = vpop.f32.mrf.mxu1  ;;  %v748_v51 = vadd.f32 %v716_v11, %v555_v13  ;;  %2007 = vmatpush.bf16.msra.mxu1 %v3778_v0  ;;  %v3745_v11 = vld [vmem:[%s5784_s5 + $0x190] sm:$0xf] }
 0x1aa   : > { %1951 = vmatmul.bf16.gmra.mxu0 %v4767_v9  ;;  %v1152_v21 = vadd.f32 %v4484_v8, %v1151_v10  ;;  %v3746_v35 = vor.u32 %v3852_v12, %v3745_v11  ;;  %v3681_v0 = vld [vmem:[%s5784_s5 + $0x110] sm:$0xf] }
 0x1ac   : > { %v1213_v62 = vmax.f32 %v1152_v21, 0.0 }
 0x1ad   : > { %1753 = vmatmul.bf16.gmra.mxu2 %v4548_v36  ;;  %2008 = vmatpush.bf16.msra.mxu1 %v3746_v35 }
 0x1af   : > { %v872_v14 = vpop.permute.xlu1 %871 }
 0x1b0   : > { %v909_v19 = vmul.f32 %v4202_v32, %v872_v14  ;;  %v3840_v14 = vld [vmem:[%s5784_s5 + $0x154] sm:$0xf] }
 0x1b1   : > { %v1153_v47 = vpop.f32.mrf.mxu1 }
 0x1b2   : > { %v941_v3 = vadd.f32 %v909_v19, %v748_v51  ;;  %v1154_v59 = vadd.f32 %v4484_v8, %v1153_v47  ;;  %v3715_v51 = vld [vmem:[%s5784_s5 + $0x170] sm:$0xf0]  ;;  %v4872_v47 = vor.u32 %v3849_v17, %v3755_v20  ;;  %v3829_v17 = vld [vmem:[%s5784_s5 + $0xf4] sm:$0xf0] }
 0x1b3   : > { %v3718_v19 = vor.u32 %v3840_v14, %v3715_v51 }
 0x1b4   : > { %v977_v33 = vadd.f32 %v4742_v4, %v941_v3  ;;  %v1214_v43 = vmax.f32 %v1154_v59, 0.0 }
 0x1b6   : > { %v1009_v7 = vmax.f32 %v977_v33, 0.0  ;;  %v4799_v22 = vpack.c.bf16 %v1214_v43, %v1213_v62  ;;  %v3845_v62 = vld [vmem:[%s5784_s5 + $0x174] sm:$0xf0] }
 0x1b7   : > { %v3722_v45 = vor.u32 %v3845_v62, %v3721_v15  ;;  %v3828_v15 = vld [vmem:[%s5784_s5 + $0xec] sm:$0xf0] }
 0x1b8   : > { %v462_v1 = vpop.permute.xlu1 %461  ;;  %v1026_v29 = vpack.c.bf16 %v1010_v57, %v1009_v7  ;;  %v3713_v7 = vld [vmem:[%s5784_s5 + $0x150] sm:$0xf] }
 0x1b9   : > { %v544_v34 = vmul.f32 %v4198_v28, %v462_v1  ;;  %v3848_v28 = vld [vmem:[%s5784_s5 + $0x194] sm:$0xf]  ;;  %v3714_v23 = vor.u32 %v3844_v24, %v3713_v7  ;;  %2187 = vmatpush.bf16.msra.mxu3 %v3722_v45  ;;  %v1313_v24 = vld [vmem:[%s5785_s6] sm:$0xff] }
 0x1ba   : > { %3534 = vmatmul.msk.bf16.gmra.mxu3 %vm1063_vm0, %v1026_v29  ;;  %1956 = vmatmul.bf16.gmra.mxu0 %v4799_v22  ;;  %v3750_v60 = vor.u32 %v3848_v28, %v3747_v38  ;;  %v3832_v29 = vld [vmem:[%s5784_s5 + $0x114] sm:$0xf] }
 0x1bb   : > { %v737_v49 = vadd.f32 %v705_v54, %v544_v34  ;;  %2009 = vmatpush.bf16.msra.mxu1 %v3714_v23  ;;  %v4897_v54 = vpop.f32.mrf.mxu3  ;;  %v3686_v31 = vor.u32 %v3832_v29, %v3683_v30  ;;  %v3841_v34 = vld [vmem:[%s5784_s5 + $0x15c] sm:$0xf] }
 0x1bc   : > { %2097 = vmatpush.bf16.msra.mxu2 %v3750_v60  ;;  %v4912_v42 = vor.u32 %v3841_v34, %v3723_v37  ;;  %v3833_v60 = vld [vmem:[%s5784_s5 + $0x11c] sm:$0xf]  ;;  %v5001_v37 = vperm.slane %v1313_v24, 3 }
 0x1bd   : > { %1758 = vmatmul.bf16.gmra.mxu2 %v4633_v6  ;;  %v930_v44 = vadd.f32 %v898_v50, %v737_v49 }
 0x1bf   : > { %v966_v63 = vadd.f32 %v4742_v4, %v930_v44  ;;  %v3690_v44 = vor.u32 %v3837_v48, %v3689_v25  ;;  %v5006_v48 = vperm.slane %v1313_v24, 2 }
 0x1c0   : > { %2098 = vmatpush.bf16.msra.mxu2 %v3718_v19  ;;  %v3657_v19 = vld [vmem:[%s5784_s5 + $0xd8] sm:$0xf] }
 0x1c1   : > { %v824_v46 = vpop.permute.xlu1 %823  ;;  %v998_v58 = vmax.f32 %v966_v63, 0.0  ;;  %2188 = vmatpush.bf16.msra.mxu3 %v3690_v44  ;;  %v3619_v44 = vld [vmem:[%s5784_s5 + $0xb0] sm:$0xf0] }
 0x1c2   : > { %v897_v55 = vmul.f32 %v4202_v32, %v824_v46  ;;  %v3857_v32 = vld [vmem:[%s5784_s5 + $0x1dc] sm:$0xf]  ;;  %v3836_v46 = vld [vmem:[%s5784_s5 + $0x12c] sm:$0xf0] }
 0x1c3   : > { %v4919_v50 = vpop.f32.mrf.mxu3 }
 0x1c4   : > { %v929_v27 = vadd.f32 %v897_v55, %v736_v53  ;;  %2099 = vmatpush.bf16.msra.mxu2 %v3686_v31  ;;  %v3682_v55 = vor.u32 %v3836_v46, %v3681_v0 }
 0x1c6   : > { %v965_v40 = vadd.f32 %v4742_v4, %v929_v27  ;;  %v3787_v4 = vld [vmem:[%s5784_s5 + $0x1f8] sm:$0xf0]  ;;  %2010 = vmatpush.bf16.msra.mxu1 %v3682_v55 }
 0x1c7   : > { %v4838_v56 = vor.u32 %v3857_v32, %v3787_v4  ;;  %v3691_v4 = vld [vmem:[%s5784_s5 + $0x138] sm:$0xf0] }
 0x1c8   : > { %v997_v26 = vmax.f32 %v965_v40, 0.0  ;;  %v1927_v40 = vpop.f32.mrf.mxu0  ;;  %v4962_v39 = vor.u32 %v3833_v60, %v3691_v4  ;;  %v3825_v60 = vld [vmem:[%s5784_s5 + $0xdc] sm:$0xf] }
 0x1c9   : > { %2274 = vmatpush.bf16.msra.mxu0 %v4838_v56  ;;  %v1928_v55 = vadd.f32 %v1927_v40, %v5001_v37  ;;  %v3659_v40 = vld [vmem:[%s5784_s5 + $0xf8] sm:$0xf0] }
 0x1ca   : > { %1837 = vmatmul.bf16.vlgmr.msrb.gmra.mxu3 %v4502_v5  ;;  %v1020_v10 = vpack.c.bf16 %v998_v58, %v997_v26  ;;  %v3824_v58 = vld [vmem:[%s5784_s5 + $0xd4] sm:$0xf] }
 0x1cb   : > { %v4923_v52 = vpop.f32.mrf.mxu3  ;;  %v3651_v26 = vld [vmem:[%s5784_s5 + $0xf0] sm:$0xf0] }
 0x1cc   : > { %3528 = vmatmul.msk.bf16.gmra.mxu1 %vm1063_vm0, %v1020_v10  ;;  %v3654_v38 = vor.u32 %v3824_v58, %v3651_v26  ;;  %v5022_v26 = vld [vmem:[%s5783_s4] ss:$0 sm:$0xff]  ;;  %vm3127_vm0 = vcmask 1044484  }
 0x1cd   : > { %1763 = vmatmul.bf16.gmra.mxu2 %v4682_v2  ;;  %2275 = vmatpush.bf16.msra.mxu0 %v4872_v47 }
 0x1ce   : > { %2100 = vmatpush.bf16.msra.mxu2 %v3654_v38 }
 0x1d1   : > { %2276 = vmatpush.bf16.msra.mxu0 %v4912_v42 }
 0x1d2   : > { %v4895_v1 = vpop.f32.mrf.mxu2 }
 0x1d3   : > { %v4941_v63 = vpop.f32.mrf.mxu3 }
 0x1d5   : > { %2277 = vmatpush.bf16.msra.mxu0 %v4962_v39 }
 0x1da   : > { %1842 = vmatmul.bf16.gmra.mxu3 %v4548_v36  ;;  %v4917_v49 = vpop.f32.mrf.mxu2 }
 0x1dc   : > { %1659 = vmatmul.bf16.vlgmr.msrb.gmra.mxu1 %v4502_v5 }
 0x1dd   : > { %1768 = vmatmul.bf16.gmra.mxu2 %v4722_v18 }
 0x1e7   : > { %v1156_v13 = vpop.f32.mrf.mxu1 }
 0x1e8   : > { %v1157_v21 = vadd.f32 %v4484_v8, %v1156_v13  ;;  %v1929_v13 = vpop.f32.mrf.mxu0 }
 0x1ea   : > { %1847 = vmatmul.bf16.gmra.mxu3 %v4633_v6  ;;  %v1215_v33 = vmax.f32 %v1157_v21, 0.0 }
 0x1ec   : > { %1664 = vmatmul.bf16.gmra.mxu1 %v4548_v36 }
 0x1ed   : > { %1773 = vmatmul.bf16.gmra.mxu2 %v4767_v9 }
 0x1ef   : > { %v1158_v3 = vpop.f32.mrf.mxu1 }
 0x1f0   : > { %v1159_v59 = vadd.f32 %v4484_v8, %v1158_v3  ;;  %v4982_v20 = vpop.f32.mrf.mxu0  ;;  %v3658_v3 = vor.u32 %v3829_v17, %v3657_v19  ;;  %v5037_v17 = vperm.slane %v1313_v24, 1 }
 0x1f2   : > { %v1216_v43 = vmax.f32 %v1159_v59, 0.0  ;;  %2189 = vmatpush.bf16.msra.mxu3 %v3658_v3  ;;  %v1930_v3 = vadd.f32 %v1929_v13, %v5001_v37 }
 0x1f4   : > { %v4877_v57 = vpack.c.bf16 %v1216_v43, %v1215_v33  ;;  %v3649_v43 = vld [vmem:[%s5784_s5 + $0xd0] sm:$0xf] }
 0x1f5   : > { %v3650_v7 = vor.u32 %v3828_v15, %v3649_v43  ;;  %v5043_v15 = vperm.slane %v1313_v24, 0 }
 0x1f6   : > { %1961 = vmatmul.bf16.gmra.mxu0 %v4877_v57 }
 0x1f7   : > { %2011 = vmatpush.bf16.msra.mxu1 %v3650_v7 }
 0x1f8   : > { %v4997_v23 = vpop.f32.mrf.mxu0 }
 0x1fa   : > { %1852 = vmatmul.bf16.gmra.mxu3 %v4682_v2 }
 0x1fc   : > { %1669 = vmatmul.bf16.gmra.mxu1 %v4633_v6 }
 0x1fd   : > { %1778 = vmatmul.bf16.gmra.mxu2 %v4799_v22 }
 0x200   : > { %v5017_v58 = vpop.f32.mrf.mxu0 }
 0x208   : > { %v5047_v7 = vpop.f32.mrf.mxu0 }
 0x209   : > { %v4950_v10 = vpop.f32.mrf.mxu3 }
 0x20a   : > { %1857 = vmatmul.bf16.gmra.mxu3 %v4722_v18 }
 0x20c   : > { %1674 = vmatmul.bf16.gmra.mxu1 %v4682_v2 }
 0x20d   : > { %1783 = vmatmul.bf16.gmra.mxu2 %v4877_v57 }
 0x210   : > { %v4921_v16 = vpop.f32.mrf.mxu2 }
 0x211   : > { %v4970_v14 = vpop.f32.mrf.mxu3 }
 0x218   : > { %v4939_v53 = vpop.f32.mrf.mxu2 }
 0x21a   : > { %1862 = vmatmul.bf16.gmra.mxu3 %v4767_v9 }
 0x21c   : > { %1679 = vmatmul.bf16.gmra.mxu1 %v4722_v18 }
 0x220   : > { %v4952_v28 = vpop.f32.mrf.mxu2 }
 0x225   : > { %v1161_v27 = vpop.f32.mrf.mxu1 }
 0x226   : > { %v1162_v32 = vadd.f32 %v4484_v8, %v1161_v27 }
 0x228   : > { %v1217_v11 = vmax.f32 %v1162_v32, 0.0  ;;  %v4972_v51 = vpop.f32.mrf.mxu2 }
 0x22a   : > { %1867 = vmatmul.bf16.gmra.mxu3 %v4799_v22 }
 0x22c   : > { %1684 = vmatmul.bf16.gmra.mxu1 %v4767_v9 }
 0x22d   : > { %v1163_v61 = vpop.f32.mrf.mxu1 }
 0x22e   : > { %v1164_v41 = vadd.f32 %v4484_v8, %v1163_v61  ;;  %v5031_v61 = vor.u32 %v3825_v60, %v3659_v40  ;;  %v1933_v40 = vadd.f32 %v4982_v20, %v5001_v37 }
 0x230   : > { %v1218_v12 = vmax.f32 %v1164_v41, 0.0  ;;  %v4984_v59 = vpop.f32.mrf.mxu2  ;;  %2278 = vmatpush.bf16.msra.mxu0 %v5031_v61 }
 0x232   : > { %v4966_v35 = vpack.c.bf16 %v1218_v12, %v1217_v11 }
 0x234   : > { %1788 = vmatmul.bf16.gmra.mxu2 %v4966_v35  ;;  %1966 = vmatmul.bf16.gmra.mxu0 %v4966_v35 }
 0x238   : > { %v4999_v31 = vpop.f32.mrf.mxu2 }
 0x23a   : > { %1872 = vmatmul.bf16.gmra.mxu3 %v4877_v57 }
 0x23c   : > { %1689 = vmatmul.bf16.gmra.mxu1 %v4799_v22 }
 0x23d   : > { %v1196_v21 = vpop.f32.mrf.mxu3 }
 0x23e   : > { %v1197_v33 = vadd.f32 %v4484_v8, %v1196_v21 }
 0x240   : > { %v1231_v29 = vmax.f32 %v1197_v33, 0.0  ;;  %v5034_v11 = vpop.f32.mrf.mxu2 }
 0x245   : > { %v1198_v62 = vpop.f32.mrf.mxu3 }
 0x246   : > { %v1199_v45 = vadd.f32 %v4484_v8, %v1198_v62  ;;  %v3816_v8 = vld [vmem:[%s5784_s5 + $0x94] sm:$0xf] }
 0x247   : > { %v3622_v46 = vor.u32 %v3816_v8, %v3619_v44 }
 0x248   : > { %v1232_v30 = vmax.f32 %v1199_v45, 0.0  ;;  %v1750_v45 = vadd.f32 %v4952_v28, %v5037_v17  ;;  %v3821_v28 = vld [vmem:[%s5784_s5 + $0xb4] sm:$0xf0] }
 0x249   : > { %v1166_v34 = vpop.f32.mrf.mxu1  ;;  %2101 = vmatpush.bf16.msra.mxu2 %v3622_v46 }
 0x24a   : > { %v5003_v25 = vpack.c.bf16 %v1232_v30, %v1231_v29  ;;  %1877 = vmatmul.bf16.gmra.mxu3 %v4966_v35  ;;  %v1167_v38 = vadd.f32 %v5022_v26, %v1166_v34 }
 0x24c   : > { %1694 = vmatmul.bf16.gmra.mxu1 %v4877_v57  ;;  %v1219_v12 = vmax.f32 %v1167_v38, 0.0  ;;  %v5062_v38 = vpop.f32.mrf.mxu2 }
 0x24d   : > { %v1838_v0 = vpop.f32.mrf.mxu3 }
 0x24e   : > { %v1839_v27 = vadd.f32 %v1838_v0, %v5006_v48 }
 0x250   : > { %v2364_v32 = vpack.c.bf16 %v1928_v55, %v1839_v27  ;;  %v3625_v55 = vld [vmem:[%s5784_s5 + $0x98] sm:$0xf]  ;;  %v1174_v27 = vadd.f32 %v5022_v26, %v4917_v49 }
 0x251   : > { %v1168_v4 = vpop.f32.mrf.mxu1  ;;  %v3626_v60 = vor.u32 %v3821_v28, %v3625_v55 }
 0x252   : > { %v1169_v41 = vadd.f32 %v5022_v26, %v1168_v4  ;;  %v2493_v29 = vunpack.c.l.bf16 %v2364_v32  ;;  %v2494_v34 = vunpack.c.h.bf16 %v2364_v32 }
 0x253   : > { %2190 = vmatpush.bf16.msra.mxu3 %v3626_v60 }
 0x254   : > { %v1220_v19 = vmax.f32 %v1169_v41, 0.0  ;;  %v1172_v41 = vadd.f32 %v5022_v26, %v4895_v1  ;;  %v3617_v1 = vld [vmem:[%s5784_s5 + $0x90] sm:$0xf]  ;;  %v5085_v60 = vpop.f32.mrf.mxu2 }
 0x255   : > { %v1840_v21 = vpop.f32.mrf.mxu3 }
 0x256   : > { %v5040_v33 = vpack.c.bf16 %v1220_v19, %v1219_v12  ;;  %v1841_v43 = vadd.f32 %v1840_v21, %v5006_v48  ;;  %v1222_v19 = vmax.f32 %v1174_v27, 0.0 }
 0x258   : > { %v2368_v62 = vpack.c.bf16 %v1930_v3, %v1841_v43  ;;  %1793 = vmatmul.bf16.gmra.mxu2 %v5040_v33  ;;  %1971 = vmatmul.bf16.gmra.mxu0 %v5040_v33  ;;  %v1752_v3 = vadd.f32 %v4972_v51, %v5037_v17  ;;  %v1935_v51 = vadd.f32 %v4997_v23, %v5001_v37 }
 0x259   : > { %v1660_v30 = vpop.f32.mrf.mxu1 }
 0x25a   : > { %v2501_v13 = vunpack.c.l.bf16 %v2368_v62  ;;  %v2502_v8 = vunpack.c.h.bf16 %v2368_v62  ;;  %v1661_v44 = vadd.f32 %v1660_v30, %v5043_v15  ;;  %1882 = vmatmul.bf16.gmra.mxu3 %v5040_v33 }
 0x25c   : > { %v2789_v24 = vmax.f32 %v2493_v29, %v2501_v13  ;;  %v2810_v0 = vmax.f32 %v2494_v34, %v2502_v8  ;;  %v2363_v46 = vpack.c.bf16 %v1750_v45, %v1661_v44  ;;  %1699 = vmatmul.bf16.gmra.mxu1 %v4966_v35  ;;  %v1221_v45 = vmax.f32 %v1172_v41, 0.0  ;;  %v5072_v29 = vpop.f32.mrf.mxu0  ;;  %v3820_v13 = vld [vmem:[%s5784_s5 + $0xac] sm:$0xf0] }
 0x25d   : > { %v1843_v32 = vpop.f32.mrf.mxu3  ;;  %v3618_v28 = vor.u32 %v3820_v13, %v3617_v1 }
 0x25e   : > { %v1844_v4 = vadd.f32 %v1843_v32, %v5006_v48  ;;  %v5082_v8 = vpack.c.bf16 %v1222_v19, %v1221_v45  ;;  %v2491_v44 = vunpack.c.l.bf16 %v2363_v46  ;;  %v2492_v27 = vunpack.c.h.bf16 %v2363_v46  ;;  %v3587_v45 = vld [vmem:[%s5784_s5 + $0x70] sm:$0xf0] }
 0x25f   : > { %2012 = vmatpush.bf16.msra.mxu1 %v3618_v28 }
 0x260   : > { %v2372_v12 = vpack.c.bf16 %v1933_v40, %v1844_v4 }
 0x261   : > { %v1662_v21 = vpop.f32.mrf.mxu1 }
 0x262   : > { %v2509_v49 = vunpack.c.l.bf16 %v2372_v12  ;;  %v2510_v43 = vunpack.c.h.bf16 %v2372_v12  ;;  %v1663_v62 = vadd.f32 %v1662_v21, %v5043_v15  ;;  %v1755_v12 = vadd.f32 %v4984_v59, %v5037_v17 }
 0x264   : > { %v2790_v20 = vmax.f32 %v2789_v24, %v2509_v49  ;;  %v2811_v30 = vmax.f32 %v2810_v0, %v2510_v43  ;;  %v2367_v34 = vpack.c.bf16 %v1752_v3, %v1663_v62  ;;  %v3808_v62 = vld [vmem:[%s5784_s5 + $0x54] sm:$0xf]  ;;  %v5100_v59 = vpop.f32.mrf.mxu0 }
 0x265   : > { %v1845_v55 = vpop.f32.mrf.mxu3  ;;  %v3590_v13 = vor.u32 %v3808_v62, %v3587_v45  ;;  %v1940_v62 = vadd.f32 %v5047_v7, %v5001_v37  ;;  %v1760_v7 = vadd.f32 %v5034_v11, %v5037_v17  ;;  %v3813_v11 = vld [vmem:[%s5784_s5 + $0x74] sm:$0xf0] }
 0x266   : > { %v2499_v24 = vunpack.c.l.bf16 %v2367_v34  ;;  %v2500_v0 = vunpack.c.h.bf16 %v2367_v34  ;;  %v1846_v32 = vadd.f32 %v1845_v55, %v5006_v48  ;;  %v1179_v34 = vadd.f32 %v5022_v26, %v4939_v53  ;;  %v3817_v53 = vld [vmem:[%s5784_s5 + $0x9c] sm:$0xf] }
 0x267   : > { %2102 = vmatpush.bf16.msra.mxu2 %v3590_v13  ;;  %v1177_v55 = vadd.f32 %v5022_v26, %v4921_v16  ;;  %v1757_v16 = vadd.f32 %v4999_v31, %v5037_v17 }
 0x268   : > { %v2747_v40 = vmax.f32 %v2491_v44, %v2499_v24  ;;  %v2768_v4 = vmax.f32 %v2492_v27, %v2500_v0  ;;  %v2376_v41 = vpack.c.bf16 %v1935_v51, %v1846_v32  ;;  %1798 = vmatmul.bf16.gmra.mxu2 %v5082_v8  ;;  %1976 = vmatmul.bf16.gmra.mxu0 %v5082_v8  ;;  %v3627_v0 = vld [vmem:[%s5784_s5 + $0xb8] sm:$0xf0]  ;;  %v5115_v32 = vpop.f32.mrf.mxu2 }
 0x269   : > { %v1665_v23 = vpop.f32.mrf.mxu1 }
 0x26a   : > { %v2517_v19 = vunpack.c.l.bf16 %v2376_v41  ;;  %v2518_v46 = vunpack.c.h.bf16 %v2376_v41  ;;  %v1666_v21 = vadd.f32 %v1665_v23, %v5043_v15  ;;  %1887 = vmatmul.bf16.gmra.mxu3 %v5082_v8  ;;  %v5117_v23 = vor.u32 %v3817_v53, %v3627_v0 }
 0x26c   : > { %v2791_v3 = vmax.f32 %v2790_v20, %v2517_v19  ;;  %v2812_v49 = vmax.f32 %v2811_v30, %v2518_v46  ;;  %v2371_v43 = vpack.c.bf16 %v1755_v12, %v1666_v21  ;;  %1704 = vmatmul.bf16.gmra.mxu1 %v5040_v33  ;;  %v1938_v20 = vadd.f32 %v5017_v58, %v5001_v37 }
 0x26d   : > { %v1848_v1 = vpop.f32.mrf.mxu3  ;;  %v1224_v58 = vmax.f32 %v1179_v34, 0.0  ;;  %2279 = vmatpush.bf16.msra.mxu0 %v5117_v23  ;;  %v1223_v19 = vmax.f32 %v1177_v55, 0.0 }
 0x26e   : > { %v2507_v30 = vunpack.c.l.bf16 %v2371_v43  ;;  %v2508_v51 = vunpack.c.h.bf16 %v2371_v43  ;;  %v1849_v44 = vadd.f32 %v1848_v1, %v5006_v48 }
 0x26f   : > { %v5125_v34 = vpack.c.bf16 %v1224_v58, %v1223_v19  ;;  %v3593_v58 = vld [vmem:[%s5784_s5 + $0x58] sm:$0xf] }
 0x270   : > { %v2748_v28 = vmax.f32 %v2747_v40, %v2507_v30  ;;  %v2769_v27 = vmax.f32 %v2768_v4, %v2508_v51  ;;  %v2380_v24 = vpack.c.bf16 %v1938_v20, %v1849_v44  ;;  %v5128_v20 = vpop.f32.mrf.mxu0  ;;  %v5136_v53 = vpop.f32.mrf.mxu2 }
 0x271   : > { %v1667_v41 = vpop.f32.mrf.mxu1 }
 0x272   : > { %v2525_v40 = vunpack.c.l.bf16 %v2380_v24  ;;  %v2526_v4 = vunpack.c.h.bf16 %v2380_v24  ;;  %v1668_v12 = vadd.f32 %v1667_v41, %v5043_v15  ;;  %v1184_v41 = vadd.f32 %v5022_v26, %v4919_v50 }
 0x274   : > { %v2792_v46 = vmax.f32 %v2791_v3, %v2525_v40  ;;  %v2813_v21 = vmax.f32 %v2812_v49, %v2526_v4  ;;  %v2375_v43 = vpack.c.bf16 %v1757_v16, %v1668_v12  ;;  %v3594_v40 = vor.u32 %v3813_v11, %v3593_v58 }
 0x275   : > { %v1850_v45 = vpop.f32.mrf.mxu3  ;;  %v1943_v4 = vadd.f32 %v5072_v29, %v5001_v37  ;;  %v1945_v11 = vadd.f32 %v5100_v59, %v5001_v37 }
 0x276   : > { %v2515_v1 = vunpack.c.l.bf16 %v2375_v43  ;;  %v2516_v13 = vunpack.c.h.bf16 %v2375_v43  ;;  %v1851_v31 = vadd.f32 %v1850_v45, %v5006_v48  ;;  %2191 = vmatpush.bf16.msra.mxu3 %v3594_v40 }
 0x278   : > { %v2749_v30 = vmax.f32 %v2748_v28, %v2515_v1  ;;  %v2770_v51 = vmax.f32 %v2769_v27, %v2516_v13  ;;  %v2384_v44 = vpack.c.bf16 %v1940_v62, %v1851_v31  ;;  %1803 = vmatmul.bf16.gmra.mxu2 %v5125_v34  ;;  %1981 = vmatmul.bf16.gmra.mxu0 %v5125_v34  ;;  %v1226_v1 = vmax.f32 %v1184_v41, 0.0  ;;  %v5152_v13 = vpop.f32.mrf.mxu0 }
 0x279   : > { %v1670_v3 = vpop.f32.mrf.mxu1  ;;  %v1762_v31 = vadd.f32 %v5062_v38, %v5037_v17 }
 0x27a   : > { %v2533_v49 = vunpack.c.l.bf16 %v2384_v44  ;;  %v2534_v55 = vunpack.c.h.bf16 %v2384_v44  ;;  %v1671_v24 = vadd.f32 %v1670_v3, %v5043_v15  ;;  %1892 = vmatmul.bf16.gmra.mxu3 %v5125_v34 }
 0x27c   : > { %v2793_v0 = vmax.f32 %v2792_v46, %v2533_v49  ;;  %v2814_v28 = vmax.f32 %v2813_v21, %v2534_v55  ;;  %v2379_v27 = vpack.c.bf16 %v1760_v7, %v1671_v24  ;;  %1709 = vmatmul.bf16.gmra.mxu1 %v5082_v8  ;;  %v1182_v21 = vadd.f32 %v5022_v26, %v4897_v54  ;;  %v3585_v54 = vld [vmem:[%s5784_s5 + $0x50] sm:$0xf] }
 0x27d   : > { %v1853_v16 = vpop.f32.mrf.mxu3 }
 0x27e   : > { %v2523_v12 = vunpack.c.l.bf16 %v2379_v27  ;;  %v2524_v19 = vunpack.c.h.bf16 %v2379_v27  ;;  %v1854_v46 = vadd.f32 %v1853_v16, %v5006_v48  ;;  %v1225_v7 = vmax.f32 %v1182_v21, 0.0  ;;  %v5165_v27 = vpop.f32.mrf.mxu2 }
 0x280   : > { %v2750_v43 = vmax.f32 %v2749_v30, %v2523_v12  ;;  %v2771_v62 = vmax.f32 %v2770_v51, %v2524_v19  ;;  %v2388_v45 = vpack.c.bf16 %v1943_v4, %v1854_v46  ;;  %v3812_v30 = vld [vmem:[%s5784_s5 + $0x6c] sm:$0xf0]  ;;  %v5163_v51 = vpack.c.bf16 %v1226_v1, %v1225_v7 }
 0x281   : > { %v1672_v50 = vpop.f32.mrf.mxu1  ;;  %v3586_v58 = vor.u32 %v3812_v30, %v3585_v54  ;;  %v1765_v19 = vadd.f32 %v5085_v60, %v5037_v17  ;;  %v3555_v60 = vld [vmem:[%s5784_s5 + $0x30] sm:$0xf0] }
 0x282   : > { %v2541_v44 = vunpack.c.l.bf16 %v2388_v45  ;;  %v2542_v29 = vunpack.c.h.bf16 %v2388_v45  ;;  %v1673_v3 = vadd.f32 %v1672_v50, %v5043_v15  ;;  %v5176_v45 = vpop.f32.mrf.mxu0  ;;  %v3800_v50 = vld [vmem:[%s5784_s5 + $0x14] sm:$0xf] }
 0x283   : > { %2013 = vmatpush.bf16.msra.mxu1 %v3586_v58 }
 0x284   : > { %v2794_v49 = vmax.f32 %v2793_v0, %v2541_v44  ;;  %v2815_v55 = vmax.f32 %v2814_v28, %v2542_v29  ;;  %v2383_v24 = vpack.c.bf16 %v1762_v31, %v1673_v3  ;;  %v1189_v31 = vadd.f32 %v5022_v26, %v4941_v63  ;;  %v3809_v63 = vld [vmem:[%s5784_s5 + $0x5c] sm:$0xf] }
 0x285   : > { %v1855_v38 = vpop.f32.mrf.mxu3  ;;  %v3558_v29 = vor.u32 %v3800_v50, %v3555_v60  ;;  %v1948_v3 = vadd.f32 %v5128_v20, %v5001_v37  ;;  %v3595_v20 = vld [vmem:[%s5784_s5 + $0x78] sm:$0xf0] }
 0x286   : > { %v2531_v0 = vunpack.c.l.bf16 %v2383_v24  ;;  %v2532_v28 = vunpack.c.h.bf16 %v2383_v24  ;;  %v1856_v41 = vadd.f32 %v1855_v38, %v5006_v48  ;;  %v1187_v24 = vadd.f32 %v5022_v26, %v4923_v52  ;;  %v5192_v54 = vpop.f32.mrf.mxu2 }
 0x287   : > { %2103 = vmatpush.bf16.msra.mxu2 %v3558_v29  ;;  %v1767_v52 = vadd.f32 %v5115_v32, %v5037_v17 }
 0x288   : > { %v2751_v16 = vmax.f32 %v2750_v43, %v2531_v0  ;;  %v2772_v40 = vmax.f32 %v2771_v62, %v2532_v28  ;;  %v2392_v4 = vpack.c.bf16 %v1945_v11, %v1856_v41  ;;  %1808 = vmatmul.bf16.gmra.mxu2 %v5163_v51  ;;  %1986 = vmatmul.bf16.gmra.mxu0 %v5163_v51  ;;  %v1228_v11 = vmax.f32 %v1189_v31, 0.0 }
 0x289   : > { %v1675_v12 = vpop.f32.mrf.mxu1  ;;  %v5201_v28 = vor.u32 %v3809_v63, %v3595_v20  ;;  %v1953_v63 = vadd.f32 %v5176_v45, %v5001_v37 }
 0x28a   : > { %v2549_v46 = vunpack.c.l.bf16 %v2392_v4  ;;  %v2550_v21 = vunpack.c.h.bf16 %v2392_v4  ;;  %v1676_v59 = vadd.f32 %v1675_v12, %v5043_v15  ;;  %1897 = vmatmul.bf16.gmra.mxu3 %v5163_v51  ;;  %v1227_v4 = vmax.f32 %v1187_v24, 0.0 }
 0x28b   : > { %3874 = vmatpush.bf16.msrb.mxu2 %v4838_v56  ;;  %2280 = vmatpush.bf16.msra.mxu0 %v5201_v28 }
 0x28c   : > { %v2795_v1 = vmax.f32 %v2794_v49, %v2549_v46  ;;  %v2816_v43 = vmax.f32 %v2815_v55, %v2550_v21  ;;  %v2387_v62 = vpack.c.bf16 %v1765_v19, %v1676_v59  ;;  %1714 = vmatmul.bf16.gmra.mxu1 %v5125_v34  ;;  %v5208_v56 = vpack.c.bf16 %v1228_v11, %v1227_v4  ;;  %v1954_v21 = vpop.f32.mrf.mxu0 }
 0x28d   : > { %v1858_v44 = vpop.f32.mrf.mxu3 }
 0x28e   : > { %v2539_v7 = vunpack.c.l.bf16 %v2387_v62  ;;  %v2540_v49 = vunpack.c.h.bf16 %v2387_v62  ;;  %v1859_v55 = vadd.f32 %v1858_v44, %v5006_v48  ;;  %v1950_v62 = vadd.f32 %v5152_v13, %v5001_v37 }
 0x28f   : > { %3875 = vmatpush.bf16.msrb.mxu2 %v4872_v47 }
 0x290   : > { %v2752_v30 = vmax.f32 %v2751_v16, %v2539_v7  ;;  %v2773_v38 = vmax.f32 %v2772_v40, %v2540_v49  ;;  %v2396_v58 = vpack.c.bf16 %v1948_v3, %v1859_v55 }
 0x291   : > { %v1677_v0 = vpop.f32.mrf.mxu1 }
 0x292   : > { %v2557_v41 = vunpack.c.l.bf16 %v2396_v58  ;;  %v2558_v16 = vunpack.c.h.bf16 %v2396_v58  ;;  %v1678_v40 = vadd.f32 %v1677_v0, %v5043_v15 }
 0x293   : > { %3876 = vmatpush.bf16.msrb.mxu2 %v4912_v42  ;;  %v3805_v42 = vld [vmem:[%s5784_s5 + $0x34] sm:$0xf0] }
 0x294   : > { %v2796_v12 = vmax.f32 %v2795_v1, %v2557_v41  ;;  %v2817_v19 = vmax.f32 %v2816_v43, %v2558_v16  ;;  %v2391_v46 = vpack.c.bf16 %v1767_v52, %v1678_v40  ;;  %v5215_v1 = vpop.f32.mrf.mxu2  ;;  %v1770_v43 = vadd.f32 %v5136_v53, %v5037_v17  ;;  %v1957_v41 = vpop.f32.mrf.mxu0 }
 0x295   : > { %v1860_v59 = vpop.f32.mrf.mxu3  ;;  %v1194_v53 = vadd.f32 %v5022_v26, %v4970_v14  ;;  %v1192_v52 = vadd.f32 %v5022_v26, %v4950_v10  ;;  %v3801_v10 = vld [vmem:[%s5784_s5 + $0x1c] sm:$0xf] }
 0x296   : > { %v2547_v32 = vunpack.c.l.bf16 %v2391_v46  ;;  %v2548_v50 = vunpack.c.h.bf16 %v2391_v46  ;;  %v1861_v60 = vadd.f32 %v1860_v59, %v5006_v48  ;;  %v3563_v26 = vld [vmem:[%s5784_s5 + $0x38] sm:$0xf0] }
 0x297   : > { %3877 = vmatpush.bf16.msrb.mxu2 %v4962_v39  ;;  %v1230_v14 = vmax.f32 %v1194_v53, 0.0  ;;  %v1772_v39 = vadd.f32 %v5165_v27, %v5037_v17  ;;  %v1229_v59 = vmax.f32 %v1192_v52, 0.0  ;;  %v3553_v27 = vld [vmem:[%s5784_s5 + $0x10] sm:$0xf]  ;;  %v1958_v52 = vadd.f32 %v1957_v41, %v5001_v37 }
 0x298   : > { %v2753_v31 = vmax.f32 %v2752_v30, %v2547_v32  ;;  %v2774_v44 = vmax.f32 %v2773_v38, %v2548_v50  ;;  %v2400_v29 = vpack.c.bf16 %v1950_v62, %v1861_v60  ;;  %1813 = vmatmul.bf16.gmra.mxu2 %v5208_v56  ;;  %1991 = vmatmul.bf16.gmra.mxu0 %v5208_v56  ;;  %v3561_v30 = vld [vmem:[%s5784_s5 + $0x18] sm:$0xf]  ;;  %v3804_v60 = vld [vmem:[%s5784_s5 + $0x2c] sm:$0xf0] }
 0x299   : > { %v1680_v47 = vpop.f32.mrf.mxu1  ;;  %v3562_v58 = vor.u32 %v3805_v42, %v3561_v30 }
 0x29a   : > { %v2565_v13 = vunpack.c.l.bf16 %v2400_v29  ;;  %v2566_v3 = vunpack.c.h.bf16 %v2400_v29  ;;  %v1681_v7 = vadd.f32 %v1680_v47, %v5043_v15  ;;  %1902 = vmatmul.bf16.gmra.mxu3 %v5208_v56  ;;  %v3554_v47 = vor.u32 %v3804_v60, %v3553_v27 }
 0x29b   : > { %2192 = vmatpush.bf16.msra.mxu3 %v3562_v58  ;;  %3878 = vmatpush.bf16.msrb.mxu2 %v5031_v61 }
 0x29c   : > { %v2797_v49 = vmax.f32 %v2796_v12, %v2565_v13  ;;  %v2818_v55 = vmax.f32 %v2817_v19, %v2566_v3  ;;  %v2395_v24 = vpack.c.bf16 %v1770_v43, %v1681_v7  ;;  %1719 = vmatmul.bf16.gmra.mxu1 %v5163_v51  ;;  %v5241_v62 = vpop.f32.mrf.mxu2  ;;  %v1955_v43 = vadd.f32 %v1954_v21, %v5001_v37  ;;  %v1959_v30 = vpop.f32.mrf.mxu0 }
 0x29d   : > { %v1863_v38 = vpop.f32.mrf.mxu3  ;;  %2014 = vmatpush.bf16.msra.mxu1 %v3554_v47 }
 0x29e   : > { %v2555_v20 = vunpack.c.l.bf16 %v2395_v24  ;;  %v2556_v11 = vunpack.c.h.bf16 %v2395_v24  ;;  %v1864_v0 = vadd.f32 %v1863_v38, %v5006_v48 }
 0x29f   : > { %3879 = vmatpush.bf16.msrb.mxu2 %v5117_v23  ;;  %v1775_v23 = vadd.f32 %v5192_v54, %v5037_v17 }
 0x2a0   : > { %v2754_v16 = vmax.f32 %v2753_v31, %v2555_v20  ;;  %v2775_v40 = vmax.f32 %v2774_v44, %v2556_v11  ;;  %v2404_v4 = vpack.c.bf16 %v1953_v63, %v1864_v0  ;;  %v3566_v31 = vor.u32 %v3801_v10, %v3563_v26 }
 0x2a1   : > { %v1682_v12 = vpop.f32.mrf.mxu1  ;;  %v5255_v44 = vpack.c.bf16 %v1230_v14, %v1229_v59 }
 0x2a2   : > { %v2573_v45 = vunpack.c.l.bf16 %v2404_v4  ;;  %v2574_v19 = vunpack.c.h.bf16 %v2404_v4  ;;  %v1683_v46 = vadd.f32 %v1682_v12, %v5043_v15  ;;  %2281 = vmatpush.bf16.msra.mxu0 %v3566_v31 }
 0x2a3   : > { %3880 = vmatpush.bf16.msrb.mxu2 %v5201_v28 }
 0x2a4   : > { %v2798_v32 = vmax.f32 %v2797_v49, %v2573_v45  ;;  %v2819_v61 = vmax.f32 %v2818_v55, %v2574_v19  ;;  %v2399_v50 = vpack.c.bf16 %v1772_v39, %v1683_v46  ;;  %v1781_v11 = vpop.f32.mrf.mxu2  ;;  %v1962_v12 = vpop.f32.mrf.mxu0  ;;  %v1777_v45 = vadd.f32 %v5215_v1, %v5037_v17 }
 0x2a5   : > { %v1865_v29 = vpop.f32.mrf.mxu3 }
 0x2a6   : > { %v2563_v13 = vunpack.c.l.bf16 %v2399_v50  ;;  %v2564_v3 = vunpack.c.h.bf16 %v2399_v50  ;;  %v1866_v7 = vadd.f32 %v1865_v29, %v5006_v48 }
 0x2a7   : > { %3881 = vmatpush.bf16.msrb.mxu2 %v3566_v31 }
 0x2a8   : > { %v2755_v49 = vmax.f32 %v2754_v16, %v2563_v13  ;;  %v2776_v55 = vmax.f32 %v2775_v40, %v2564_v3  ;;  %v2408_v24 = vpack.c.bf16 %v1955_v43, %v1866_v7  ;;  %1818 = vmatmul.bf16.gmra.mxu2 %v5255_v44  ;;  %1996 = vmatmul.bf16.gmra.mxu0 %v5255_v44 }
 0x2a9   : > { %v1685_v42 = vpop.f32.mrf.mxu1  ;;  %v1780_v13 = vadd.f32 %v5241_v62, %v5037_v17 }
 0x2aa   : > { %v2581_v21 = vunpack.c.l.bf16 %v2408_v24  ;;  %v2582_v53 = vunpack.c.h.bf16 %v2408_v24  ;;  %v1686_v38 = vadd.f32 %v1685_v42, %v5043_v15  ;;  %1907 = vmatmul.bf16.gmra.mxu3 %v5255_v44 }
 0x2ac   : > { %v2799_v58 = vmax.f32 %v2798_v32, %v2581_v21  ;;  %v2820_v63 = vmax.f32 %v2819_v61, %v2582_v53  ;;  %v2403_v20 = vpack.c.bf16 %v1775_v23, %v1686_v38  ;;  %1724 = vmatmul.bf16.gmra.mxu1 %v5208_v56  ;;  %v1960_v61 = vadd.f32 %v1959_v30, %v5001_v37  ;;  %v1784_v31 = vpop.f32.mrf.mxu2 }
 0x2ad   : > { %v1868_v0 = vpop.f32.mrf.mxu3  ;;  %v1963_v21 = vadd.f32 %v1962_v12, %v5001_v37 }
 0x2ae   : > { %v2571_v28 = vunpack.c.l.bf16 %v2403_v20  ;;  %v2572_v16 = vunpack.c.h.bf16 %v2403_v20  ;;  %v1869_v54 = vadd.f32 %v1868_v0, %v5006_v48 }
 0x2b0   : > { %v2756_v40 = vmax.f32 %v2755_v49, %v2571_v28  ;;  %v2777_v4 = vmax.f32 %v2776_v55, %v2572_v16  ;;  %v2412_v14 = vpack.c.bf16 %v1958_v52, %v1869_v54  ;;  %v1964_v55 = vpop.f32.mrf.mxu0  ;;  %v1782_v28 = vadd.f32 %v1781_v11, %v5037_v17 }
 0x2b1   : > { %v1687_v39 = vpop.f32.mrf.mxu1 }
 0x2b2   : > { %v2589_v19 = vunpack.c.l.bf16 %v2412_v14  ;;  %v2590_v46 = vunpack.c.h.bf16 %v2412_v14  ;;  %v1688_v59 = vadd.f32 %v1687_v39, %v5043_v15 }
 0x2b4   : > { %v2800_v10 = vmax.f32 %v2799_v58, %v2589_v19  ;;  %v2821_v26 = vmax.f32 %v2820_v63, %v2590_v46  ;;  %v2407_v32 = vpack.c.bf16 %v1777_v45, %v1688_v59  ;;  %v1786_v0 = vpop.f32.mrf.mxu2  ;;  %v1965_v19 = vadd.f32 %v1964_v55, %v5001_v37 }
 0x2b5   : > { %v1870_v41 = vpop.f32.mrf.mxu3 }
 0x2b6   : > { %v2579_v50 = vunpack.c.l.bf16 %v2407_v32  ;;  %v2580_v27 = vunpack.c.h.bf16 %v2407_v32  ;;  %v1871_v60 = vadd.f32 %v1870_v41, %v5006_v48 }
 0x2b8   : > { %v2757_v29 = vmax.f32 %v2756_v40, %v2579_v50  ;;  %v2778_v47 = vmax.f32 %v2777_v4, %v2580_v27  ;;  %v2416_v43 = vpack.c.bf16 %v1960_v61, %v1871_v60  ;;  %1823 = vmatmul.bf16.gmra.mxu2 %v5003_v25  ;;  %2001 = vmatmul.bf16.gmra.mxu0 %v5003_v25  ;;  %v1967_v4 = vpop.f32.mrf.mxu0 }
 0x2b9   : > { %v1690_v1 = vpop.f32.mrf.mxu1  ;;  %v1785_v50 = vadd.f32 %v1784_v31, %v5037_v17 }
 0x2ba   : > { %v2597_v3 = vunpack.c.l.bf16 %v2416_v43  ;;  %v2598_v7 = vunpack.c.h.bf16 %v2416_v43  ;;  %v1691_v49 = vadd.f32 %v1690_v1, %v5043_v15  ;;  %1912 = vmatmul.bf16.gmra.mxu3 %v5003_v25 }
 0x2bc   : > { %v2801_v24 = vmax.f32 %v2800_v10, %v2597_v3  ;;  %v2822_v30 = vmax.f32 %v2821_v26, %v2598_v7  ;;  %v2411_v42 = vpack.c.bf16 %v1780_v13, %v1691_v49  ;;  %1729 = vmatmul.bf16.gmra.mxu1 %v5255_v44  ;;  %v1789_v11 = vpop.f32.mrf.mxu2 }
 0x2bd   : > { %v1873_v23 = vpop.f32.mrf.mxu3 }
 0x2be   : > { %v2587_v53 = vunpack.c.l.bf16 %v2411_v42  ;;  %v2588_v38 = vunpack.c.h.bf16 %v2411_v42  ;;  %v1874_v58 = vadd.f32 %v1873_v23, %v5006_v48 }
 0x2c0   : > { %v2758_v62 = vmax.f32 %v2757_v29, %v2587_v53  ;;  %v2779_v63 = vmax.f32 %v2778_v47, %v2588_v38  ;;  %v2420_v20 = vpack.c.bf16 %v1963_v21, %v1874_v58  ;;  %v1969_v13 = vpop.f32.mrf.mxu0 }
 0x2c1   : > { %v1692_v52 = vpop.f32.mrf.mxu1 }
 0x2c2   : > { %v2605_v16 = vunpack.c.l.bf16 %v2420_v20  ;;  %v2606_v54 = vunpack.c.h.bf16 %v2420_v20  ;;  %v1693_v40 = vadd.f32 %v1692_v52, %v5043_v15 }
 0x2c4   : > { %v2802_v14 = vmax.f32 %v2801_v24, %v2605_v16  ;;  %v2823_v39 = vmax.f32 %v2822_v30, %v2606_v54  ;;  %v2415_v45 = vpack.c.bf16 %v1782_v28, %v1693_v40  ;;  %v1968_v30 = vadd.f32 %v1967_v4, %v5001_v37  ;;  %v1791_v28 = vpop.f32.mrf.mxu2 }
 0x2c5   : > { %v1875_v12 = vpop.f32.mrf.mxu3 }
 0x2c6   : > { %v2595_v46 = vunpack.c.l.bf16 %v2415_v45  ;;  %v2596_v59 = vunpack.c.h.bf16 %v2415_v45  ;;  %v1876_v10 = vadd.f32 %v1875_v12, %v5006_v48 }
 0x2c8   : > { %v2759_v26 = vmax.f32 %v2758_v62, %v2595_v46  ;;  %v2780_v32 = vmax.f32 %v2779_v63, %v2596_v59  ;;  %v2424_v41 = vpack.c.bf16 %v1965_v19, %v1876_v10  ;;  %2104 = vmatmul.bf16.vlgmr.msra.gmra.mxu2 %v4502_v5  ;;  %2282 = vmatmul.bf16.vlgmr.msra.gmra.mxu0 %v4502_v5 }
 0x2c9   : > { %v1695_v61 = vpop.f32.mrf.mxu1  ;;  %v1787_v62 = vadd.f32 %v1786_v0, %v5037_v17  ;;  %v1970_v46 = vadd.f32 %v1969_v13, %v5001_v37 }
 0x2ca   : > { %v2613_v27 = vunpack.c.l.bf16 %v2424_v41  ;;  %v2614_v60 = vunpack.c.h.bf16 %v2424_v41  ;;  %v1696_v29 = vadd.f32 %v1695_v61, %v5043_v15  ;;  %2193 = vmatmul.bf16.vlgmr.msra.gmra.mxu3 %v4502_v5  ;;  %v1790_v41 = vadd.f32 %v1789_v11, %v5037_v17 }
 0x2cc   : > { %v2803_v47 = vmax.f32 %v2802_v14, %v2613_v27  ;;  %v2824_v43 = vmax.f32 %v2823_v39, %v2614_v60  ;;  %v2419_v1 = vpack.c.bf16 %v1785_v50, %v1696_v29  ;;  %1734 = vmatmul.bf16.gmra.mxu1 %v5003_v25 }
 0x2cd   : > { %v1878_v3 = vpop.f32.mrf.mxu3 }
 0x2ce   : > { %v2804_v7 = vrot.slane %v2803_v47, 4  ;;  %v2825_v49 = vrot.slane %v2824_v43, 4  ;;  %v2603_v55 = vunpack.c.l.bf16 %v2419_v1  ;;  %v2604_v24 = vunpack.c.h.bf16 %v2419_v1 }
 0x2cf   : > { %v1879_v31 = vadd.f32 %v1878_v3, %v5006_v48 }
 0x2d0   : > { %v2805_v42 = vmax.f32 %v2803_v47, %v2804_v7  ;;  %v2826_v23 = vmax.f32 %v2824_v43, %v2825_v49  ;;  %v2760_v21 = vmax.f32 %v2759_v26, %v2603_v55  ;;  %v2781_v53 = vmax.f32 %v2780_v32, %v2604_v24 }
 0x2d1   : > { %v2428_v38 = vpack.c.bf16 %v1968_v30, %v1879_v31  ;;  %v1697_v58 = vpop.f32.mrf.mxu1 }
 0x2d2   : > { %v2806_v63 = vrot.slane %v2805_v42, 2  ;;  %v2827_v20 = vrot.slane %v2826_v23, 2  ;;  %v1698_v52 = vadd.f32 %v1697_v58, %v5043_v15 }
 0x2d3   : > { %v2621_v43 = vunpack.c.l.bf16 %v2428_v38  ;;  %v2622_v1 = vunpack.c.h.bf16 %v2428_v38 }
 0x2d4   : > { %v2807_v16 = vmax.f32 %v2805_v42, %v2806_v63  ;;  %v2828_v54 = vmax.f32 %v2826_v23, %v2827_v20  ;;  %v2423_v40 = vpack.c.bf16 %v1787_v62, %v1698_v52 }
 0x2d5   : > { %v1880_v14 = vpop.f32.mrf.mxu3  ;;  %v1972_v4 = vpop.f32.mrf.mxu0 }
 0x2d6   : > { %v2808_v39 = vrot.slane %v2807_v16, 1  ;;  %v2829_v45 = vrot.slane %v2828_v54, 1  ;;  %v2611_v12 = vunpack.c.l.bf16 %v2423_v40  ;;  %v2612_v19 = vunpack.c.h.bf16 %v2423_v40 }
 0x2d7   : > { %v1881_v59 = vadd.f32 %v1880_v14, %v5006_v48 }
 0x2d8   : > { %v2809_v10 = vmax.f32 %v2807_v16, %v2808_v39  ;;  %v2830_v0 = vmax.f32 %v2828_v54, %v2829_v45  ;;  %v2761_v26 = vmax.f32 %v2760_v21, %v2611_v12  ;;  %v2782_v32 = vmax.f32 %v2781_v53, %v2612_v19  ;;  %2109 = vmatmul.bf16.gmra.mxu2 %v4548_v36 }
 0x2d9   : > { %v2432_v61 = vpack.c.bf16 %v1970_v46, %v1881_v59  ;;  %2287 = vmatmul.bf16.gmra.mxu0 %v4548_v36  ;;  %v1700_v50 = vpop.f32.mrf.mxu1  ;;  %v1973_v53 = vadd.f32 %v1972_v4, %v5001_v37 }
 0x2da   : > { %v3084_v27 = vpack.c.bf16 %v2830_v0, %v2809_v10  ;;  %v2762_v60 = vrot.slane %v2761_v26, 4  ;;  %v2783_v29 = vrot.slane %v2782_v32, 4  ;;  %v1701_v47 = vadd.f32 %v1700_v50, %v5043_v15  ;;  %2198 = vmatmul.bf16.gmra.mxu3 %v4548_v36 }
 0x2db   : > { %v2629_v13 = vunpack.c.l.bf16 %v2432_v61  ;;  %v2630_v3 = vunpack.c.h.bf16 %v2432_v61  ;;  %v1794_v7 = vpop.f32.mrf.mxu2 }
 0x2dc   : > { %v2763_v49 = vmax.f32 %v2761_v26, %v2762_v60  ;;  %v2784_v55 = vmax.f32 %v2782_v32, %v2783_v29  ;;  %2015 = vmatmul.bf16.vlgmr.msra.gmra.mxu1 %v4502_v5  ;;  %v2427_v30 = vpack.c.bf16 %v1790_v41, %v1701_v47  ;;  %v1792_v5 = vadd.f32 %v1791_v28, %v5037_v17 }
 0x2dd   : > { %v2957_v11 = vmax.f32 %v2621_v43, %v2629_v13  ;;  %v2978_v24 = vmax.f32 %v2622_v1, %v2630_v3  ;;  %v1883_v31 = vpop.f32.mrf.mxu3  ;;  %v1974_v42 = vpop.f32.mrf.mxu0  ;;  %v3104_v4 = vrot.slane %v3084_v27, 6  ;;  %v3105_v59 = vrot.slane %v3084_v27, 1 }
 0x2de   : > { %v2764_v23 = vrot.slane %v2763_v49, 2  ;;  %v2785_v21 = vrot.slane %v2784_v55, 2  ;;  %v1884_v58 = vadd.f32 %v1883_v31, %v5006_v48  ;;  %v1975_v41 = vadd.f32 %v1974_v42, %v5001_v37 }
 0x2df   : > { %v2619_v28 = vunpack.c.l.bf16 %v2427_v30  ;;  %v2620_v50 = vunpack.c.h.bf16 %v2427_v30  ;;  %v3124_v27 = vsel %vm3121_vm1, %v3104_v4, %v3105_v59  ;;  %v1795_v1 = vadd.f32 %v1794_v7, %v5037_v17 }
 0x2e0   : > { %v2765_v62 = vmax.f32 %v2763_v49, %v2764_v23  ;;  %v2786_v38 = vmax.f32 %v2784_v55, %v2785_v21  ;;  %v2436_v63 = vpack.c.bf16 %v1973_v53, %v1884_v58 }
 0x2e1   : > { %v1702_v20 = vpop.f32.mrf.mxu1 }
 0x2e2   : > { %v2766_v52 = vrot.slane %v2765_v62, 1  ;;  %v2787_v16 = vrot.slane %v2786_v38, 1  ;;  %v2637_v54 = vunpack.c.l.bf16 %v2436_v63  ;;  %v2638_v40 = vunpack.c.h.bf16 %v2436_v63 }
 0x2e3   : > { %v1703_v14 = vadd.f32 %v1702_v20, %v5043_v15  ;;  %v1796_v39 = vpop.f32.mrf.mxu2 }
 0x2e4   : > { %v2767_v45 = vmax.f32 %v2765_v62, %v2766_v52  ;;  %v2788_v12 = vmax.f32 %v2786_v38, %v2787_v16  ;;  %v2958_v19 = vmax.f32 %v2957_v11, %v2637_v54  ;;  %v2979_v46 = vmax.f32 %v2978_v24, %v2638_v40 }
 0x2e5   : > { %v2431_v10 = vpack.c.bf16 %v1792_v5, %v1703_v14  ;;  %v1885_v0 = vpop.f32.mrf.mxu3  ;;  %v1977_v26 = vpop.f32.mrf.mxu0  ;;  %v1797_v5 = vadd.f32 %v1796_v39, %v5037_v17 }
 0x2e6   : > { %v3083_v32 = vpack.c.bf16 %v2788_v12, %v2767_v45  ;;  %v1886_v61 = vadd.f32 %v1885_v0, %v5006_v48  ;;  %v1978_v62 = vadd.f32 %v1977_v26, %v5001_v37 }
 0x2e7   : > { %v2627_v60 = vunpack.c.l.bf16 %v2431_v10  ;;  %v2628_v29 = vunpack.c.h.bf16 %v2431_v10 }
 0x2e8   : > { %v3103_v47 = vrot.slane %v3083_v32, 3  ;;  %v2440_v43 = vpack.c.bf16 %v1975_v41, %v1886_v61  ;;  %2114 = vmatmul.bf16.gmra.mxu2 %v4633_v6 }
 0x2e9   : > { %v2915_v13 = vmax.f32 %v2619_v28, %v2627_v60  ;;  %v2936_v3 = vmax.f32 %v2620_v50, %v2628_v29  ;;  %2292 = vmatmul.bf16.gmra.mxu0 %v4633_v6  ;;  %v1705_v49 = vpop.f32.mrf.mxu1 }
 0x2ea   : > { %v3120_v55 = vsel %vm3117_vm2, %v3083_v32, %v3103_v47  ;;  %v2645_v11 = vunpack.c.l.bf16 %v2440_v43  ;;  %v2646_v24 = vunpack.c.h.bf16 %v2440_v43  ;;  %v1706_v30 = vadd.f32 %v1705_v49, %v5043_v15  ;;  %2203 = vmatmul.bf16.gmra.mxu3 %v4633_v6 }
 0x2eb   : > { %v5320_v31 = vsel %vm3125_vm3, %v3120_v55, %v3124_v27  ;;  %v1799_v42 = vpop.f32.mrf.mxu2 }
 0x2ec   : > { %v2959_v23 = vmax.f32 %v2958_v19, %v2645_v11  ;;  %v2980_v21 = vmax.f32 %v2979_v46, %v2646_v24  ;;  %v2435_v7 = vpack.c.bf16 %v1795_v1, %v1706_v30  ;;  %2020 = vmatmul.bf16.gmra.mxu1 %v4548_v36  ;;  %v1800_v60 = vadd.f32 %v1799_v42, %v5037_v17 }
 0x2ed   : > { %v1888_v53 = vpop.f32.mrf.mxu3  ;;  %v1979_v58 = vpop.f32.mrf.mxu0 }
 0x2ee   : > { %v2635_v38 = vunpack.c.l.bf16 %v2435_v7  ;;  %v2636_v63 = vunpack.c.h.bf16 %v2435_v7  ;;  %v1889_v20 = vadd.f32 %v1888_v53, %v5006_v48  ;;  %v1980_v0 = vadd.f32 %v1979_v58, %v5001_v37 }
 0x2f0   : > { %v2916_v52 = vmax.f32 %v2915_v13, %v2635_v38  ;;  %v2937_v16 = vmax.f32 %v2936_v3, %v2636_v63  ;;  %v2444_v54 = vpack.c.bf16 %v1978_v62, %v1889_v20 }
 0x2f1   : > { %v1707_v40 = vpop.f32.mrf.mxu1 }
 0x2f2   : > { %v2653_v14 = vunpack.c.l.bf16 %v2444_v54  ;;  %v2654_v45 = vunpack.c.h.bf16 %v2444_v54  ;;  %v1708_v12 = vadd.f32 %v1707_v40, %v5043_v15 }
 0x2f3   : > { %v1801_v19 = vpop.f32.mrf.mxu2 }
 0x2f4   : > { %v2960_v36 = vmax.f32 %v2959_v23, %v2653_v14  ;;  %v2981_v46 = vmax.f32 %v2980_v21, %v2654_v45  ;;  %v2439_v4 = vpack.c.bf16 %v1797_v5, %v1708_v12  ;;  %v1802_v58 = vadd.f32 %v1801_v19, %v5037_v17 }
 0x2f5   : > { %v1890_v59 = vpop.f32.mrf.mxu3  ;;  %v1982_v10 = vpop.f32.mrf.mxu0 }
 0x2f6   : > { %v2643_v26 = vunpack.c.l.bf16 %v2439_v4  ;;  %v2644_v32 = vunpack.c.h.bf16 %v2439_v4  ;;  %v1891_v41 = vadd.f32 %v1890_v59, %v5006_v48  ;;  %v1983_v11 = vadd.f32 %v1982_v10, %v5001_v37 }
 0x2f8   : > { %v2917_v61 = vmax.f32 %v2916_v52, %v2643_v26  ;;  %v2938_v28 = vmax.f32 %v2937_v16, %v2644_v32  ;;  %v2448_v50 = vpack.c.bf16 %v1980_v0, %v1891_v41  ;;  %2119 = vmatmul.bf16.gmra.mxu2 %v4682_v2 }
 0x2f9   : > { %2297 = vmatmul.bf16.gmra.mxu0 %v4682_v2  ;;  %v1710_v39 = vpop.f32.mrf.mxu1 }
 0x2fa   : > { %v2661_v29 = vunpack.c.l.bf16 %v2448_v50  ;;  %v2662_v47 = vunpack.c.h.bf16 %v2448_v50  ;;  %v1711_v43 = vadd.f32 %v1710_v39, %v5043_v15  ;;  %2208 = vmatmul.bf16.gmra.mxu3 %v4682_v2 }
 0x2fb   : > { %v1804_v27 = vpop.f32.mrf.mxu2 }
 0x2fc   : > { %v2961_v1 = vmax.f32 %v2960_v36, %v2661_v29  ;;  %v2982_v13 = vmax.f32 %v2981_v46, %v2662_v47  ;;  %v2443_v3 = vpack.c.bf16 %v1800_v60, %v1711_v43  ;;  %2025 = vmatmul.bf16.gmra.mxu1 %v4633_v6  ;;  %v1805_v59 = vadd.f32 %v1804_v27, %v5037_v17 }
 0x2fd   : > { %v1893_v49 = vpop.f32.mrf.mxu3  ;;  %v1984_v55 = vpop.f32.mrf.mxu0 }
 0x2fe   : > { %v2651_v24 = vunpack.c.l.bf16 %v2443_v3  ;;  %v2652_v30 = vunpack.c.h.bf16 %v2443_v3  ;;  %v1894_v42 = vadd.f32 %v1893_v49, %v5006_v48  ;;  %v1985_v5 = vadd.f32 %v1984_v55, %v5001_v37 }
 0x300   : > { %v2918_v23 = vmax.f32 %v2917_v61, %v2651_v24  ;;  %v2939_v21 = vmax.f32 %v2938_v28, %v2652_v30  ;;  %v2452_v7 = vpack.c.bf16 %v1983_v11, %v1894_v42 }
 0x301   : > { %v1712_v53 = vpop.f32.mrf.mxu1 }
 0x302   : > { %v2669_v62 = vunpack.c.l.bf16 %v2452_v7  ;;  %v2670_v38 = vunpack.c.h.bf16 %v2452_v7  ;;  %v1713_v63 = vadd.f32 %v1712_v53, %v5043_v15 }
 0x303   : > { %v1806_v20 = vpop.f32.mrf.mxu2 }
 0x304   : > { %v2962_v6 = vmax.f32 %v2961_v1, %v2669_v62  ;;  %v2983_v52 = vmax.f32 %v2982_v13, %v2670_v38  ;;  %v2447_v16 = vpack.c.bf16 %v1802_v58, %v1713_v63  ;;  %v1807_v49 = vadd.f32 %v1806_v20, %v5037_v17 }
 0x305   : > { %v1895_v54 = vpop.f32.mrf.mxu3  ;;  %v1987_v40 = vpop.f32.mrf.mxu0 }
 0x306   : > { %v2659_v14 = vunpack.c.l.bf16 %v2447_v16  ;;  %v2660_v45 = vunpack.c.h.bf16 %v2447_v16  ;;  %v1896_v12 = vadd.f32 %v1895_v54, %v5006_v48  ;;  %v1988_v60 = vadd.f32 %v1987_v40, %v5001_v37 }
 0x308   : > { %v2919_v36 = vmax.f32 %v2918_v23, %v2659_v14  ;;  %v2940_v46 = vmax.f32 %v2939_v21, %v2660_v45  ;;  %v2456_v4 = vpack.c.bf16 %v1985_v5, %v1896_v12  ;;  %2124 = vmatmul.bf16.gmra.mxu2 %v4722_v18 }
 0x309   : > { %2302 = vmatmul.bf16.gmra.mxu0 %v4722_v18  ;;  %v1715_v19 = vpop.f32.mrf.mxu1 }
 0x30a   : > { %v2677_v10 = vunpack.c.l.bf16 %v2456_v4  ;;  %v2678_v0 = vunpack.c.h.bf16 %v2456_v4  ;;  %v1716_v26 = vadd.f32 %v1715_v19, %v5043_v15  ;;  %2213 = vmatmul.bf16.gmra.mxu3 %v4722_v18 }
 0x30b   : > { %v1809_v32 = vpop.f32.mrf.mxu2 }
 0x30c   : > { %v2963_v41 = vmax.f32 %v2962_v6, %v2677_v10  ;;  %v2984_v61 = vmax.f32 %v2983_v52, %v2678_v0  ;;  %v2451_v28 = vpack.c.bf16 %v1805_v59, %v1716_v26  ;;  %2030 = vmatmul.bf16.gmra.mxu1 %v4682_v2  ;;  %v1810_v16 = vadd.f32 %v1809_v32, %v5037_v17 }
 0x30d   : > { %v1898_v50 = vpop.f32.mrf.mxu3  ;;  %v1989_v39 = vpop.f32.mrf.mxu0 }
 0x30e   : > { %v2667_v29 = vunpack.c.l.bf16 %v2451_v28  ;;  %v2668_v47 = vunpack.c.h.bf16 %v2451_v28  ;;  %v1899_v43 = vadd.f32 %v1898_v50, %v5006_v48  ;;  %v1990_v53 = vadd.f32 %v1989_v39, %v5001_v37 }
 0x310   : > { %v2920_v27 = vmax.f32 %v2919_v36, %v2667_v29  ;;  %v2941_v1 = vmax.f32 %v2940_v46, %v2668_v47  ;;  %v2460_v13 = vpack.c.bf16 %v1988_v60, %v1899_v43 }
 0x311   : > { %v1717_v3 = vpop.f32.mrf.mxu1 }
 0x312   : > { %v2685_v55 = vunpack.c.l.bf16 %v2460_v13  ;;  %v2686_v11 = vunpack.c.h.bf16 %v2460_v13  ;;  %v1718_v24 = vadd.f32 %v1717_v3, %v5043_v15 }
 0x313   : > { %v1811_v30 = vpop.f32.mrf.mxu2 }
 0x314   : > { %v2964_v2 = vmax.f32 %v2963_v41, %v2685_v55  ;;  %v2985_v42 = vmax.f32 %v2984_v61, %v2686_v11  ;;  %v2455_v23 = vpack.c.bf16 %v1807_v49, %v1718_v24  ;;  %v1812_v28 = vadd.f32 %v1811_v30, %v5037_v17 }
 0x315   : > { %v1900_v21 = vpop.f32.mrf.mxu3  ;;  %v1992_v7 = vpop.f32.mrf.mxu0 }
 0x316   : > { %v2675_v58 = vunpack.c.l.bf16 %v2455_v23  ;;  %v2676_v62 = vunpack.c.h.bf16 %v2455_v23  ;;  %v1901_v38 = vadd.f32 %v1900_v21, %v5006_v48  ;;  %v1993_v19 = vadd.f32 %v1992_v7, %v5001_v37 }
 0x318   : > { %v2921_v63 = vmax.f32 %v2920_v27, %v2675_v58  ;;  %v2942_v6 = vmax.f32 %v2941_v1, %v2676_v62  ;;  %v2464_v52 = vpack.c.bf16 %v1990_v53, %v1901_v38  ;;  %2129 = vmatmul.bf16.gmra.mxu2 %v4767_v9 }
 0x319   : > { %2307 = vmatmul.bf16.gmra.mxu0 %v4767_v9  ;;  %v1720_v20 = vpop.f32.mrf.mxu1 }
 0x31a   : > { %v2693_v54 = vunpack.c.l.bf16 %v2464_v52  ;;  %v2694_v40 = vunpack.c.h.bf16 %v2464_v52  ;;  %v1721_v5 = vadd.f32 %v1720_v20, %v5043_v15  ;;  %2218 = vmatmul.bf16.gmra.mxu3 %v4767_v9 }
 0x31b   : > { %v1814_v14 = vpop.f32.mrf.mxu2 }
 0x31c   : > { %v2965_v45 = vmax.f32 %v2964_v2, %v2693_v54  ;;  %v2986_v12 = vmax.f32 %v2985_v42, %v2694_v40  ;;  %v2459_v36 = vpack.c.bf16 %v1810_v16, %v1721_v5  ;;  %2035 = vmatmul.bf16.gmra.mxu1 %v4722_v18  ;;  %v1815_v42 = vadd.f32 %v1814_v14, %v5037_v17 }
 0x31d   : > { %v1903_v46 = vpop.f32.mrf.mxu3  ;;  %v1994_v4 = vpop.f32.mrf.mxu0 }
 0x31e   : > { %v2683_v59 = vunpack.c.l.bf16 %v2459_v36  ;;  %v2684_v10 = vunpack.c.h.bf16 %v2459_v36  ;;  %v1904_v0 = vadd.f32 %v1903_v46, %v5006_v48  ;;  %v1995_v13 = vadd.f32 %v1994_v4, %v5001_v37 }
 0x320   : > { %v2922_v26 = vmax.f32 %v2921_v63, %v2683_v59  ;;  %v2943_v32 = vmax.f32 %v2942_v6, %v2684_v10  ;;  %v2468_v41 = vpack.c.bf16 %v1993_v19, %v1904_v0 }
 0x321   : > { %v1722_v61 = vpop.f32.mrf.mxu1 }
 0x322   : > { %v2701_v50 = vunpack.c.l.bf16 %v2468_v41  ;;  %v2702_v39 = vunpack.c.h.bf16 %v2468_v41  ;;  %v1723_v60 = vadd.f32 %v1722_v61, %v5043_v15 }
 0x323   : > { %v1816_v29 = vpop.f32.mrf.mxu2 }
 0x324   : > { %v2966_v18 = vmax.f32 %v2965_v45, %v2701_v50  ;;  %v2987_v47 = vmax.f32 %v2986_v12, %v2702_v39  ;;  %v2463_v43 = vpack.c.bf16 %v1812_v28, %v1723_v60  ;;  %v1817_v12 = vadd.f32 %v1816_v29, %v5037_v17 }
 0x325   : > { %v1905_v27 = vpop.f32.mrf.mxu3  ;;  %v1997_v1 = vpop.f32.mrf.mxu0 }
 0x326   : > { %v2691_v3 = vunpack.c.l.bf16 %v2463_v43  ;;  %v2692_v49 = vunpack.c.h.bf16 %v2463_v43  ;;  %v1906_v55 = vadd.f32 %v1905_v27, %v5006_v48  ;;  %v1998_v52 = vadd.f32 %v1997_v1, %v5001_v37 }
 0x328   : > { %v2923_v11 = vmax.f32 %v2922_v26, %v2691_v3  ;;  %v2944_v24 = vmax.f32 %v2943_v32, %v2692_v49  ;;  %v2472_v2 = vpack.c.bf16 %v1995_v13, %v1906_v55  ;;  %2134 = vmatmul.bf16.gmra.mxu2 %v4799_v22 }
 0x329   : > { %2312 = vmatmul.bf16.gmra.mxu0 %v4799_v22  ;;  %v1725_v30 = vpop.f32.mrf.mxu1 }
 0x32a   : > { %v2709_v23 = vunpack.c.l.bf16 %v2472_v2  ;;  %v2710_v21 = vunpack.c.h.bf16 %v2472_v2  ;;  %v1726_v7 = vadd.f32 %v1725_v30, %v5043_v15  ;;  %2223 = vmatmul.bf16.gmra.mxu3 %v4799_v22 }
 0x32b   : > { %v1819_v53 = vpop.f32.mrf.mxu2 }
 0x32c   : > { %v2967_v58 = vmax.f32 %v2966_v18, %v2709_v23  ;;  %v2988_v62 = vmax.f32 %v2987_v47, %v2710_v21  ;;  %v2467_v38 = vpack.c.bf16 %v1815_v42, %v1726_v7  ;;  %2040 = vmatmul.bf16.gmra.mxu1 %v4767_v9  ;;  %v1820_v18 = vadd.f32 %v1819_v53, %v5037_v17 }
 0x32d   : > { %v1908_v63 = vpop.f32.mrf.mxu3  ;;  %v1999_v6 = vpop.f32.mrf.mxu0 }
 0x32e   : > { %v2699_v20 = vunpack.c.l.bf16 %v2467_v38  ;;  %v2700_v16 = vunpack.c.h.bf16 %v2467_v38  ;;  %v1909_v54 = vadd.f32 %v1908_v63, %v5006_v48  ;;  %v2000_v26 = vadd.f32 %v1999_v6, %v5001_v37 }
 0x330   : > { %v2924_v40 = vmax.f32 %v2923_v11, %v2699_v20  ;;  %v2945_v5 = vmax.f32 %v2944_v24, %v2700_v16  ;;  %v2476_v14 = vpack.c.bf16 %v1998_v52, %v1909_v54 }
 0x331   : > { %v1727_v45 = vpop.f32.mrf.mxu1 }
 0x332   : > { %v2717_v36 = vunpack.c.l.bf16 %v2476_v14  ;;  %v2718_v46 = vunpack.c.h.bf16 %v2476_v14  ;;  %v1728_v4 = vadd.f32 %v1727_v45, %v5043_v15 }
 0x333   : > { %v1821_v19 = vpop.f32.mrf.mxu2 }
 0x334   : > { %v2968_v9 = vmax.f32 %v2967_v58, %v2717_v36  ;;  %v2989_v59 = vmax.f32 %v2988_v62, %v2718_v46  ;;  %v2471_v10 = vpack.c.bf16 %v1817_v12, %v1728_v4  ;;  %v1822_v58 = vadd.f32 %v1821_v19, %v5037_v17 }
 0x335   : > { %v1910_v0 = vpop.f32.mrf.mxu3  ;;  %v2002_v28 = vpop.f32.mrf.mxu0 }
 0x336   : > { %v2707_v32 = vunpack.c.l.bf16 %v2471_v10  ;;  %v2708_v41 = vunpack.c.h.bf16 %v2471_v10  ;;  %v1911_v61 = vadd.f32 %v1910_v0, %v5006_v48  ;;  %v2003_v11 = vadd.f32 %v2002_v28, %v5001_v37 }
 0x338   : > { %v2925_v50 = vmax.f32 %v2924_v40, %v2707_v32  ;;  %v2946_v39 = vmax.f32 %v2945_v5, %v2708_v41  ;;  %v2480_v60 = vpack.c.bf16 %v2000_v26, %v1911_v61  ;;  %2139 = vmatmul.bf16.gmra.mxu2 %v4877_v57 }
 0x339   : > { %2317 = vmatmul.bf16.gmra.mxu0 %v4877_v57  ;;  %v1730_v29 = vpop.f32.mrf.mxu1 }
 0x33a   : > { %v2725_v47 = vunpack.c.l.bf16 %v2480_v60  ;;  %v2726_v43 = vunpack.c.h.bf16 %v2480_v60  ;;  %v1731_v27 = vadd.f32 %v1730_v29, %v5043_v15  ;;  %2228 = vmatmul.bf16.gmra.mxu3 %v4877_v57 }
 0x33b   : > { %v1824_v1 = vpop.f32.mrf.mxu2 }
 0x33c   : > { %v2969_v13 = vmax.f32 %v2968_v9, %v2725_v47  ;;  %v2990_v3 = vmax.f32 %v2989_v59, %v2726_v43  ;;  %v2475_v49 = vpack.c.bf16 %v1820_v18, %v1731_v27  ;;  %2045 = vmatmul.bf16.gmra.mxu1 %v4799_v22  ;;  %v1825_v19 = vadd.f32 %v1824_v1, %v5037_v17 }
 0x33d   : > { %v1913_v55 = vpop.f32.mrf.mxu3  ;;  %v2004_v42 = vpop.f32.mrf.mxu0 }
 0x33e   : > { %v2715_v24 = vunpack.c.l.bf16 %v2475_v49  ;;  %v2716_v2 = vunpack.c.h.bf16 %v2475_v49  ;;  %v1914_v30 = vadd.f32 %v1913_v55, %v5006_v48  ;;  %v2005_v54 = vadd.f32 %v2004_v42, %v5001_v37  ;;  %v3996_v37 = vld [vmem:[%s5785_s6] sm:$0xff] }
 0x33f   : > { %v5399_v26 = vperm.slane %v3996_v37, 6 }
 0x340   : > { %v2926_v23 = vmax.f32 %v2925_v50, %v2715_v24  ;;  %v2947_v21 = vmax.f32 %v2946_v39, %v2716_v2  ;;  %v2484_v7 = vpack.c.bf16 %v2003_v11, %v1914_v30 }
 0x341   : > { %v1732_v53 = vpop.f32.mrf.mxu1 }
 0x342   : > { %v2733_v62 = vunpack.c.l.bf16 %v2484_v7  ;;  %v2734_v38 = vunpack.c.h.bf16 %v2484_v7  ;;  %v1733_v63 = vadd.f32 %v1732_v53, %v5043_v15  ;;  %v5406_v7 = vperm.slane %v3996_v37, 5 }
 0x343   : > { %v1826_v6 = vpop.f32.mrf.mxu2 }
 0x344   : > { %v2970_v22 = vmax.f32 %v2969_v13, %v2733_v62  ;;  %v2991_v52 = vmax.f32 %v2990_v3, %v2734_v38  ;;  %v2479_v20 = vpack.c.bf16 %v1822_v58, %v1733_v63  ;;  %v1827_v11 = vadd.f32 %v1826_v6, %v5037_v17 }
 0x345   : > { %v1915_v16 = vpop.f32.mrf.mxu3  ;;  %v2283_v45 = vpop.f32.mrf.mxu0  ;;  %v5408_v58 = vperm.slane %v3996_v37, 4 }
 0x346   : > { %v2723_v40 = vunpack.c.l.bf16 %v2479_v20  ;;  %v2724_v5 = vunpack.c.h.bf16 %v2479_v20  ;;  %v1916_v14 = vadd.f32 %v1915_v16, %v5006_v48  ;;  %v5397_v48 = vperm.slane %v3996_v37, 7 }
 0x348   : > { %v2927_v12 = vmax.f32 %v2926_v23, %v2723_v40  ;;  %v2948_v36 = vmax.f32 %v2947_v21, %v2724_v5  ;;  %v2488_v46 = vpack.c.bf16 %v2005_v54, %v1916_v14  ;;  %2144 = vmatmul.bf16.gmra.mxu2 %v4966_v35  ;;  %v2284_v47 = vadd.f32 %v2283_v45, %v5397_v48 }
 0x349   : > { %2322 = vmatmul.bf16.gmra.mxu0 %v4966_v35  ;;  %v1735_v4 = vpop.f32.mrf.mxu1 }
 0x34a   : > { %v2741_v9 = vunpack.c.l.bf16 %v2488_v46  ;;  %v2742_v59 = vunpack.c.h.bf16 %v2488_v46  ;;  %v1736_v10 = vadd.f32 %v1735_v4, %v5043_v15  ;;  %2233 = vmatmul.bf16.gmra.mxu3 %v4966_v35 }
 0x34b   : > { %v2105_v0 = vpop.f32.mrf.mxu2 }
 0x34c   : > { %v2971_v32 = vmax.f32 %v2970_v22, %v2741_v9  ;;  %v2992_v41 = vmax.f32 %v2991_v52, %v2742_v59  ;;  %v2483_v61 = vpack.c.bf16 %v1825_v19, %v1736_v10  ;;  %2050 = vmatmul.bf16.gmra.mxu1 %v4877_v57  ;;  %v2106_v40 = vadd.f32 %v2105_v0, %v5406_v7 }
 0x34d   : > { %v2194_v28 = vpop.f32.mrf.mxu3  ;;  %v2285_v18 = vpop.f32.mrf.mxu0 }
 0x34e   : > { %v2972_v50 = vrot.slane %v2971_v32, 4  ;;  %v2993_v39 = vrot.slane %v2992_v41, 4  ;;  %v2731_v60 = vunpack.c.l.bf16 %v2483_v61  ;;  %v2732_v29 = vunpack.c.h.bf16 %v2483_v61 }
 0x34f   : > { %v2195_v43 = vadd.f32 %v2194_v28, %v5399_v26  ;;  %v2286_v17 = vadd.f32 %v2285_v18, %v5397_v48 }
 0x350   : > { %v2973_v27 = vmax.f32 %v2971_v32, %v2972_v50  ;;  %v2994_v1 = vmax.f32 %v2992_v41, %v2993_v39  ;;  %v2928_v13 = vmax.f32 %v2927_v12, %v2731_v60  ;;  %v2949_v3 = vmax.f32 %v2948_v36, %v2732_v29 }
 0x351   : > { %v2366_v49 = vpack.c.bf16 %v2284_v47, %v2195_v43  ;;  %v1737_v55 = vpop.f32.mrf.mxu1 }
 0x352   : > { %v2974_v24 = vrot.slane %v2973_v27, 2  ;;  %v2995_v57 = vrot.slane %v2994_v1, 2  ;;  %v1738_v2 = vadd.f32 %v1737_v55, %v5043_v15 }
 0x353   : > { %v2107_v30 = vpop.f32.mrf.mxu2  ;;  %v2497_v4 = vunpack.c.l.bf16 %v2366_v49  ;;  %v2498_v19 = vunpack.c.h.bf16 %v2366_v49 }
 0x354   : > { %v2975_v42 = vmax.f32 %v2973_v27, %v2974_v24  ;;  %v2996_v23 = vmax.f32 %v2994_v1, %v2995_v57  ;;  %v2487_v21 = vpack.c.bf16 %v1827_v11, %v1738_v2 }
 0x355   : > { %v2196_v53 = vpop.f32.mrf.mxu3 }
 0x356   : > { %v2976_v62 = vrot.slane %v2975_v42, 1  ;;  %v2997_v38 = vrot.slane %v2996_v23, 1  ;;  %v2739_v63 = vunpack.c.l.bf16 %v2487_v21  ;;  %v2740_v22 = vunpack.c.h.bf16 %v2487_v21  ;;  %v2288_v52 = vpop.f32.mrf.mxu0 }
 0x357   : > { %v2197_v6 = vadd.f32 %v2196_v53, %v5399_v26  ;;  %v2289_v60 = vadd.f32 %v2288_v52, %v5397_v48 }
 0x358   : > { %v2977_v20 = vmax.f32 %v2975_v42, %v2976_v62  ;;  %v2998_v15 = vmax.f32 %v2996_v23, %v2997_v38  ;;  %v2929_v16 = vmax.f32 %v2928_v13, %v2739_v63  ;;  %v2950_v54 = vmax.f32 %v2949_v3, %v2740_v22  ;;  %2149 = vmatmul.bf16.gmra.mxu2 %v5040_v33 }
 0x359   : > { %v2370_v5 = vpack.c.bf16 %v2286_v17, %v2197_v6  ;;  %2327 = vmatmul.bf16.gmra.mxu0 %v5040_v33  ;;  %v2016_v14 = vpop.f32.mrf.mxu1 }
 0x35a   : > { %v3088_v45 = vpack.c.bf16 %v2998_v15, %v2977_v20  ;;  %v2930_v12 = vrot.slane %v2929_v16, 4  ;;  %v2951_v36 = vrot.slane %v2950_v54, 4  ;;  %v2017_v46 = vadd.f32 %v2016_v14, %v5408_v58  ;;  %2238 = vmatmul.bf16.gmra.mxu3 %v5040_v33 }
 0x35b   : > { %v2505_v9 = vunpack.c.l.bf16 %v2370_v5  ;;  %v2506_v59 = vunpack.c.h.bf16 %v2370_v5  ;;  %v2110_v10 = vpop.f32.mrf.mxu2 }
 0x35c   : > { %v2931_v37 = vmax.f32 %v2929_v16, %v2930_v12  ;;  %v2952_v32 = vmax.f32 %v2950_v54, %v2951_v36  ;;  %2055 = vmatmul.bf16.gmra.mxu1 %v4966_v35  ;;  %v2365_v61 = vpack.c.bf16 %v2106_v40, %v2017_v46  ;;  %v2108_v35 = vadd.f32 %v2107_v30, %v5406_v7 }
 0x35d   : > { %v2873_v0 = vmax.f32 %v2497_v4, %v2505_v9  ;;  %v2894_v41 = vmax.f32 %v2498_v19, %v2506_v59  ;;  %v2199_v28 = vpop.f32.mrf.mxu3  ;;  %v3111_v21 = vrot.slane %v3088_v45, 6  ;;  %v3112_v53 = vrot.slane %v3088_v45, 1 }
 0x35e   : > { %v2932_v50 = vrot.slane %v2931_v37, 2  ;;  %v2953_v39 = vrot.slane %v2952_v32, 2  ;;  %v2200_v29 = vadd.f32 %v2199_v28, %v5399_v26  ;;  %v2290_v18 = vpop.f32.mrf.mxu0  ;;  %v2495_v6 = vunpack.c.l.bf16 %v2365_v61 }
 0x35f   : > { %v2291_v22 = vadd.f32 %v2290_v18, %v5397_v48  ;;  %v2496_v20 = vunpack.c.h.bf16 %v2365_v61  ;;  %v3144_v40 = vsel %vm3121_vm1, %v3111_v21, %v3112_v53  ;;  %v2111_v5 = vadd.f32 %v2110_v10, %v5406_v7 }
 0x360   : > { %v2933_v47 = vmax.f32 %v2931_v37, %v2932_v50  ;;  %v2954_v43 = vmax.f32 %v2952_v32, %v2953_v39  ;;  %v2374_v27 = vpack.c.bf16 %v2289_v60, %v2200_v29  ;;  %vm3172_vm1 = vsmask.f32 4352 }
 0x361   : > { %v2018_v1 = vpop.f32.mrf.mxu1 }
 0x362   : > { %v2934_v13 = vrot.slane %v2933_v47, 1  ;;  %v2955_v3 = vrot.slane %v2954_v43, 1  ;;  %v2513_v49 = vunpack.c.l.bf16 %v2374_v27  ;;  %v2514_v55 = vunpack.c.h.bf16 %v2374_v27 }
 0x363   : > { %v2019_v11 = vadd.f32 %v2018_v1, %v5408_v58  ;;  %v2112_v24 = vpop.f32.mrf.mxu2 }
 0x364   : > { %v2935_v57 = vmax.f32 %v2933_v47, %v2934_v13  ;;  %v2956_v2 = vmax.f32 %v2954_v43, %v2955_v3  ;;  %v2874_v42 = vmax.f32 %v2873_v0, %v2513_v49  ;;  %v2895_v23 = vmax.f32 %v2894_v41, %v2514_v55 }
 0x365   : > { %v2369_v62 = vpack.c.bf16 %v2108_v35, %v2019_v11  ;;  %v2201_v38 = vpop.f32.mrf.mxu3  ;;  %v2113_v43 = vadd.f32 %v2112_v24, %v5406_v7 }
 0x366   : > { %v3087_v63 = vpack.c.bf16 %v2956_v2, %v2935_v57  ;;  %v2202_v52 = vadd.f32 %v2201_v38, %v5399_v26  ;;  %v2293_v17 = vpop.f32.mrf.mxu0 }
 0x367   : > { %v2503_v30 = vunpack.c.l.bf16 %v2369_v62  ;;  %v2504_v15 = vunpack.c.h.bf16 %v2369_v62  ;;  %v2294_v41 = vadd.f32 %v2293_v17, %v5397_v48 }
 0x368   : > { %v3110_v16 = vrot.slane %v3087_v63, 3  ;;  %v2378_v54 = vpack.c.bf16 %v2291_v22, %v2202_v52  ;;  %2154 = vmatmul.bf16.gmra.mxu2 %v5082_v8 }
 0x369   : > { %v2831_v14 = vmax.f32 %v2495_v6, %v2503_v30  ;;  %v2852_v45 = vmax.f32 %v2496_v20, %v2504_v15  ;;  %2332 = vmatmul.bf16.gmra.mxu0 %v5082_v8  ;;  %v2021_v12 = vpop.f32.mrf.mxu1 }
 0x36a   : > { %v3141_v36 = vsel %vm3117_vm2, %v3087_v63, %v3110_v16  ;;  %v2521_v46 = vunpack.c.l.bf16 %v2378_v54  ;;  %v2522_v4 = vunpack.c.h.bf16 %v2378_v54  ;;  %v2022_v19 = vadd.f32 %v2021_v12, %v5408_v58  ;;  %2243 = vmatmul.bf16.gmra.mxu3 %v5082_v8  ;;  %vm3170_vm2 = vmor %vm5595_vm15, %vm5588_vm14 }
 0x36b   : > { %v5432_v9 = vsel %vm3125_vm3, %v3141_v36, %v3144_v40  ;;  %v2115_v59 = vpop.f32.mrf.mxu2  ;;  %vm3173_vm3 = vmand %vm3127_vm0, %vm3172_vm1  ;;  %vm3135_vm14 = vcmask 1045508  }
 0x36c   : > { %v2875_v37 = vmax.f32 %v2874_v42, %v2521_v46  ;;  %v2896_v32 = vmax.f32 %v2895_v23, %v2522_v4  ;;  %v2373_v10 = vpack.c.bf16 %v2111_v5, %v2022_v19  ;;  %2060 = vmatmul.bf16.gmra.mxu1 %v5040_v33  ;;  %v2116_v21 = vadd.f32 %v2115_v59, %v5406_v7  ;;  %vm5616_vm7 = vmor %vm3173_vm3, %vm3170_vm2 }
 0x36d   : > { %v2204_v0 = vpop.f32.mrf.mxu3  ;;  %vm3178_vm11 = vmor %vm5620_vm8, %vm5616_vm7  ;;  %vm3137_vm2 = vcmask 1043456  }
 0x36e   : > { %v2511_v61 = vunpack.c.l.bf16 %v2373_v10  ;;  %v2512_v28 = vunpack.c.h.bf16 %v2373_v10  ;;  %v2205_v50 = vadd.f32 %v2204_v0, %v5399_v26  ;;  %v5437_v39 = vpop.f32.mrf.mxu0  ;;  %vm5646_vm15 = vmor %vm5625_vm10, %vm3178_vm11 }
 0x36f   : > { %vm5659_vm1 = vmand %vm3183_vm12, %vm3184_vm13 }
 0x370   : > { %v2832_v60 = vmax.f32 %v2831_v14, %v2511_v61  ;;  %v2853_v29 = vmax.f32 %v2852_v45, %v2512_v28  ;;  %v2382_v18 = vpack.c.bf16 %v2294_v41, %v2205_v50  ;;  %vm3186_vm3 = vmor %vm5659_vm1, %vm5646_vm15 }
 0x371   : > { %v2023_v47 = vpop.f32.mrf.mxu1 }
 0x372   : > { %v2529_v27 = vunpack.c.l.bf16 %v2382_v18  ;;  %v2530_v1 = vunpack.c.h.bf16 %v2382_v18  ;;  %v2024_v13 = vadd.f32 %v2023_v47, %v5408_v58 }
 0x373   : > { %v2117_v33 = vpop.f32.mrf.mxu2 }
 0x374   : > { %v5441_v3 = vmax.f32 %v2875_v37, %v2529_v27  ;;  %v5443_v49 = vmax.f32 %v2896_v32, %v2530_v1  ;;  %v2377_v55 = vpack.c.bf16 %v2113_v43, %v2024_v13  ;;  %v2118_v15 = vadd.f32 %v2117_v33, %v5406_v7 }
 0x375   : > { %v2206_v35 = vpop.f32.mrf.mxu3 }
 0x376   : > { %v2519_v11 = vunpack.c.l.bf16 %v2377_v55  ;;  %v2520_v57 = vunpack.c.h.bf16 %v2377_v55  ;;  %v5445_v2 = vpop.f32.mrf.mxu0  ;;  %v2207_v55 = vadd.f32 %v2206_v35, %v5399_v26 }
 0x378   : > { %v2833_v42 = vmax.f32 %v2832_v60, %v2519_v11  ;;  %v2854_v23 = vmax.f32 %v2853_v29, %v2520_v57  ;;  %2159 = vmatmul.bf16.gmra.mxu2 %v5125_v34  ;;  %v2296_v57 = vadd.f32 %v5437_v39, %v5397_v48 }
 0x379   : > { %2337 = vmatmul.bf16.gmra.mxu0 %v5125_v34  ;;  %v2026_v24 = vpop.f32.mrf.mxu1 }
 0x37a   : > { %v2027_v53 = vadd.f32 %v2026_v24, %v5408_v58  ;;  %2248 = vmatmul.bf16.gmra.mxu3 %v5125_v34  ;;  %v2299_v24 = vadd.f32 %v5445_v2, %v5397_v48 }
 0x37b   : > { %v2120_v62 = vpop.f32.mrf.mxu2 }
 0x37c   : > { %v2381_v38 = vpack.c.bf16 %v2116_v21, %v2027_v53  ;;  %2065 = vmatmul.bf16.gmra.mxu1 %v5082_v8  ;;  %v2121_v4 = vadd.f32 %v2120_v62, %v5406_v7 }
 0x37d   : > { %v2209_v63 = vpop.f32.mrf.mxu3 }
 0x37e   : > { %v2527_v22 = vunpack.c.l.bf16 %v2381_v38  ;;  %v2528_v52 = vunpack.c.h.bf16 %v2381_v38  ;;  %v2300_v17 = vpop.f32.mrf.mxu0 }
 0x37f   : > { %v2301_v39 = vadd.f32 %v2300_v17, %v5397_v48 }
 0x380   : > { %v2834_v6 = vmax.f32 %v2833_v42, %v2527_v22  ;;  %v2855_v20 = vmax.f32 %v2854_v23, %v2528_v52  ;;  %v2210_v42 = vadd.f32 %v2209_v63, %v5399_v26  ;;  %v2386_v23 = vpack.c.bf16 %v2296_v57, %v2207_v55 }
 0x381   : > { %v2028_v30 = vpop.f32.mrf.mxu1 }
 0x382   : > { %v2029_v16 = vadd.f32 %v2028_v30, %v5408_v58  ;;  %v2390_v53 = vpack.c.bf16 %v2299_v24, %v2210_v42  ;;  %v2537_v38 = vunpack.c.l.bf16 %v2386_v23 }
 0x383   : > { %v5455_v54 = vpop.f32.mrf.mxu2 }
 0x384   : > { %v2385_v40 = vpack.c.bf16 %v2118_v15, %v2029_v16  ;;  %v2546_v15 = vunpack.c.h.bf16 %v2390_v53  ;;  %v2877_v17 = vmax.f32 %v5441_v3, %v2537_v38 }
 0x385   : > { %v2211_v5 = vpop.f32.mrf.mxu3 }
 0x386   : > { %v2535_v14 = vunpack.c.l.bf16 %v2385_v40  ;;  %v2536_v45 = vunpack.c.h.bf16 %v2385_v40  ;;  %v2303_v12 = vpop.f32.mrf.mxu0  ;;  %v2212_v21 = vadd.f32 %v2211_v5, %v5399_v26 }
 0x387   : > { %v2304_v2 = vadd.f32 %v2303_v12, %v5397_v48 }
 0x388   : > { %v2835_v36 = vmax.f32 %v2834_v6, %v2535_v14  ;;  %v2856_v8 = vmax.f32 %v2855_v20, %v2536_v45  ;;  %2164 = vmatmul.bf16.gmra.mxu2 %v5163_v51  ;;  %v2394_v63 = vpack.c.bf16 %v2301_v39, %v2212_v21  ;;  %v2538_v6 = vunpack.c.h.bf16 %v2386_v23 }
 0x389   : > { %2342 = vmatmul.bf16.gmra.mxu0 %v5163_v51  ;;  %v2031_v46 = vpop.f32.mrf.mxu1  ;;  %v2545_v20 = vunpack.c.l.bf16 %v2390_v53 }
 0x38a   : > { %v2032_v19 = vadd.f32 %v2031_v46, %v5408_v58  ;;  %2253 = vmatmul.bf16.gmra.mxu3 %v5163_v51  ;;  %v2553_v5 = vunpack.c.l.bf16 %v2394_v63  ;;  %v2898_v45 = vmax.f32 %v5443_v49, %v2538_v6 }
 0x38b   : > { %v5462_v59 = vpop.f32.mrf.mxu2  ;;  %v2878_v46 = vmax.f32 %v2877_v17, %v2545_v20 }
 0x38c   : > { %v2389_v37 = vpack.c.bf16 %v2121_v4, %v2032_v19  ;;  %2070 = vmatmul.bf16.gmra.mxu1 %v5125_v34 }
 0x38d   : > { %v2214_v32 = vpop.f32.mrf.mxu3 }
 0x38e   : > { %v2543_v10 = vunpack.c.l.bf16 %v2389_v37  ;;  %v2544_v0 = vunpack.c.h.bf16 %v2389_v37  ;;  %v2305_v41 = vpop.f32.mrf.mxu0  ;;  %v2215_v22 = vadd.f32 %v2214_v32, %v5399_v26  ;;  %v2899_v37 = vmax.f32 %v2898_v45, %v2546_v15 }
 0x390   : > { %v5465_v61 = vmax.f32 %v2835_v36, %v2543_v10  ;;  %v5467_v28 = vmax.f32 %v2856_v8, %v2544_v0  ;;  %v2398_v14 = vpack.c.bf16 %v2304_v2, %v2215_v22  ;;  %v2554_v36 = vunpack.c.h.bf16 %v2394_v63 }
 0x391   : > { %v2033_v50 = vpop.f32.mrf.mxu1  ;;  %v2306_v8 = vadd.f32 %v2305_v41, %v5397_v48  ;;  %v2879_v0 = vmax.f32 %v2878_v46, %v2553_v5 }
 0x392   : > { %v2034_v30 = vadd.f32 %v2033_v50, %v5408_v58  ;;  %v2561_v50 = vunpack.c.l.bf16 %v2398_v14  ;;  %v2562_v55 = vunpack.c.h.bf16 %v2398_v14 }
 0x393   : > { %v5469_v60 = vpop.f32.mrf.mxu2 }
 0x394   : > { %v2880_v38 = vmax.f32 %v2879_v0, %v2561_v50 }
 0x395   : > { %v2216_v29 = vpop.f32.mrf.mxu3 }
 0x396   : > { %v2308_v18 = vpop.f32.mrf.mxu0  ;;  %v2217_v16 = vadd.f32 %v2216_v29, %v5399_v26  ;;  %v2900_v29 = vmax.f32 %v2899_v37, %v2554_v36 }
 0x397   : > { %v2309_v41 = vadd.f32 %v2308_v18, %v5397_v48  ;;  %v2128_v18 = vadd.f32 %v5469_v60, %v5406_v7 }
 0x398   : > { %2169 = vmatmul.bf16.gmra.mxu2 %v5208_v56  ;;  %v2402_v32 = vpack.c.bf16 %v2306_v8, %v2217_v16 }
 0x399   : > { %2347 = vmatmul.bf16.gmra.mxu0 %v5208_v56  ;;  %v2036_v47 = vpop.f32.mrf.mxu1 }
 0x39a   : > { %2258 = vmatmul.bf16.gmra.mxu3 %v5208_v56  ;;  %v2037_v19 = vadd.f32 %v2036_v47, %v5408_v58  ;;  %v2570_v63 = vunpack.c.h.bf16 %v2402_v32 }
 0x39b   : > { %v5474_v34 = vpop.f32.mrf.mxu2 }
 0x39c   : > { %2075 = vmatmul.bf16.gmra.mxu1 %v5163_v51 }
 0x39d   : > { %v2219_v43 = vpop.f32.mrf.mxu3 }
 0x39e   : > { %v2310_v27 = vpop.f32.mrf.mxu0  ;;  %v2220_v3 = vadd.f32 %v2219_v43, %v5399_v26  ;;  %v2569_v43 = vunpack.c.l.bf16 %v2402_v32 }
 0x39f   : > { %v2311_v53 = vadd.f32 %v2310_v27, %v5397_v48 }
 0x3a0   : > { %v2406_v21 = vpack.c.bf16 %v2309_v41, %v2220_v3  ;;  %v2881_v60 = vmax.f32 %v2880_v38, %v2569_v43 }
 0x3a1   : > { %v2038_v1 = vpop.f32.mrf.mxu1 }
 0x3a2   : > { %v2039_v24 = vadd.f32 %v2038_v1, %v5408_v58  ;;  %v2577_v15 = vunpack.c.l.bf16 %v2406_v21  ;;  %v2578_v14 = vunpack.c.h.bf16 %v2406_v21 }
 0x3a3   : > { %v5477_v13 = vpop.f32.mrf.mxu2 }
 0x3a4   : > { %v2882_v37 = vmax.f32 %v2881_v60, %v2577_v15 }
 0x3a5   : > { %v2221_v33 = vpop.f32.mrf.mxu3 }
 0x3a6   : > { %v5480_v11 = vpop.f32.mrf.mxu0  ;;  %v2222_v57 = vadd.f32 %v2221_v33, %v5399_v26  ;;  %v2901_v33 = vmax.f32 %v2900_v29, %v2562_v55 }
 0x3a7   : > { %v2314_v1 = vadd.f32 %v5480_v11, %v5397_v48 }
 0x3a8   : > { %2174 = vmatmul.bf16.gmra.mxu2 %v5255_v44  ;;  %v2410_v22 = vpack.c.bf16 %v2311_v53, %v2222_v57  ;;  %v2902_v5 = vmax.f32 %v2901_v33, %v2570_v63 }
 0x3a9   : > { %2352 = vmatmul.bf16.gmra.mxu0 %v5255_v44  ;;  %v5487_v51 = vpop.f32.mrf.mxu1 }
 0x3aa   : > { %2263 = vmatmul.bf16.gmra.mxu3 %v5255_v44  ;;  %v2585_v8 = vunpack.c.l.bf16 %v2410_v22  ;;  %v2903_v50 = vmax.f32 %v2902_v5, %v2578_v14 }
 0x3ab   : > { %v5493_v35 = vpop.f32.mrf.mxu2 }
 0x3ac   : > { %2080 = vmatmul.bf16.gmra.mxu1 %v5208_v56  ;;  %v2123_v56 = vadd.f32 %v5455_v54, %v5406_v7  ;;  %v2126_v54 = vadd.f32 %v5462_v59, %v5406_v7  ;;  %v2883_v55 = vmax.f32 %v2882_v37, %v2585_v8 }
 0x3ad   : > { %v2224_v62 = vpop.f32.mrf.mxu3 }
 0x3ae   : > { %v2315_v52 = vpop.f32.mrf.mxu0  ;;  %v2393_v4 = vpack.c.bf16 %v2123_v56, %v2034_v30  ;;  %v2397_v47 = vpack.c.bf16 %v2126_v54, %v2037_v19  ;;  %v2225_v59 = vadd.f32 %v2224_v62, %v5399_v26  ;;  %v2401_v30 = vpack.c.bf16 %v2128_v18, %v2039_v24 }
 0x3af   : > { %v2316_v17 = vadd.f32 %v2315_v52, %v5397_v48  ;;  %v2586_v52 = vunpack.c.h.bf16 %v2410_v22 }
 0x3b0   : > { %v2551_v42 = vunpack.c.l.bf16 %v2393_v4  ;;  %v2552_v23 = vunpack.c.h.bf16 %v2393_v4  ;;  %v2559_v2 = vunpack.c.l.bf16 %v2397_v47  ;;  %v2414_v16 = vpack.c.bf16 %v2314_v1, %v2225_v59 }
 0x3b1   : > { %v5501_v40 = vpop.f32.mrf.mxu1  ;;  %v2560_v11 = vunpack.c.h.bf16 %v2397_v47  ;;  %v2131_v4 = vadd.f32 %v5474_v34, %v5406_v7  ;;  %v2567_v19 = vunpack.c.l.bf16 %v2401_v30 }
 0x3b2   : > { %v2837_v27 = vmax.f32 %v5465_v61, %v2551_v42  ;;  %v2858_v62 = vmax.f32 %v5467_v28, %v2552_v23  ;;  %v2042_v61 = vadd.f32 %v5487_v51, %v5408_v58  ;;  %v2593_v32 = vunpack.c.l.bf16 %v2414_v16 }
 0x3b3   : > { %v5508_v12 = vpop.f32.mrf.mxu2  ;;  %v2044_v3 = vadd.f32 %v5501_v40, %v5408_v58  ;;  %v2133_v51 = vadd.f32 %v5477_v13, %v5406_v7  ;;  %v2594_v29 = vunpack.c.h.bf16 %v2414_v16  ;;  %v2904_v23 = vmax.f32 %v2903_v50, %v2586_v52 }
 0x3b4   : > { %v2859_v54 = vmax.f32 %v2858_v62, %v2560_v11  ;;  %v2405_v41 = vpack.c.bf16 %v2131_v4, %v2042_v61  ;;  %v2136_v40 = vadd.f32 %v5493_v35, %v5406_v7  ;;  %v2884_v43 = vmax.f32 %v2883_v55, %v2593_v32 }
 0x3b5   : > { %v2226_v10 = vpop.f32.mrf.mxu3  ;;  %v2409_v21 = vpack.c.bf16 %v2133_v51, %v2044_v3  ;;  %v2905_v13 = vmax.f32 %v2904_v23, %v2594_v29  ;;  %v2138_v15 = vadd.f32 %v5508_v12, %v5406_v7 }
 0x3b6   : > { %v2318_v49 = vpop.f32.mrf.mxu0  ;;  %v2227_v6 = vadd.f32 %v2226_v10, %v5399_v26  ;;  %v2575_v1 = vunpack.c.l.bf16 %v2405_v41 }
 0x3b7   : > { %v2319_v46 = vadd.f32 %v2318_v49, %v5397_v48  ;;  %v2568_v49 = vunpack.c.h.bf16 %v2401_v30  ;;  %v2583_v30 = vunpack.c.l.bf16 %v2409_v21  ;;  %v2584_v60 = vunpack.c.h.bf16 %v2409_v21 }
 0x3b8   : > { %2179 = vmatmul.bf16.gmra.mxu2 %v5003_v25  ;;  %v2418_v28 = vpack.c.bf16 %v2316_v17, %v2227_v6 }
 0x3b9   : > { %v2046_v39 = vpop.f32.mrf.mxu1  ;;  %v2860_v22 = vmax.f32 %v2859_v54, %v2568_v49 }
 0x3ba   : > { %2268 = vmatmul.bf16.gmra.mxu3 %v5003_v25  ;;  %v2601_v57 = vunpack.c.l.bf16 %v2418_v28  ;;  %v2602_v47 = vunpack.c.h.bf16 %v2418_v28  ;;  %v2047_v24 = vadd.f32 %v2046_v39, %v5408_v58  ;;  %v2576_v39 = vunpack.c.h.bf16 %v2405_v41 }
 0x3bb   : > { %v5526_v20 = vpop.f32.mrf.mxu2 }
 0x3bc   : > { %2085 = vmatmul.bf16.gmra.mxu1 %v5255_v44  ;;  %v2838_v44 = vmax.f32 %v2837_v27, %v2559_v2  ;;  %v2885_v6 = vmax.f32 %v2884_v43, %v2601_v57  ;;  %v2906_v62 = vmax.f32 %v2905_v13, %v2602_v47  ;;  %v2413_v2 = vpack.c.bf16 %v2136_v40, %v2047_v24 }
 0x3bd   : > { %v2229_v56 = vpop.f32.mrf.mxu3  ;;  %v2861_v28 = vmax.f32 %v2860_v22, %v2576_v39 }
 0x3be   : > { %v2230_v45 = vadd.f32 %v2229_v56, %v5399_v26  ;;  %v2320_v36 = vpop.f32.mrf.mxu0  ;;  %v2839_v42 = vmax.f32 %v2838_v44, %v2567_v19  ;;  %v2592_v12 = vunpack.c.h.bf16 %v2413_v2 }
 0x3bf   : > { %v2321_v18 = vadd.f32 %v2320_v36, %v5397_v48  ;;  %v2141_v36 = vadd.f32 %v5526_v20, %v5406_v7  ;;  %v2862_v32 = vmax.f32 %v2861_v28, %v2584_v60 }
 0x3c0   : > { %v2422_v10 = vpack.c.bf16 %v2319_v46, %v2230_v45  ;;  %v2840_v45 = vmax.f32 %v2839_v42, %v2575_v1  ;;  %v2591_v46 = vunpack.c.l.bf16 %v2413_v2 }
 0x3c1   : > { %v2048_v0 = vpop.f32.mrf.mxu1  ;;  %v2863_v57 = vmax.f32 %v2862_v32, %v2592_v12 }
 0x3c2   : > { %v2609_v53 = vunpack.c.l.bf16 %v2422_v10  ;;  %v2610_v38 = vunpack.c.h.bf16 %v2422_v10  ;;  %v2049_v27 = vadd.f32 %v2048_v0, %v5408_v58  ;;  %v2841_v37 = vmax.f32 %v2840_v45, %v2583_v30 }
 0x3c3   : > { %v5542_v34 = vpop.f32.mrf.mxu2 }
 0x3c4   : > { %v2886_v16 = vmax.f32 %v2885_v6, %v2609_v53  ;;  %v2907_v56 = vmax.f32 %v2906_v62, %v2610_v38  ;;  %v2417_v8 = vpack.c.bf16 %v2138_v15, %v2049_v27  ;;  %v2842_v29 = vmax.f32 %v2841_v37, %v2591_v46 }
 0x3c5   : > { %v2231_v59 = vpop.f32.mrf.mxu3  ;;  %v2143_v40 = vadd.f32 %v5542_v34, %v5406_v7 }
 0x3c6   : > { %v2232_v63 = vadd.f32 %v2231_v59, %v5399_v26  ;;  %v2323_v33 = vpop.f32.mrf.mxu0  ;;  %v2599_v54 = vunpack.c.l.bf16 %v2417_v8  ;;  %v2600_v20 = vunpack.c.h.bf16 %v2417_v8 }
 0x3c7   : > { %v2324_v50 = vadd.f32 %v2323_v33, %v5397_v48 }
 0x3c8   : > { %v2426_v35 = vpack.c.bf16 %v2321_v18, %v2232_v63  ;;  %2357 = vmatmul.bf16.vlgmr.msrb.gmra.mxu2 %v5003_v25  ;;  %v2843_v13 = vmax.f32 %v2842_v29, %v2599_v54  ;;  %v2864_v38 = vmax.f32 %v2863_v57, %v2600_v20 }
 0x3c9   : > { %v2051_v17 = vpop.f32.mrf.mxu1 }
 0x3ca   : > { %v2617_v5 = vunpack.c.l.bf16 %v2426_v35  ;;  %v2618_v11 = vunpack.c.h.bf16 %v2426_v35  ;;  %v2052_v14 = vadd.f32 %v2051_v17, %v5408_v58 }
 0x3cb   : > { %v2145_v61 = vpop.f32.mrf.mxu2 }
 0x3cc   : > { %v2887_v44 = vmax.f32 %v2886_v16, %v2617_v5  ;;  %v2908_v4 = vmax.f32 %v2907_v56, %v2618_v11  ;;  %2090 = vmatmul.bf16.gmra.mxu1 %v5003_v25  ;;  %v2421_v19 = vpack.c.bf16 %v2141_v36, %v2052_v14  ;;  %v2146_v14 = vadd.f32 %v2145_v61, %v5406_v7 }
 0x3cd   : > { %v2234_v52 = vpop.f32.mrf.mxu3 }
 0x3ce   : > { %v2888_v3 = vrot.slane %v2887_v44, 4  ;;  %v2909_v10 = vrot.slane %v2908_v4, 4  ;;  %v2325_v0 = vpop.f32.mrf.mxu0  ;;  %v2235_v51 = vadd.f32 %v2234_v52, %v5399_v26  ;;  %v2607_v42 = vunpack.c.l.bf16 %v2421_v19 }
 0x3cf   : > { %v2608_v23 = vunpack.c.h.bf16 %v2421_v19  ;;  %v2326_v30 = vadd.f32 %v2325_v0, %v5397_v48 }
 0x3d0   : > { %v2889_v49 = vmax.f32 %v2887_v44, %v2888_v3  ;;  %v2910_v55 = vmax.f32 %v2908_v4, %v2909_v10  ;;  %v2430_v47 = vpack.c.bf16 %v2324_v50, %v2235_v51  ;;  %v2844_v22 = vmax.f32 %v2843_v13, %v2607_v42 }
 0x3d1   : > { %v2053_v24 = vpop.f32.mrf.mxu1  ;;  %v2865_v1 = vmax.f32 %v2864_v38, %v2608_v23 }
 0x3d2   : > { %v2890_v43 = vrot.slane %v2889_v49, 2  ;;  %v2911_v21 = vrot.slane %v2910_v55, 2  ;;  %v2054_v53 = vadd.f32 %v2053_v24, %v5408_v58  ;;  %v2625_v4 = vunpack.c.l.bf16 %v2430_v47 }
 0x3d3   : > { %v5580_v18 = vpop.f32.mrf.mxu2  ;;  %v2626_v12 = vunpack.c.h.bf16 %v2430_v47 }
 0x3d4   : > { %v2891_v34 = vmax.f32 %v2889_v49, %v2890_v43  ;;  %v2912_v63 = vmax.f32 %v2910_v55, %v2911_v21  ;;  %v2425_v33 = vpack.c.bf16 %v2143_v40, %v2054_v53  ;;  %v2148_v53 = vadd.f32 %v5580_v18, %v5406_v7 }
 0x3d5   : > { %v2236_v6 = vpop.f32.mrf.mxu3 }
 0x3d6   : > { %v2892_v27 = vrot.slane %v2891_v34, 1  ;;  %v2913_v39 = vrot.slane %v2912_v63, 1  ;;  %v2615_v62 = vunpack.c.l.bf16 %v2425_v33  ;;  %v2616_v2 = vunpack.c.h.bf16 %v2425_v33  ;;  %v2328_v15 = vpop.f32.mrf.mxu0 }
 0x3d7   : > { %v2237_v60 = vadd.f32 %v2236_v6, %v5399_v26  ;;  %v2329_v51 = vadd.f32 %v2328_v15, %v5397_v48 }
 0x3d8   : > { %v2893_v16 = vmax.f32 %v2891_v34, %v2892_v27  ;;  %v2914_v17 = vmax.f32 %v2912_v63, %v2913_v39  ;;  %v2845_v56 = vmax.f32 %v2844_v22, %v2615_v62  ;;  %v2866_v5 = vmax.f32 %v2865_v1, %v2616_v2 }
 0x3d9   : > { %v2434_v45 = vpack.c.bf16 %v2326_v30, %v2237_v60  ;;  %v2056_v36 = vpop.f32.mrf.mxu1 }
 0x3da   : > { %v5600_v8 = vpack.c.bf16 %v2914_v17, %v2893_v16  ;;  %v2846_v28 = vrot.slane %v2845_v56, 4  ;;  %v2867_v46 = vrot.slane %v2866_v5, 4  ;;  %v2057_v44 = vadd.f32 %v2056_v36, %v5408_v58 }
 0x3db   : > { %v2633_v19 = vunpack.c.l.bf16 %v2434_v45  ;;  %v2634_v52 = vunpack.c.h.bf16 %v2434_v45  ;;  %v2150_v61 = vpop.f32.mrf.mxu2 }
 0x3dc   : > { %v2847_v37 = vmax.f32 %v2845_v56, %v2846_v28  ;;  %v2868_v32 = vmax.f32 %v2866_v5, %v2867_v46  ;;  %v2429_v0 = vpack.c.bf16 %v2146_v14, %v2057_v44  ;;  %v3108_v22 = vrot.slane %v5600_v8, 2  ;;  %v3187_v46 = vld [vmem:[%s5655_s27] sm:$0xff] }
 0x3dd   : > { %v3041_v3 = vmax.f32 %v2625_v4, %v2633_v19  ;;  %v3062_v10 = vmax.f32 %v2626_v12, %v2634_v52  ;;  %v2239_v54 = vpop.f32.mrf.mxu3  ;;  %v3109_v1 = vrot.slane %v5600_v8, 5  ;;  %v2151_v14 = vadd.f32 %v2150_v61, %v5406_v7 }
 0x3de   : > { %v2848_v20 = vrot.slane %v2847_v37, 2  ;;  %v2869_v50 = vrot.slane %v2868_v32, 2  ;;  %v2240_v25 = vadd.f32 %v2239_v54, %v5399_v26  ;;  %v2330_v42 = vpop.f32.mrf.mxu0  ;;  %v2623_v30 = vunpack.c.l.bf16 %v2429_v0 }
 0x3df   : > { %v2331_v62 = vadd.f32 %v2330_v42, %v5397_v48  ;;  %v2624_v60 = vunpack.c.h.bf16 %v2429_v0  ;;  %v3134_v11 = vsel %vm3131_vm9, %v3108_v22, %v3109_v1 }
 0x3e0   : > { %v2849_v49 = vmax.f32 %v2847_v37, %v2848_v20  ;;  %v2870_v55 = vmax.f32 %v2868_v32, %v2869_v50  ;;  %v2438_v57 = vpack.c.bf16 %v2329_v51, %v2240_v25 }
 0x3e1   : > { %v2058_v23 = vpop.f32.mrf.mxu1 }
 0x3e2   : > { %v2850_v24 = vrot.slane %v2849_v49, 1  ;;  %v2871_v40 = vrot.slane %v2870_v55, 1  ;;  %v2641_v43 = vunpack.c.l.bf16 %v2438_v57  ;;  %v2642_v21 = vunpack.c.h.bf16 %v2438_v57 }
 0x3e3   : > { %v2059_v59 = vadd.f32 %v2058_v23, %v5408_v58  ;;  %v2152_v13 = vpop.f32.mrf.mxu2 }
 0x3e4   : > { %v2851_v38 = vmax.f32 %v2849_v49, %v2850_v24  ;;  %v2872_v34 = vmax.f32 %v2870_v55, %v2871_v40  ;;  %v3042_v63 = vmax.f32 %v3041_v3, %v2641_v43  ;;  %v3063_v33 = vmax.f32 %v3062_v10, %v2642_v21 }
 0x3e5   : > { %v2433_v6 = vpack.c.bf16 %v2148_v53, %v2059_v59  ;;  %v2241_v27 = vpop.f32.mrf.mxu3  ;;  %v2153_v41 = vadd.f32 %v2152_v13, %v5406_v7 }
 0x3e6   : > { %v3085_v39 = vpack.c.bf16 %v2872_v34, %v2851_v38  ;;  %v2242_v2 = vadd.f32 %v2241_v27, %v5399_v26  ;;  %v2333_v52 = vpop.f32.mrf.mxu0 }
 0x3e7   : > { %v2631_v15 = vunpack.c.l.bf16 %v2433_v6  ;;  %v2632_v16 = vunpack.c.h.bf16 %v2433_v6  ;;  %v2334_v20 = vadd.f32 %v2333_v52, %v5397_v48 }
 0x3e8   : > { %v3106_v17 = vrot.slane %v3085_v39, 4  ;;  %v3107_v56 = vrot.slane %v3085_v39, 7  ;;  %v2442_v5 = vpack.c.bf16 %v2331_v62, %v2242_v2 }
 0x3e9   : > { %v2999_v45 = vmax.f32 %v2623_v30, %v2631_v15  ;;  %v3020_v36 = vmax.f32 %v2624_v60, %v2632_v16  ;;  %v2061_v8 = vpop.f32.mrf.mxu1 }
 0x3ea   : > { %v3130_v28 = vsel %vm3127_vm0, %v3106_v17, %v3107_v56  ;;  %v2649_v44 = vunpack.c.l.bf16 %v2442_v5  ;;  %v2650_v4 = vunpack.c.h.bf16 %v2442_v5  ;;  %v2062_v12 = vadd.f32 %v2061_v8, %v5408_v58 }
 0x3eb   : > { %v3136_v19 = vsel %vm3135_vm14, %v3130_v28, %v3134_v11  ;;  %v2155_v61 = vpop.f32.mrf.mxu2 }
 0x3ec   : > { %v3138_v37 = vsel %vm3137_vm2, %v5320_v31, %v3136_v19  ;;  %v3043_v32 = vmax.f32 %v3042_v63, %v2649_v44  ;;  %v3064_v3 = vmax.f32 %v3063_v33, %v2650_v4  ;;  %v2437_v10 = vpack.c.bf16 %v2151_v14, %v2062_v12 }
 0x3ed   : > { %v3188_v0 = vsel %vm3186_vm3, %v3138_v37, %v3187_v46  ;;  %v2244_v54 = vpop.f32.mrf.mxu3  ;;  %v2156_v22 = vadd.f32 %v2155_v61, %v5406_v7 }
 0x3ee   : > { %3189 = vst [vmem:[%s5655_s27] sm:$0xff] %v3188_v0  ;;  %v2639_v50 = vunpack.c.l.bf16 %v2437_v10  ;;  %v2640_v51 = vunpack.c.h.bf16 %v2437_v10  ;;  %v2245_v25 = vadd.f32 %v2244_v54, %v5399_v26  ;;  %v2335_v38 = vpop.f32.mrf.mxu0 }
 0x3f0   : > { %v3000_v29 = vmax.f32 %v2999_v45, %v2639_v50  ;;  %v3021_v49 = vmax.f32 %v3020_v36, %v2640_v51  ;;  %v2446_v31 = vpack.c.bf16 %v2334_v20, %v2245_v25 }
 0x3f1   : > { %v2063_v55 = vpop.f32.mrf.mxu1 }
 0x3f2   : > { %v2657_v57 = vunpack.c.l.bf16 %v2446_v31  ;;  %v2658_v42 = vunpack.c.h.bf16 %v2446_v31  ;;  %v2064_v23 = vadd.f32 %v2063_v55, %v5408_v58 }
 0x3f3   : > { %v2157_v47 = vpop.f32.mrf.mxu2 }
 0x3f4   : > { %v5685_v24 = vmax.f32 %v3043_v32, %v2657_v57  ;;  %v5687_v40 = vmax.f32 %v3064_v3, %v2658_v42  ;;  %v2441_v43 = vpack.c.bf16 %v2153_v41, %v2064_v23  ;;  %v2158_v15 = vadd.f32 %v2157_v47, %v5406_v7 }
 0x3f5   : > { %v2246_v21 = vpop.f32.mrf.mxu3 }
 0x3f6   : > { %v2647_v53 = vunpack.c.l.bf16 %v2441_v43  ;;  %v2648_v59 = vunpack.c.h.bf16 %v2441_v43  ;;  %v2338_v16 = vpop.f32.mrf.mxu0 }
 0x3f8   : > { %v3001_v34 = vmax.f32 %v3000_v29, %v2647_v53  ;;  %v3022_v63 = vmax.f32 %v3021_v49, %v2648_v59 }
 0x3f9   : > { %v2066_v33 = vpop.f32.mrf.mxu1 }
 0x3fa   : > { %v2067_v13 = vadd.f32 %v2066_v33, %v5408_v58  ;;  %v2247_v33 = vadd.f32 %v2246_v21, %v5399_v26 }
 0x3fb   : > { %v2160_v1 = vpop.f32.mrf.mxu2 }
 0x3fc   : > { %v2445_v6 = vpack.c.bf16 %v2156_v22, %v2067_v13  ;;  %v2161_v46 = vadd.f32 %v2160_v1, %v5406_v7  ;;  %v2336_v22 = vadd.f32 %v2335_v38, %v5397_v48 }
 0x3fd   : > { %v2249_v27 = vpop.f32.mrf.mxu3 }
 0x3fe   : > { %v2655_v39 = vunpack.c.l.bf16 %v2445_v6  ;;  %v2656_v62 = vunpack.c.h.bf16 %v2445_v6  ;;  %v2340_v12 = vpop.f32.mrf.mxu0  ;;  %v2250_v13 = vadd.f32 %v2249_v27, %v5399_v26  ;;  %v2450_v6 = vpack.c.bf16 %v2336_v22, %v2247_v33 }
 0x400   : > { %v3002_v2 = vmax.f32 %v3001_v34, %v2655_v39  ;;  %v3023_v30 = vmax.f32 %v3022_v63, %v2656_v62  ;;  %v2339_v39 = vadd.f32 %v2338_v16, %v5397_v48  ;;  %v2665_v21 = vunpack.c.l.bf16 %v2450_v6 }
 0x401   : > { %v2068_v60 = vpop.f32.mrf.mxu1 }
 0x402   : > { %v2069_v17 = vadd.f32 %v2068_v60, %v5408_v58 }
 0x403   : > { %v2162_v56 = vpop.f32.mrf.mxu2 }
 0x404   : > { %v2449_v5 = vpack.c.bf16 %v2158_v15, %v2069_v17  ;;  %v2163_v0 = vadd.f32 %v2162_v56, %v5406_v7  ;;  %v2454_v15 = vpack.c.bf16 %v2339_v39, %v2250_v13  ;;  %v2341_v17 = vadd.f32 %v2340_v12, %v5397_v48 }
 0x405   : > { %v2251_v11 = vpop.f32.mrf.mxu3 }
 0x406   : > { %v2663_v14 = vunpack.c.l.bf16 %v2449_v5  ;;  %v2664_v45 = vunpack.c.h.bf16 %v2449_v5  ;;  %v2343_v25 = vpop.f32.mrf.mxu0  ;;  %v2252_v62 = vadd.f32 %v2251_v11, %v5399_v26 }
 0x407   : > { %v2344_v38 = vadd.f32 %v2343_v25, %v5397_v48 }
 0x408   : > { %v3003_v36 = vmax.f32 %v3002_v2, %v2663_v14  ;;  %v3024_v8 = vmax.f32 %v3023_v30, %v2664_v45  ;;  %v2458_v5 = vpack.c.bf16 %v2341_v17, %v2252_v62  ;;  %v2666_v14 = vunpack.c.h.bf16 %v2450_v6 }
 0x409   : > { %v2071_v28 = vpop.f32.mrf.mxu1  ;;  %v2673_v45 = vunpack.c.l.bf16 %v2454_v15 }
 0x40a   : > { %v2072_v44 = vadd.f32 %v2071_v28, %v5408_v58  ;;  %v3045_v28 = vmax.f32 %v5685_v24, %v2665_v21 }
 0x40b   : > { %v2165_v4 = vpop.f32.mrf.mxu2 }
 0x40c   : > { %v2453_v19 = vpack.c.bf16 %v2161_v46, %v2072_v44  ;;  %v2674_v46 = vunpack.c.h.bf16 %v2454_v15  ;;  %v2681_v44 = vunpack.c.l.bf16 %v2458_v5 }
 0x40d   : > { %v2254_v52 = vpop.f32.mrf.mxu3 }
 0x40e   : > { %v2671_v61 = vunpack.c.l.bf16 %v2453_v19  ;;  %v2672_v37 = vunpack.c.h.bf16 %v2453_v19  ;;  %v2345_v23 = vpop.f32.mrf.mxu0  ;;  %v2255_v56 = vadd.f32 %v2254_v52, %v5399_v26  ;;  %v2166_v52 = vadd.f32 %v2165_v4, %v5406_v7 }
 0x40f   : > { %v2346_v11 = vadd.f32 %v2345_v23, %v5397_v48 }
 0x410   : > { %v3004_v32 = vmax.f32 %v3003_v36, %v2671_v61  ;;  %v3025_v3 = vmax.f32 %v3024_v8, %v2672_v37  ;;  %v2462_v16 = vpack.c.bf16 %v2344_v38, %v2255_v56 }
 0x411   : > { %v2073_v10 = vpop.f32.mrf.mxu1 }
 0x412   : > { %v2074_v54 = vadd.f32 %v2073_v10, %v5408_v58  ;;  %v2682_v10 = vunpack.c.h.bf16 %v2458_v5 }
 0x413   : > { %v2167_v20 = vpop.f32.mrf.mxu2 }
 0x414   : > { %v2457_v50 = vpack.c.bf16 %v2163_v0, %v2074_v54  ;;  %v2689_v0 = vunpack.c.l.bf16 %v2462_v16 }
 0x415   : > { %v2256_v51 = vpop.f32.mrf.mxu3 }
 0x416   : > { %v2679_v29 = vunpack.c.l.bf16 %v2457_v50  ;;  %v2680_v49 = vunpack.c.h.bf16 %v2457_v50  ;;  %v2348_v34 = vpop.f32.mrf.mxu0  ;;  %v2257_v27 = vadd.f32 %v2256_v51, %v5399_v26  ;;  %v2168_v50 = vadd.f32 %v2167_v20, %v5406_v7 }
 0x417   : > { %v2349_v24 = vadd.f32 %v2348_v34, %v5397_v48 }
 0x418   : > { %v5697_v31 = vmax.f32 %v3004_v32, %v2679_v29  ;;  %v5699_v55 = vmax.f32 %v3025_v3, %v2680_v49  ;;  %v2466_v12 = vpack.c.bf16 %v2346_v11, %v2257_v27  ;;  %v3066_v32 = vmax.f32 %v5687_v40, %v2666_v14 }
 0x419   : > { %v2076_v41 = vpop.f32.mrf.mxu1  ;;  %v3046_v3 = vmax.f32 %v3045_v28, %v2673_v45 }
 0x41a   : > { %v2077_v8 = vadd.f32 %v2076_v41, %v5408_v58  ;;  %v3067_v29 = vmax.f32 %v3066_v32, %v2674_v46  ;;  %v2690_v41 = vunpack.c.h.bf16 %v2462_v16  ;;  %v2697_v4 = vunpack.c.l.bf16 %v2466_v12 }
 0x41b   : > { %v2170_v57 = vpop.f32.mrf.mxu2  ;;  %v3047_v49 = vmax.f32 %v3046_v3, %v2681_v44  ;;  %v2698_v22 = vunpack.c.h.bf16 %v2466_v12 }
 0x41c   : > { %v2461_v51 = vpack.c.bf16 %v2166_v52, %v2077_v8  ;;  %v3068_v33 = vmax.f32 %v3067_v29, %v2682_v10  ;;  %v2171_v20 = vadd.f32 %v2170_v57, %v5406_v7 }
 0x41d   : > { %v2259_v42 = vpop.f32.mrf.mxu3  ;;  %v3048_v40 = vmax.f32 %v3047_v49, %v2689_v0 }
 0x41e   : > { %v2350_v60 = vpop.f32.mrf.mxu0  ;;  %v2260_v61 = vadd.f32 %v2259_v42, %v5399_v26  ;;  %v2687_v6 = vunpack.c.l.bf16 %v2461_v51  ;;  %v2688_v39 = vunpack.c.h.bf16 %v2461_v51  ;;  %v3069_v62 = vmax.f32 %v3068_v33, %v2690_v41 }
 0x41f   : > { %v3049_v15 = vmax.f32 %v3048_v40, %v2697_v4  ;;  %v2351_v17 = vadd.f32 %v2350_v60, %v5397_v48 }
 0x420   : > { %v2470_v23 = vpack.c.bf16 %v2349_v24, %v2260_v61  ;;  %v3070_v14 = vmax.f32 %v3069_v62, %v2698_v22  ;;  %v3006_v16 = vmax.f32 %v5697_v31, %v2687_v6  ;;  %v3027_v60 = vmax.f32 %v5699_v55, %v2688_v39 }
 0x421   : > { %v2078_v47 = vpop.f32.mrf.mxu1 }
 0x422   : > { %v2079_v37 = vadd.f32 %v2078_v47, %v5408_v58  ;;  %v2705_v5 = vunpack.c.l.bf16 %v2470_v23  ;;  %v2706_v8 = vunpack.c.h.bf16 %v2470_v23 }
 0x423   : > { %v5701_v43 = vpop.f32.mrf.mxu2 }
 0x424   : > { %v2465_v42 = vpack.c.bf16 %v2168_v50, %v2079_v37  ;;  %v2173_v57 = vadd.f32 %v5701_v43, %v5406_v7  ;;  %v3050_v12 = vmax.f32 %v3049_v15, %v2705_v5  ;;  %v3071_v40 = vmax.f32 %v3070_v14, %v2706_v8 }
 0x425   : > { %v2261_v53 = vpop.f32.mrf.mxu3 }
 0x426   : > { %v2353_v25 = vpop.f32.mrf.mxu0  ;;  %v2262_v34 = vadd.f32 %v2261_v53, %v5399_v26  ;;  %v2696_v45 = vunpack.c.h.bf16 %v2465_v42 }
 0x428   : > { %v2474_v11 = vpack.c.bf16 %v2351_v17, %v2262_v34  ;;  %v3028_v37 = vmax.f32 %v3027_v60, %v2696_v45 }
 0x429   : > { %v2081_v59 = vpop.f32.mrf.mxu1 }
 0x42a   : > { %v2082_v47 = vadd.f32 %v2081_v59, %v5408_v58  ;;  %v2695_v59 = vunpack.c.l.bf16 %v2465_v42  ;;  %v2713_v10 = vunpack.c.l.bf16 %v2474_v11  ;;  %v2714_v0 = vunpack.c.h.bf16 %v2474_v11 }
 0x42b   : > { %v5703_v63 = vpop.f32.mrf.mxu2 }
 0x42c   : > { %v2469_v38 = vpack.c.bf16 %v2171_v20, %v2082_v47  ;;  %v2176_v28 = vadd.f32 %v5703_v63, %v5406_v7  ;;  %v3007_v52 = vmax.f32 %v3006_v16, %v2695_v59  ;;  %v3051_v22 = vmax.f32 %v3050_v12, %v2713_v10 }
 0x42d   : > { %v2264_v2 = vpop.f32.mrf.mxu3  ;;  %v3072_v62 = vmax.f32 %v3071_v40, %v2714_v0 }
 0x42e   : > { %v2265_v27 = vadd.f32 %v2264_v2, %v5399_v26  ;;  %v2703_v43 = vunpack.c.l.bf16 %v2469_v38  ;;  %v2704_v63 = vunpack.c.h.bf16 %v2469_v38 }
 0x430   : > { %v3008_v41 = vmax.f32 %v3007_v52, %v2703_v43 }
 0x431   : > { %v2083_v1 = vpop.f32.mrf.mxu1 }
 0x432   : > { %v2084_v56 = vadd.f32 %v2083_v1, %v5408_v58  ;;  %v2354_v1 = vadd.f32 %v2353_v25, %v5397_v48 }
 0x433   : > { %v5710_v30 = vpop.f32.mrf.mxu2 }
 0x434   : > { %v2473_v46 = vpack.c.bf16 %v2173_v57, %v2084_v56  ;;  %v2478_v61 = vpack.c.bf16 %v2354_v1, %v2265_v27  ;;  %v2178_v31 = vadd.f32 %v5710_v30, %v5406_v7 }
 0x435   : > { %v2266_v54 = vpop.f32.mrf.mxu3 }
 0x436   : > { %v2267_v55 = vadd.f32 %v2266_v54, %v5399_v26  ;;  %v2711_v51 = vunpack.c.l.bf16 %v2473_v46  ;;  %v2721_v4 = vunpack.c.l.bf16 %v2478_v61  ;;  %v2712_v30 = vunpack.c.h.bf16 %v2473_v46 }
 0x437   : > { %v2722_v39 = vunpack.c.h.bf16 %v2478_v61 }
 0x438   : > { %v3009_v20 = vmax.f32 %v3008_v41, %v2711_v51  ;;  %v3052_v15 = vmax.f32 %v3051_v22, %v2721_v4 }
 0x439   : > { %v2086_v36 = vpop.f32.mrf.mxu1  ;;  %v3073_v11 = vmax.f32 %v3072_v62, %v2722_v39 }
 0x43a   : > { %v2087_v53 = vadd.f32 %v2086_v36, %v5408_v58  ;;  %v2355_v36 = vpop.f32.mrf.mxu0 }
 0x43b   : > { %v5719_v19 = vpop.f32.mrf.mxu2  ;;  %v2356_v24 = vadd.f32 %v2355_v36, %v5397_v48 }
 0x43c   : > { %v2477_v32 = vpack.c.bf16 %v2176_v28, %v2087_v53  ;;  %v2181_v25 = vadd.f32 %v5719_v19, %v5406_v7 }
 0x43d   : > { %v2269_v2 = vpop.f32.mrf.mxu3  ;;  %v2482_v23 = vpack.c.bf16 %v2356_v24, %v2267_v55 }
 0x43e   : > { %v2719_v42 = vunpack.c.l.bf16 %v2477_v32  ;;  %v2270_v47 = vadd.f32 %v2269_v2, %v5399_v26  ;;  %v2720_v6 = vunpack.c.h.bf16 %v2477_v32 }
 0x43f   : > { %v2729_v5 = vunpack.c.l.bf16 %v2482_v23  ;;  %v2730_v59 = vunpack.c.h.bf16 %v2482_v23 }
 0x440   : > { %v3010_v38 = vmax.f32 %v3009_v20, %v2719_v42 }
 0x441   : > { %v2088_v13 = vpop.f32.mrf.mxu1  ;;  %v3053_v43 = vmax.f32 %v3052_v15, %v2729_v5  ;;  %v3074_v61 = vmax.f32 %v3073_v11, %v2730_v59 }
 0x442   : > { %v2089_v44 = vadd.f32 %v2088_v13, %v5408_v58  ;;  %v3029_v13 = vmax.f32 %v3028_v37, %v2704_v63 }
 0x443   : > { %v5732_v21 = vpop.f32.mrf.mxu2 }
 0x444   : > { %v2481_v29 = vpack.c.bf16 %v2178_v31, %v2089_v44  ;;  %v3030_v17 = vmax.f32 %v3029_v13, %v2712_v30  ;;  %v2183_v14 = vadd.f32 %v5732_v21, %v5406_v7 }
 0x445   : > { %v2271_v27 = vpop.f32.mrf.mxu3 }
 0x446   : > { %v2727_v34 = vunpack.c.l.bf16 %v2481_v29  ;;  %v2728_v56 = vunpack.c.h.bf16 %v2481_v29  ;;  %v3031_v53 = vmax.f32 %v3030_v17, %v2720_v6  ;;  %v2272_v44 = vadd.f32 %v2271_v27, %v5399_v26 }
 0x448   : > { %v3011_v1 = vmax.f32 %v3010_v38, %v2727_v34  ;;  %v3032_v2 = vmax.f32 %v3031_v53, %v2728_v56 }
 0x449   : > { %v2091_v3 = vpop.f32.mrf.mxu1 }
 0x44a   : > { %v2092_v50 = vadd.f32 %v2091_v3, %v5408_v58 }
 0x44b   : > { %v2358_v49 = vpop.f32.mrf.mxu2 }
 0x44c   : > { %v2359_v54 = vadd.f32 %v2358_v49, %v5397_v48  ;;  %v2485_v33 = vpack.c.bf16 %v2181_v25, %v2092_v50 }
 0x44e   : > { %v2486_v19 = vpack.c.bf16 %v2359_v54, %v2270_v47  ;;  %v2735_v45 = vunpack.c.l.bf16 %v2485_v33  ;;  %v2736_v16 = vunpack.c.h.bf16 %v2485_v33 }
 0x450   : > { %v2737_v8 = vunpack.c.l.bf16 %v2486_v19  ;;  %v2738_v28 = vunpack.c.h.bf16 %v2486_v19  ;;  %v3012_v36 = vmax.f32 %v3011_v1, %v2735_v45  ;;  %v3033_v37 = vmax.f32 %v3032_v2, %v2736_v16 }
 0x451   : > { %v2093_v57 = vpop.f32.mrf.mxu1 }
 0x452   : > { %v2094_v60 = vadd.f32 %v2093_v57, %v5408_v58  ;;  %v3054_v55 = vmax.f32 %v3053_v43, %v2737_v8  ;;  %v3075_v58 = vmax.f32 %v3074_v61, %v2738_v28 }
 0x453   : > { %v2360_v46 = vpop.f32.mrf.mxu2 }
 0x454   : > { %v2489_v12 = vpack.c.bf16 %v2183_v14, %v2094_v60  ;;  %v2361_v52 = vadd.f32 %v2360_v46, %v5397_v48  ;;  %v3190_v14 = vld [vmem:[%s5655_s27 + $0x8] sm:$0xff] }
 0x456   : > { %v2743_v31 = vunpack.c.l.bf16 %v2489_v12  ;;  %v2744_v7 = vunpack.c.h.bf16 %v2489_v12  ;;  %v2490_v21 = vpack.c.bf16 %v2361_v52, %v2272_v44 }
 0x458   : > { %v3013_v32 = vmax.f32 %v3012_v36, %v2743_v31  ;;  %v3034_v3 = vmax.f32 %v3033_v37, %v2744_v7  ;;  %v2745_v10 = vunpack.c.l.bf16 %v2490_v21  ;;  %v2746_v0 = vunpack.c.h.bf16 %v2490_v21 }
 0x45a   : > { %v3014_v63 = vrot.slane %v3013_v32, 4  ;;  %v3035_v50 = vrot.slane %v3034_v3, 4  ;;  %v3055_v24 = vmax.f32 %v3054_v55, %v2745_v10  ;;  %v3076_v26 = vmax.f32 %v3075_v58, %v2746_v0 }
 0x45c   : > { %v3015_v51 = vmax.f32 %v3013_v32, %v3014_v63  ;;  %v3036_v25 = vmax.f32 %v3034_v3, %v3035_v50  ;;  %v3056_v48 = vrot.slane %v3055_v24, 4  ;;  %v3077_v29 = vrot.slane %v3076_v26, 4 }
 0x45e   : > { %v3016_v49 = vrot.slane %v3015_v51, 2  ;;  %v3037_v41 = vrot.slane %v3036_v25, 2  ;;  %v3057_v4 = vmax.f32 %v3055_v24, %v3056_v48  ;;  %v3078_v30 = vmax.f32 %v3076_v26, %v3077_v29 }
 0x460   : > { %v3017_v54 = vmax.f32 %v3015_v51, %v3016_v49  ;;  %v3038_v23 = vmax.f32 %v3036_v25, %v3037_v41  ;;  %v3058_v42 = vrot.slane %v3057_v4, 2  ;;  %v3079_v47 = vrot.slane %v3078_v30, 2 }
 0x462   : > { %v3018_v33 = vrot.slane %v3017_v54, 1  ;;  %v3039_v40 = vrot.slane %v3038_v23, 1  ;;  %v3059_v22 = vmax.f32 %v3057_v4, %v3058_v42  ;;  %v3080_v13 = vmax.f32 %v3078_v30, %v3079_v47 }
 0x464   : > { %v3019_v6 = vmax.f32 %v3017_v54, %v3018_v33  ;;  %v3040_v39 = vmax.f32 %v3038_v23, %v3039_v40  ;;  %v3060_v20 = vrot.slane %v3059_v22, 1  ;;  %v3081_v34 = vrot.slane %v3080_v13, 1 }
 0x466   : > { %v3089_v19 = vpack.c.bf16 %v3040_v39, %v3019_v6  ;;  %v3061_v62 = vmax.f32 %v3059_v22, %v3060_v20  ;;  %v3082_v15 = vmax.f32 %v3080_v13, %v3081_v34 }
 0x468   : > { %v3113_v17 = vrot.slane %v3089_v19, 4  ;;  %v3114_v56 = vrot.slane %v3089_v19, 7  ;;  %v3090_v5 = vpack.c.bf16 %v3082_v15, %v3061_v62 }
 0x46a   : > { %v3115_v59 = vrot.slane %v3090_v5, 2  ;;  %v3116_v38 = vrot.slane %v3090_v5, 5  ;;  %v3148_v27 = vsel %vm3127_vm0, %v3113_v17, %v3114_v56 }
 0x46c   : > { %v3151_v45 = vsel %vm3131_vm9, %v3115_v59, %v3116_v38 }
 0x46d   : > { %v3152_v57 = vsel %vm3135_vm14, %v3148_v27, %v3151_v45 }
 0x46e   : > { %v3153_v53 = vsel %vm3137_vm2, %v5432_v9, %v3152_v57 }
 0x46f   : > { %v3191_v16 = vsel %vm3186_vm3, %v3153_v53, %v3190_v14 }
 0x470   : > { %3192 = vst [vmem:[%s5655_s27 + $0x8] sm:$0xff] %v3191_v16 }
 0x471 PF: > { %s18_s26 = sadd.s32 1, %s4053_s26   ;;  %s5807_s24 = smov %s4049_s25 }
 0x472   : > { %p15_p8 = scmp.ge.s32.totalorder %s18_s26, 4   ;;  %s5808_s25 = smov %s5810_s28 }
 0x474   :  { %17 = sbr.rel (!%p15_p8) target bundleno = 2 (0x2), region = 91 }
 0x479   :  { %3430 = vsyncpa [#allocation3], 1 }
 0x47a   :  { %3432 = vsyncpa [#allocation3 + $0x1], 1 }

</bundles_post_ra>
